<compile_context>
chip_gen: v6e
topology: v6e:2x2x1
jax: 0.10.0
libtpu: 0.0.40
codegen_flags: <defaults>
</compile_context>

<pallas_src>
import functools

import jax
import jax.numpy as jnp
from jax import lax
from jax.experimental import pallas as pl
from jax.experimental.pallas import tpu as pltpu


# ----------------------------------------------------------------------------
# Fused kernel: one grid step == one batch element (full HxW, channels-last)
# ----------------------------------------------------------------------------
def _bottleneck_kernel(x_ref, w1_ref, t1_ref, w2_ref, t2_ref, w3_ref, t3_ref,
                       o_ref):
    _, H, W, Cin = x_ref.shape
    width = w1_ref.shape[1]
    cout = w3_ref.shape[1]
    HW = H * W
    cdtype = x_ref.dtype

    x2d = x_ref[0].reshape(HW, Cin)                    # channels-last rows

    # ---- stage 1: 1x1 conv (BN1 scale folded into w1) + shift + ReLU
    y1 = jnp.dot(x2d, w1_ref[...], preferred_element_type=jnp.float32)
    y1 = jnp.maximum(y1 + t1_ref[...], 0.0).astype(cdtype)

    # ---- stage 2: 3x3 conv (pad=1) as 9 shifted + masked matmuls.
    # Output row r = h*W + w takes tap (dy, dx) from flat row r + (dy-1)*W+(dx-1)
    # whenever (h+dy-1, w+dx-1) is inside the image; invalid rows are masked.
    hh = lax.broadcasted_iota(jnp.int32, (H, W, 1), 0).reshape(HW, 1)
    ww = lax.broadcasted_iota(jnp.int32, (H, W, 1), 1).reshape(HW, 1)
    npad = W + 1                                       # covers any tap shift
    zpad = jnp.zeros((npad, width), cdtype)
    y1e = jnp.concatenate([zpad, y1, zpad], axis=0)    # keeps slices in-bounds

    acc = jnp.zeros((HW, width), jnp.float32)
    for dy in range(3):
        for dx in range(3):
            off = (dy - 1) * W + (dx - 1)
            src = y1e[npad + off:npad + off + HW, :]
            valid = ((hh + (dy - 1) >= 0) & (hh + (dy - 1) < H) &
                     (ww + (dx - 1) >= 0) & (ww + (dx - 1) < W))
            src = jnp.where(valid, src, jnp.zeros_like(src))
            acc = acc + jnp.dot(src, w2_ref[dy * 3 + dx],
                                preferred_element_type=jnp.float32)
    y2 = jnp.maximum(acc + t2_ref[...], 0.0).astype(cdtype)

    # ---- stage 3: 1x1 conv (BN3 folded) + residual add + ReLU
    y3 = jnp.dot(y2, w3_ref[...], preferred_element_type=jnp.float32)
    y3 = y3 + t3_ref[...] + x2d.astype(jnp.float32)
    o_ref[0] = jnp.maximum(y3, 0.0).reshape(H, W, cout).astype(o_ref.dtype)


# ----------------------------------------------------------------------------
# Helpers / wrappers
# ----------------------------------------------------------------------------
def _fold_bn(bn, eps=1e-5):
    scale = bn["gamma"] / jnp.sqrt(bn["var"] + eps)
    shift = bn["beta"] - bn["mean"] * scale
    return (scale.reshape(1, -1).astype(jnp.float32),
            shift.reshape(1, -1).astype(jnp.float32))


def bottleneck_forward_nhwc(x, params, *, stride=1, compute_dtype=None):
    """Fused Bottleneck forward on NHWC input (eval-mode BN folded)."""
    B, H, W, Cin = x.shape
    w1, w2, w3 = params["w1"], params["w2"], params["w3"]
    width = w1.shape[0]
    cout = w3.shape[0]

    assert stride == 1, "downsample=None path requires stride == 1"
    assert Cin == cout, "residual add requires in_channel == out_channel * 4"
    assert w2.shape == (width, width, 3, 3), "groups != 1 not supported"

    cdtype = jnp.dtype(compute_dtype) if compute_dtype is not None else x.dtype

    s1, t1 = _fold_bn(params["bn1"])
    s2, t2 = _fold_bn(params["bn2"])
    s3, t3 = _fold_bn(params["bn3"])

    # Fold BN scale into the matmul weights (scale is per output channel).
    w1_mat = (w1.reshape(width, Cin).T * s1).astype(cdtype)        # (Cin, width)
    w2_mat = (w2.transpose(2, 3, 1, 0) * s2).reshape(
        9, width, width).astype(cdtype)                            # (9, wi, wo)
    w3_mat = (w3.reshape(cout, width).T * s3).astype(cdtype)       # (width, cout)

    xc = x.astype(cdtype)

    # VMEM budget estimate (x/out double-buffered + weights + f32 intermediates),
    # capped at 64 MiB so it is valid on v7x as well.
    isz = jnp.dtype(cdtype).itemsize
    x_blk = H * W * Cin * isz
    o_blk = H * W * cout * isz
    wts = (Cin * width + 9 * width * width + width * cout) * isz \
        + 4 * (2 * width + cout)
    interm = H * W * (4 * width * 4 + 2 * cout * 4)
    vmem_limit = int(min(max(2 * (2 * (x_blk + o_blk) + wts + interm),
                             16 * 1024 * 1024), 64 * 1024 * 1024))

    flops = 2 * B * H * W * (Cin * width + 9 * width * width + width * cout)
    bytes_accessed = B * (x_blk + o_blk) + wts

    return pl.pallas_call(
        _bottleneck_kernel,
        out_shape=jax.ShapeDtypeStruct((B, H, W, cout), x.dtype),
        grid=(B,),
        in_specs=[
            pl.BlockSpec((1, H, W, Cin), lambda b: (b, 0, 0, 0)),
            pl.BlockSpec((Cin, width), lambda b: (0, 0)),        # VMEM-resident
            pl.BlockSpec((1, width), lambda b: (0, 0)),
            pl.BlockSpec((9, width, width), lambda b: (0, 0, 0)),
            pl.BlockSpec((1, width), lambda b: (0, 0)),
            pl.BlockSpec((width, cout), lambda b: (0, 0)),
            pl.BlockSpec((1, cout), lambda b: (0, 0)),
        ],
        out_specs=pl.BlockSpec((1, H, W, cout), lambda b: (b, 0, 0, 0)),
        compiler_params=pltpu.CompilerParams(
            dimension_semantics=("parallel",),
            vmem_limit_bytes=vmem_limit),
        cost_estimate=pl.CostEstimate(
            flops=flops, transcendentals=0, bytes_accessed=bytes_accessed),
    )(xc, w1_mat, t1, w2_mat, t2, w3_mat, t3)


@functools.partial(jax.jit, static_argnames=("stride", "compute_dtype"))
def bottleneck_forward(x, params, *, stride=1, compute_dtype=None):
    """NCHW (PyTorch-layout) entry point.

    x: (B, Cin, H, W); params: w1/w2/w3 (OIHW, no bias) + bn1/bn2/bn3 dicts
    {gamma, beta, mean, var}.
    """
    # TODO(synk): if the caller can produce/consume NHWC directly, call
    # bottleneck_forward_nhwc and drop these two full-tensor transposes.
    x_nhwc = x.transpose(0, 2, 3, 1)
    out = bottleneck_forward_nhwc(x_nhwc, params, stride=stride,
                                  compute_dtype=compute_dtype)
    return out.transpose(0, 3, 1, 2)


# ----------------------------------------------------------------------------
# Pure-JAX reference (conv-based)
# ----------------------------------------------------------------------------
def _reference(x, params, *, stride=1, eps=1e-5):
    def bn(y, p):
        inv = p["gamma"] / jnp.sqrt(p["var"] + eps)
        return (y * inv.reshape(1, -1, 1, 1)
                + (p["beta"] - p["mean"] * inv).reshape(1, -1, 1, 1))

    conv = functools.partial(
        lax.conv_general_dilated,
        dimension_numbers=("NCHW", "OIHW", "NCHW"),
        precision=lax.Precision.HIGHEST)

    out = jax.nn.relu(bn(conv(x, params["w1"], window_strides=(1, 1),
                              padding="VALID"), params["bn1"]))
    out = jax.nn.relu(bn(conv(out, params["w2"],
                              window_strides=(stride, stride),
                              padding=((1, 1), (1, 1))), params["bn2"]))
    out = bn(conv(out, params["w3"], window_strides=(1, 1),
                  padding="VALID"), params["bn3"])
    return jax.nn.relu(out + x)


# ----------------------------------------------------------------------------
if __name__ == "__main__":
    # in_channel must equal out_channel * expansion (=4) for the identity add.
    B, Cin, H, W = 2, 32, 16, 16
    out_channel = 8
    width = out_channel                       # groups=1, width_per_group=64
    cout = out_channel * 4                    # expansion = 4  -> 32 == Cin

    key = jax.random.PRNGKey(0)
    ks = jax.random.split(key, 7)

    def bn_params(k, c):
        k1, k2, k3, k4 = jax.random.split(k, 4)
        return dict(
            gamma=1.0 + 0.1 * jax.random.normal(k1, (c,), jnp.float32),
            beta=0.1 * jax.random.normal(k2, (c,), jnp.float32),
            mean=0.1 * jax.random.normal(k3, (c,), jnp.float32),
            var=jax.random.uniform(k4, (c,), jnp.float32, 0.5, 1.5),
        )

    x = jax.random.normal(ks[0], (B, Cin, H, W), dtype=jnp.float32)
    params = dict(
        w1=0.1 * jax.random.normal(ks[1], (width, Cin, 1, 1), jnp.float32),
        bn1=bn_params(ks[2], width),
        w2=0.1 * jax.random.normal(ks[3], (width, width, 3, 3), jnp.float32),
        bn2=bn_params(ks[4], width),
        w3=0.1 * jax.random.normal(ks[5], (cout, width, 1, 1), jnp.float32),
        bn3=bn_params(ks[6], cout),
    )

    out = bottleneck_forward(x, params, stride=1)
    out = jax.block_until_ready(out)

    ref = _reference(x, params, stride=1)
    assert out.shape == ref.shape == (B, cout, H, W), (out.shape, ref.shape)
    max_diff = jnp.max(jnp.abs(out - ref))
    assert jnp.allclose(out, ref, atol=1e-3, rtol=1e-3), (
        f"mismatch vs reference, max abs diff {max_diff}")

    print("KERNEL_OK")
</pallas_src>

<mosaic_0001>
module attributes {stable_mosaic.version = 11 : i64} {
  func.func @_bottleneck_kernel(%arg0: i32, %arg1: memref<1x16x16x32xf32, #tpu.memory_space<vmem>>, %arg2: memref<32x8xf32, #tpu.memory_space<vmem>>, %arg3: memref<1x8xf32, #tpu.memory_space<vmem>>, %arg4: memref<9x8x8xf32, #tpu.memory_space<vmem>>, %arg5: memref<1x8xf32, #tpu.memory_space<vmem>>, %arg6: memref<8x32xf32, #tpu.memory_space<vmem>>, %arg7: memref<1x32xf32, #tpu.memory_space<vmem>>, %arg8: memref<1x16x16x32xf32, #tpu.memory_space<vmem>>) attributes {dimension_semantics = [#tpu.dimension_semantics<parallel>], iteration_bounds = array<i64: 2>, scalar_prefetch = 0 : i64, scratch_operands = 0 : i64, tpu.core_type = #tpu.core_type<tc>, window_params = [{transform_indices = @transform_0, window_bounds = array<i64: 1, 16, 16, 32>}, {pipeline_mode = #tpu.pipeline_mode<synchronous>, transform_indices = @transform_1, window_bounds = array<i64: 32, 8>}, {pipeline_mode = #tpu.pipeline_mode<synchronous>, transform_indices = @transform_2, window_bounds = array<i64: 1, 8>}, {pipeline_mode = #tpu.pipeline_mode<synchronous>, transform_indices = @transform_3, window_bounds = array<i64: 9, 8, 8>}, {pipeline_mode = #tpu.pipeline_mode<synchronous>, transform_indices = @transform_4, window_bounds = array<i64: 1, 8>}, {pipeline_mode = #tpu.pipeline_mode<synchronous>, transform_indices = @transform_5, window_bounds = array<i64: 8, 32>}, {pipeline_mode = #tpu.pipeline_mode<synchronous>, transform_indices = @transform_6, window_bounds = array<i64: 1, 32>}, {transform_indices = @transform_7, window_bounds = array<i64: 1, 16, 16, 32>}]} {
    %c0 = arith.constant 0 : index
    %c0_0 = arith.constant 0 : index
    %c0_1 = arith.constant 0 : index
    %c0_2 = arith.constant 0 : index
    %0 = vector.load %arg1[%c0, %c0_0, %c0_1, %c0_2] : memref<1x16x16x32xf32, #tpu.memory_space<vmem>>, vector<1x16x16x32xf32>
    %1 = vector.shape_cast %0 : vector<1x16x16x32xf32> to vector<16x16x32xf32>
    %2 = vector.shape_cast %1 : vector<16x16x32xf32> to vector<256x32xf32>
    %c0_3 = arith.constant 0 : index
    %c0_4 = arith.constant 0 : index
    %3 = vector.load %arg2[%c0_3, %c0_4] : memref<32x8xf32, #tpu.memory_space<vmem>>, vector<32x8xf32>
    %cst = arith.constant dense<0.000000e+00> : vector<256x8xf32>
    %4 = tpu.matmul %2, %3, %cst {dimension_numbers = #tpu.dot_dimension_numbers<[1], [0], [0], [1], [0, 0, 1, 1], [], []>} : vector<256x32xf32>, vector<32x8xf32>, vector<256x8xf32> -> vector<256x8xf32>
    %c0_5 = arith.constant 0 : index
    %c0_6 = arith.constant 0 : index
    %5 = vector.load %arg3[%c0_5, %c0_6] : memref<1x8xf32, #tpu.memory_space<vmem>>, vector<1x8xf32>
    %6 = vector.broadcast %5 : vector<1x8xf32> to vector<256x8xf32>
    %7 = arith.addf %4, %6 : vector<256x8xf32>
    %cst_7 = arith.constant 0.000000e+00 : f32
    %8 = vector.broadcast %cst_7 : f32 to vector<256x8xf32>
    %9 = arith.maximumf %7, %8 : vector<256x8xf32>
    %10 = tpu.iota {dimensions = array<i32: 0>} : vector<16x16x1xi32>
    %11 = vector.shape_cast %10 : vector<16x16x1xi32> to vector<256x1xi32>
    %12 = tpu.iota {dimensions = array<i32: 1>} : vector<16x16x1xi32>
    %13 = vector.shape_cast %12 : vector<16x16x1xi32> to vector<256x1xi32>
    %cst_8 = arith.constant 0.000000e+00 : f32
    %14 = vector.broadcast %cst_8 : f32 to vector<17x8xf32>
    %15 = tpu.concatenate %14, %9, %14 in 0 : vector<17x8xf32>, vector<256x8xf32>, vector<17x8xf32> -> vector<290x8xf32>
    %cst_9 = arith.constant 0.000000e+00 : f32
    %16 = vector.broadcast %cst_9 : f32 to vector<256x8xf32>
    %17 = vector.extract_strided_slice %15 {offsets = [0, 0], sizes = [256, 8], strides = [1, 1]} : vector<290x8xf32> to vector<256x8xf32>
    %c-1_i32 = arith.constant -1 : i32
    %18 = vector.broadcast %c-1_i32 : i32 to vector<256x1xi32>
    %19 = arith.addi %11, %18 : vector<256x1xi32>
    %c0_i32 = arith.constant 0 : i32
    %20 = vector.broadcast %c0_i32 : i32 to vector<256x1xi32>
    %21 = arith.cmpi sge, %19, %20 : vector<256x1xi32>
    %c-1_i32_10 = arith.constant -1 : i32
    %22 = vector.broadcast %c-1_i32_10 : i32 to vector<256x1xi32>
    %23 = arith.addi %11, %22 : vector<256x1xi32>
    %c16_i32 = arith.constant 16 : i32
    %24 = vector.broadcast %c16_i32 : i32 to vector<256x1xi32>
    %25 = arith.cmpi slt, %23, %24 : vector<256x1xi32>
    %26 = arith.andi %21, %25 : vector<256x1xi1>
    %c-1_i32_11 = arith.constant -1 : i32
    %27 = vector.broadcast %c-1_i32_11 : i32 to vector<256x1xi32>
    %28 = arith.addi %13, %27 : vector<256x1xi32>
    %c0_i32_12 = arith.constant 0 : i32
    %29 = vector.broadcast %c0_i32_12 : i32 to vector<256x1xi32>
    %30 = arith.cmpi sge, %28, %29 : vector<256x1xi32>
    %31 = arith.andi %26, %30 : vector<256x1xi1>
    %c-1_i32_13 = arith.constant -1 : i32
    %32 = vector.broadcast %c-1_i32_13 : i32 to vector<256x1xi32>
    %33 = arith.addi %13, %32 : vector<256x1xi32>
    %c16_i32_14 = arith.constant 16 : i32
    %34 = vector.broadcast %c16_i32_14 : i32 to vector<256x1xi32>
    %35 = arith.cmpi slt, %33, %34 : vector<256x1xi32>
    %36 = arith.andi %31, %35 : vector<256x1xi1>
    %cst_15 = arith.constant 0.000000e+00 : f32
    %37 = vector.broadcast %cst_15 : f32 to vector<256x8xf32>
    %38 = vector.shape_cast %36 : vector<256x1xi1> to vector<256x1xi1>
    %39 = vector.broadcast %38 : vector<256x1xi1> to vector<256x8xi1>
    %40 = arith.select %39, %17, %37 : vector<256x8xi1>, vector<256x8xf32>
    %c0_16 = arith.constant 0 : index
    %c0_17 = arith.constant 0 : index
    %c0_18 = arith.constant 0 : index
    %41 = vector.load %arg4[%c0_16, %c0_17, %c0_18] : memref<9x8x8xf32, #tpu.memory_space<vmem>>, vector<1x8x8xf32>
    %42 = vector.shape_cast %41 : vector<1x8x8xf32> to vector<8x8xf32>
    %cst_19 = arith.constant dense<0.000000e+00> : vector<256x8xf32>
    %43 = tpu.matmul %40, %42, %cst_19 {dimension_numbers = #tpu.dot_dimension_numbers<[1], [0], [0], [1], [0, 0, 1, 1], [], []>} : vector<256x8xf32>, vector<8x8xf32>, vector<256x8xf32> -> vector<256x8xf32>
    %44 = arith.addf %16, %43 : vector<256x8xf32>
    %45 = vector.extract_strided_slice %15 {offsets = [1, 0], sizes = [256, 8], strides = [1, 1]} : vector<290x8xf32> to vector<256x8xf32>
    %c-1_i32_20 = arith.constant -1 : i32
    %46 = vector.broadcast %c-1_i32_20 : i32 to vector<256x1xi32>
    %47 = arith.addi %11, %46 : vector<256x1xi32>
    %c0_i32_21 = arith.constant 0 : i32
    %48 = vector.broadcast %c0_i32_21 : i32 to vector<256x1xi32>
    %49 = arith.cmpi sge, %47, %48 : vector<256x1xi32>
    %c-1_i32_22 = arith.constant -1 : i32
    %50 = vector.broadcast %c-1_i32_22 : i32 to vector<256x1xi32>
    %51 = arith.addi %11, %50 : vector<256x1xi32>
    %c16_i32_23 = arith.constant 16 : i32
    %52 = vector.broadcast %c16_i32_23 : i32 to vector<256x1xi32>
    %53 = arith.cmpi slt, %51, %52 : vector<256x1xi32>
    %54 = arith.andi %49, %53 : vector<256x1xi1>
    %c0_i32_24 = arith.constant 0 : i32
    %55 = vector.broadcast %c0_i32_24 : i32 to vector<256x1xi32>
    %56 = arith.addi %13, %55 : vector<256x1xi32>
    %c0_i32_25 = arith.constant 0 : i32
    %57 = vector.broadcast %c0_i32_25 : i32 to vector<256x1xi32>
    %58 = arith.cmpi sge, %56, %57 : vector<256x1xi32>
    %59 = arith.andi %54, %58 : vector<256x1xi1>
    %c0_i32_26 = arith.constant 0 : i32
    %60 = vector.broadcast %c0_i32_26 : i32 to vector<256x1xi32>
    %61 = arith.addi %13, %60 : vector<256x1xi32>
    %c16_i32_27 = arith.constant 16 : i32
    %62 = vector.broadcast %c16_i32_27 : i32 to vector<256x1xi32>
    %63 = arith.cmpi slt, %61, %62 : vector<256x1xi32>
    %64 = arith.andi %59, %63 : vector<256x1xi1>
    %cst_28 = arith.constant 0.000000e+00 : f32
    %65 = vector.broadcast %cst_28 : f32 to vector<256x8xf32>
    %66 = vector.shape_cast %64 : vector<256x1xi1> to vector<256x1xi1>
    %67 = vector.broadcast %66 : vector<256x1xi1> to vector<256x8xi1>
    %68 = arith.select %67, %45, %65 : vector<256x8xi1>, vector<256x8xf32>
    %c1 = arith.constant 1 : index
    %c0_29 = arith.constant 0 : index
    %c0_30 = arith.constant 0 : index
    %69 = vector.load %arg4[%c1, %c0_29, %c0_30] : memref<9x8x8xf32, #tpu.memory_space<vmem>>, vector<1x8x8xf32>
    %70 = vector.shape_cast %69 : vector<1x8x8xf32> to vector<8x8xf32>
    %cst_31 = arith.constant dense<0.000000e+00> : vector<256x8xf32>
    %71 = tpu.matmul %68, %70, %cst_31 {dimension_numbers = #tpu.dot_dimension_numbers<[1], [0], [0], [1], [0, 0, 1, 1], [], []>} : vector<256x8xf32>, vector<8x8xf32>, vector<256x8xf32> -> vector<256x8xf32>
    %72 = arith.addf %44, %71 : vector<256x8xf32>
    %73 = vector.extract_strided_slice %15 {offsets = [2, 0], sizes = [256, 8], strides = [1, 1]} : vector<290x8xf32> to vector<256x8xf32>
    %c-1_i32_32 = arith.constant -1 : i32
    %74 = vector.broadcast %c-1_i32_32 : i32 to vector<256x1xi32>
    %75 = arith.addi %11, %74 : vector<256x1xi32>
    %c0_i32_33 = arith.constant 0 : i32
    %76 = vector.broadcast %c0_i32_33 : i32 to vector<256x1xi32>
    %77 = arith.cmpi sge, %75, %76 : vector<256x1xi32>
    %c-1_i32_34 = arith.constant -1 : i32
    %78 = vector.broadcast %c-1_i32_34 : i32 to vector<256x1xi32>
    %79 = arith.addi %11, %78 : vector<256x1xi32>
    %c16_i32_35 = arith.constant 16 : i32
    %80 = vector.broadcast %c16_i32_35 : i32 to vector<256x1xi32>
    %81 = arith.cmpi slt, %79, %80 : vector<256x1xi32>
    %82 = arith.andi %77, %81 : vector<256x1xi1>
    %c1_i32 = arith.constant 1 : i32
    %83 = vector.broadcast %c1_i32 : i32 to vector<256x1xi32>
    %84 = arith.addi %13, %83 : vector<256x1xi32>
    %c0_i32_36 = arith.constant 0 : i32
    %85 = vector.broadcast %c0_i32_36 : i32 to vector<256x1xi32>
    %86 = arith.cmpi sge, %84, %85 : vector<256x1xi32>
    %87 = arith.andi %82, %86 : vector<256x1xi1>
    %c1_i32_37 = arith.constant 1 : i32
    %88 = vector.broadcast %c1_i32_37 : i32 to vector<256x1xi32>
    %89 = arith.addi %13, %88 : vector<256x1xi32>
    %c16_i32_38 = arith.constant 16 : i32
    %90 = vector.broadcast %c16_i32_38 : i32 to vector<256x1xi32>
    %91 = arith.cmpi slt, %89, %90 : vector<256x1xi32>
    %92 = arith.andi %87, %91 : vector<256x1xi1>
    %cst_39 = arith.constant 0.000000e+00 : f32
    %93 = vector.broadcast %cst_39 : f32 to vector<256x8xf32>
    %94 = vector.shape_cast %92 : vector<256x1xi1> to vector<256x1xi1>
    %95 = vector.broadcast %94 : vector<256x1xi1> to vector<256x8xi1>
    %96 = arith.select %95, %73, %93 : vector<256x8xi1>, vector<256x8xf32>
    %c2 = arith.constant 2 : index
    %c0_40 = arith.constant 0 : index
    %c0_41 = arith.constant 0 : index
    %97 = vector.load %arg4[%c2, %c0_40, %c0_41] : memref<9x8x8xf32, #tpu.memory_space<vmem>>, vector<1x8x8xf32>
    %98 = vector.shape_cast %97 : vector<1x8x8xf32> to vector<8x8xf32>
    %cst_42 = arith.constant dense<0.000000e+00> : vector<256x8xf32>
    %99 = tpu.matmul %96, %98, %cst_42 {dimension_numbers = #tpu.dot_dimension_numbers<[1], [0], [0], [1], [0, 0, 1, 1], [], []>} : vector<256x8xf32>, vector<8x8xf32>, vector<256x8xf32> -> vector<256x8xf32>
    %100 = arith.addf %72, %99 : vector<256x8xf32>
    %101 = vector.extract_strided_slice %15 {offsets = [16, 0], sizes = [256, 8], strides = [1, 1]} : vector<290x8xf32> to vector<256x8xf32>
    %c0_i32_43 = arith.constant 0 : i32
    %102 = vector.broadcast %c0_i32_43 : i32 to vector<256x1xi32>
    %103 = arith.addi %11, %102 : vector<256x1xi32>
    %c0_i32_44 = arith.constant 0 : i32
    %104 = vector.broadcast %c0_i32_44 : i32 to vector<256x1xi32>
    %105 = arith.cmpi sge, %103, %104 : vector<256x1xi32>
    %c0_i32_45 = arith.constant 0 : i32
    %106 = vector.broadcast %c0_i32_45 : i32 to vector<256x1xi32>
    %107 = arith.addi %11, %106 : vector<256x1xi32>
    %c16_i32_46 = arith.constant 16 : i32
    %108 = vector.broadcast %c16_i32_46 : i32 to vector<256x1xi32>
    %109 = arith.cmpi slt, %107, %108 : vector<256x1xi32>
    %110 = arith.andi %105, %109 : vector<256x1xi1>
    %c-1_i32_47 = arith.constant -1 : i32
    %111 = vector.broadcast %c-1_i32_47 : i32 to vector<256x1xi32>
    %112 = arith.addi %13, %111 : vector<256x1xi32>
    %c0_i32_48 = arith.constant 0 : i32
    %113 = vector.broadcast %c0_i32_48 : i32 to vector<256x1xi32>
    %114 = arith.cmpi sge, %112, %113 : vector<256x1xi32>
    %115 = arith.andi %110, %114 : vector<256x1xi1>
    %c-1_i32_49 = arith.constant -1 : i32
    %116 = vector.broadcast %c-1_i32_49 : i32 to vector<256x1xi32>
    %117 = arith.addi %13, %116 : vector<256x1xi32>
    %c16_i32_50 = arith.constant 16 : i32
    %118 = vector.broadcast %c16_i32_50 : i32 to vector<256x1xi32>
    %119 = arith.cmpi slt, %117, %118 : vector<256x1xi32>
    %120 = arith.andi %115, %119 : vector<256x1xi1>
    %cst_51 = arith.constant 0.000000e+00 : f32
    %121 = vector.broadcast %cst_51 : f32 to vector<256x8xf32>
    %122 = vector.shape_cast %120 : vector<256x1xi1> to vector<256x1xi1>
    %123 = vector.broadcast %122 : vector<256x1xi1> to vector<256x8xi1>
    %124 = arith.select %123, %101, %121 : vector<256x8xi1>, vector<256x8xf32>
    %c3 = arith.constant 3 : index
    %c0_52 = arith.constant 0 : index
    %c0_53 = arith.constant 0 : index
    %125 = vector.load %arg4[%c3, %c0_52, %c0_53] : memref<9x8x8xf32, #tpu.memory_space<vmem>>, vector<1x8x8xf32>
    %126 = vector.shape_cast %125 : vector<1x8x8xf32> to vector<8x8xf32>
    %cst_54 = arith.constant dense<0.000000e+00> : vector<256x8xf32>
    %127 = tpu.matmul %124, %126, %cst_54 {dimension_numbers = #tpu.dot_dimension_numbers<[1], [0], [0], [1], [0, 0, 1, 1], [], []>} : vector<256x8xf32>, vector<8x8xf32>, vector<256x8xf32> -> vector<256x8xf32>
    %128 = arith.addf %100, %127 : vector<256x8xf32>
    %129 = vector.extract_strided_slice %15 {offsets = [17, 0], sizes = [256, 8], strides = [1, 1]} : vector<290x8xf32> to vector<256x8xf32>
    %c0_i32_55 = arith.constant 0 : i32
    %130 = vector.broadcast %c0_i32_55 : i32 to vector<256x1xi32>
    %131 = arith.addi %11, %130 : vector<256x1xi32>
    %c0_i32_56 = arith.constant 0 : i32
    %132 = vector.broadcast %c0_i32_56 : i32 to vector<256x1xi32>
    %133 = arith.cmpi sge, %131, %132 : vector<256x1xi32>
    %c0_i32_57 = arith.constant 0 : i32
    %134 = vector.broadcast %c0_i32_57 : i32 to vector<256x1xi32>
    %135 = arith.addi %11, %134 : vector<256x1xi32>
    %c16_i32_58 = arith.constant 16 : i32
    %136 = vector.broadcast %c16_i32_58 : i32 to vector<256x1xi32>
    %137 = arith.cmpi slt, %135, %136 : vector<256x1xi32>
    %138 = arith.andi %133, %137 : vector<256x1xi1>
    %c0_i32_59 = arith.constant 0 : i32
    %139 = vector.broadcast %c0_i32_59 : i32 to vector<256x1xi32>
    %140 = arith.addi %13, %139 : vector<256x1xi32>
    %c0_i32_60 = arith.constant 0 : i32
    %141 = vector.broadcast %c0_i32_60 : i32 to vector<256x1xi32>
    %142 = arith.cmpi sge, %140, %141 : vector<256x1xi32>
    %143 = arith.andi %138, %142 : vector<256x1xi1>
    %c0_i32_61 = arith.constant 0 : i32
    %144 = vector.broadcast %c0_i32_61 : i32 to vector<256x1xi32>
    %145 = arith.addi %13, %144 : vector<256x1xi32>
    %c16_i32_62 = arith.constant 16 : i32
    %146 = vector.broadcast %c16_i32_62 : i32 to vector<256x1xi32>
    %147 = arith.cmpi slt, %145, %146 : vector<256x1xi32>
    %148 = arith.andi %143, %147 : vector<256x1xi1>
    %cst_63 = arith.constant 0.000000e+00 : f32
    %149 = vector.broadcast %cst_63 : f32 to vector<256x8xf32>
    %150 = vector.shape_cast %148 : vector<256x1xi1> to vector<256x1xi1>
    %151 = vector.broadcast %150 : vector<256x1xi1> to vector<256x8xi1>
    %152 = arith.select %151, %129, %149 : vector<256x8xi1>, vector<256x8xf32>
    %c4 = arith.constant 4 : index
    %c0_64 = arith.constant 0 : index
    %c0_65 = arith.constant 0 : index
    %153 = vector.load %arg4[%c4, %c0_64, %c0_65] : memref<9x8x8xf32, #tpu.memory_space<vmem>>, vector<1x8x8xf32>
    %154 = vector.shape_cast %153 : vector<1x8x8xf32> to vector<8x8xf32>
    %cst_66 = arith.constant dense<0.000000e+00> : vector<256x8xf32>
    %155 = tpu.matmul %152, %154, %cst_66 {dimension_numbers = #tpu.dot_dimension_numbers<[1], [0], [0], [1], [0, 0, 1, 1], [], []>} : vector<256x8xf32>, vector<8x8xf32>, vector<256x8xf32> -> vector<256x8xf32>
    %156 = arith.addf %128, %155 : vector<256x8xf32>
    %157 = vector.extract_strided_slice %15 {offsets = [18, 0], sizes = [256, 8], strides = [1, 1]} : vector<290x8xf32> to vector<256x8xf32>
    %c0_i32_67 = arith.constant 0 : i32
    %158 = vector.broadcast %c0_i32_67 : i32 to vector<256x1xi32>
    %159 = arith.addi %11, %158 : vector<256x1xi32>
    %c0_i32_68 = arith.constant 0 : i32
    %160 = vector.broadcast %c0_i32_68 : i32 to vector<256x1xi32>
    %161 = arith.cmpi sge, %159, %160 : vector<256x1xi32>
    %c0_i32_69 = arith.constant 0 : i32
    %162 = vector.broadcast %c0_i32_69 : i32 to vector<256x1xi32>
    %163 = arith.addi %11, %162 : vector<256x1xi32>
    %c16_i32_70 = arith.constant 16 : i32
    %164 = vector.broadcast %c16_i32_70 : i32 to vector<256x1xi32>
    %165 = arith.cmpi slt, %163, %164 : vector<256x1xi32>
    %166 = arith.andi %161, %165 : vector<256x1xi1>
    %c1_i32_71 = arith.constant 1 : i32
    %167 = vector.broadcast %c1_i32_71 : i32 to vector<256x1xi32>
    %168 = arith.addi %13, %167 : vector<256x1xi32>
    %c0_i32_72 = arith.constant 0 : i32
    %169 = vector.broadcast %c0_i32_72 : i32 to vector<256x1xi32>
    %170 = arith.cmpi sge, %168, %169 : vector<256x1xi32>
    %171 = arith.andi %166, %170 : vector<256x1xi1>
    %c1_i32_73 = arith.constant 1 : i32
    %172 = vector.broadcast %c1_i32_73 : i32 to vector<256x1xi32>
    %173 = arith.addi %13, %172 : vector<256x1xi32>
    %c16_i32_74 = arith.constant 16 : i32
    %174 = vector.broadcast %c16_i32_74 : i32 to vector<256x1xi32>
    %175 = arith.cmpi slt, %173, %174 : vector<256x1xi32>
    %176 = arith.andi %171, %175 : vector<256x1xi1>
    %cst_75 = arith.constant 0.000000e+00 : f32
    %177 = vector.broadcast %cst_75 : f32 to vector<256x8xf32>
    %178 = vector.shape_cast %176 : vector<256x1xi1> to vector<256x1xi1>
    %179 = vector.broadcast %178 : vector<256x1xi1> to vector<256x8xi1>
    %180 = arith.select %179, %157, %177 : vector<256x8xi1>, vector<256x8xf32>
    %c5 = arith.constant 5 : index
    %c0_76 = arith.constant 0 : index
    %c0_77 = arith.constant 0 : index
    %181 = vector.load %arg4[%c5, %c0_76, %c0_77] : memref<9x8x8xf32, #tpu.memory_space<vmem>>, vector<1x8x8xf32>
    %182 = vector.shape_cast %181 : vector<1x8x8xf32> to vector<8x8xf32>
    %cst_78 = arith.constant dense<0.000000e+00> : vector<256x8xf32>
    %183 = tpu.matmul %180, %182, %cst_78 {dimension_numbers = #tpu.dot_dimension_numbers<[1], [0], [0], [1], [0, 0, 1, 1], [], []>} : vector<256x8xf32>, vector<8x8xf32>, vector<256x8xf32> -> vector<256x8xf32>
    %184 = arith.addf %156, %183 : vector<256x8xf32>
    %185 = vector.extract_strided_slice %15 {offsets = [32, 0], sizes = [256, 8], strides = [1, 1]} : vector<290x8xf32> to vector<256x8xf32>
    %c1_i32_79 = arith.constant 1 : i32
    %186 = vector.broadcast %c1_i32_79 : i32 to vector<256x1xi32>
    %187 = arith.addi %11, %186 : vector<256x1xi32>
    %c0_i32_80 = arith.constant 0 : i32
    %188 = vector.broadcast %c0_i32_80 : i32 to vector<256x1xi32>
    %189 = arith.cmpi sge, %187, %188 : vector<256x1xi32>
    %c1_i32_81 = arith.constant 1 : i32
    %190 = vector.broadcast %c1_i32_81 : i32 to vector<256x1xi32>
    %191 = arith.addi %11, %190 : vector<256x1xi32>
    %c16_i32_82 = arith.constant 16 : i32
    %192 = vector.broadcast %c16_i32_82 : i32 to vector<256x1xi32>
    %193 = arith.cmpi slt, %191, %192 : vector<256x1xi32>
    %194 = arith.andi %189, %193 : vector<256x1xi1>
    %c-1_i32_83 = arith.constant -1 : i32
    %195 = vector.broadcast %c-1_i32_83 : i32 to vector<256x1xi32>
    %196 = arith.addi %13, %195 : vector<256x1xi32>
    %c0_i32_84 = arith.constant 0 : i32
    %197 = vector.broadcast %c0_i32_84 : i32 to vector<256x1xi32>
    %198 = arith.cmpi sge, %196, %197 : vector<256x1xi32>
    %199 = arith.andi %194, %198 : vector<256x1xi1>
    %c-1_i32_85 = arith.constant -1 : i32
    %200 = vector.broadcast %c-1_i32_85 : i32 to vector<256x1xi32>
    %201 = arith.addi %13, %200 : vector<256x1xi32>
    %c16_i32_86 = arith.constant 16 : i32
    %202 = vector.broadcast %c16_i32_86 : i32 to vector<256x1xi32>
    %203 = arith.cmpi slt, %201, %202 : vector<256x1xi32>
    %204 = arith.andi %199, %203 : vector<256x1xi1>
    %cst_87 = arith.constant 0.000000e+00 : f32
    %205 = vector.broadcast %cst_87 : f32 to vector<256x8xf32>
    %206 = vector.shape_cast %204 : vector<256x1xi1> to vector<256x1xi1>
    %207 = vector.broadcast %206 : vector<256x1xi1> to vector<256x8xi1>
    %208 = arith.select %207, %185, %205 : vector<256x8xi1>, vector<256x8xf32>
    %c6 = arith.constant 6 : index
    %c0_88 = arith.constant 0 : index
    %c0_89 = arith.constant 0 : index
    %209 = vector.load %arg4[%c6, %c0_88, %c0_89] : memref<9x8x8xf32, #tpu.memory_space<vmem>>, vector<1x8x8xf32>
    %210 = vector.shape_cast %209 : vector<1x8x8xf32> to vector<8x8xf32>
    %cst_90 = arith.constant dense<0.000000e+00> : vector<256x8xf32>
    %211 = tpu.matmul %208, %210, %cst_90 {dimension_numbers = #tpu.dot_dimension_numbers<[1], [0], [0], [1], [0, 0, 1, 1], [], []>} : vector<256x8xf32>, vector<8x8xf32>, vector<256x8xf32> -> vector<256x8xf32>
    %212 = arith.addf %184, %211 : vector<256x8xf32>
    %213 = vector.extract_strided_slice %15 {offsets = [33, 0], sizes = [256, 8], strides = [1, 1]} : vector<290x8xf32> to vector<256x8xf32>
    %c1_i32_91 = arith.constant 1 : i32
    %214 = vector.broadcast %c1_i32_91 : i32 to vector<256x1xi32>
    %215 = arith.addi %11, %214 : vector<256x1xi32>
    %c0_i32_92 = arith.constant 0 : i32
    %216 = vector.broadcast %c0_i32_92 : i32 to vector<256x1xi32>
    %217 = arith.cmpi sge, %215, %216 : vector<256x1xi32>
    %c1_i32_93 = arith.constant 1 : i32
    %218 = vector.broadcast %c1_i32_93 : i32 to vector<256x1xi32>
    %219 = arith.addi %11, %218 : vector<256x1xi32>
    %c16_i32_94 = arith.constant 16 : i32
    %220 = vector.broadcast %c16_i32_94 : i32 to vector<256x1xi32>
    %221 = arith.cmpi slt, %219, %220 : vector<256x1xi32>
    %222 = arith.andi %217, %221 : vector<256x1xi1>
    %c0_i32_95 = arith.constant 0 : i32
    %223 = vector.broadcast %c0_i32_95 : i32 to vector<256x1xi32>
    %224 = arith.addi %13, %223 : vector<256x1xi32>
    %c0_i32_96 = arith.constant 0 : i32
    %225 = vector.broadcast %c0_i32_96 : i32 to vector<256x1xi32>
    %226 = arith.cmpi sge, %224, %225 : vector<256x1xi32>
    %227 = arith.andi %222, %226 : vector<256x1xi1>
    %c0_i32_97 = arith.constant 0 : i32
    %228 = vector.broadcast %c0_i32_97 : i32 to vector<256x1xi32>
    %229 = arith.addi %13, %228 : vector<256x1xi32>
    %c16_i32_98 = arith.constant 16 : i32
    %230 = vector.broadcast %c16_i32_98 : i32 to vector<256x1xi32>
    %231 = arith.cmpi slt, %229, %230 : vector<256x1xi32>
    %232 = arith.andi %227, %231 : vector<256x1xi1>
    %cst_99 = arith.constant 0.000000e+00 : f32
    %233 = vector.broadcast %cst_99 : f32 to vector<256x8xf32>
    %234 = vector.shape_cast %232 : vector<256x1xi1> to vector<256x1xi1>
    %235 = vector.broadcast %234 : vector<256x1xi1> to vector<256x8xi1>
    %236 = arith.select %235, %213, %233 : vector<256x8xi1>, vector<256x8xf32>
    %c7 = arith.constant 7 : index
    %c0_100 = arith.constant 0 : index
    %c0_101 = arith.constant 0 : index
    %237 = vector.load %arg4[%c7, %c0_100, %c0_101] : memref<9x8x8xf32, #tpu.memory_space<vmem>>, vector<1x8x8xf32>
    %238 = vector.shape_cast %237 : vector<1x8x8xf32> to vector<8x8xf32>
    %cst_102 = arith.constant dense<0.000000e+00> : vector<256x8xf32>
    %239 = tpu.matmul %236, %238, %cst_102 {dimension_numbers = #tpu.dot_dimension_numbers<[1], [0], [0], [1], [0, 0, 1, 1], [], []>} : vector<256x8xf32>, vector<8x8xf32>, vector<256x8xf32> -> vector<256x8xf32>
    %240 = arith.addf %212, %239 : vector<256x8xf32>
    %241 = vector.extract_strided_slice %15 {offsets = [34, 0], sizes = [256, 8], strides = [1, 1]} : vector<290x8xf32> to vector<256x8xf32>
    %c1_i32_103 = arith.constant 1 : i32
    %242 = vector.broadcast %c1_i32_103 : i32 to vector<256x1xi32>
    %243 = arith.addi %11, %242 : vector<256x1xi32>
    %c0_i32_104 = arith.constant 0 : i32
    %244 = vector.broadcast %c0_i32_104 : i32 to vector<256x1xi32>
    %245 = arith.cmpi sge, %243, %244 : vector<256x1xi32>
    %c1_i32_105 = arith.constant 1 : i32
    %246 = vector.broadcast %c1_i32_105 : i32 to vector<256x1xi32>
    %247 = arith.addi %11, %246 : vector<256x1xi32>
    %c16_i32_106 = arith.constant 16 : i32
    %248 = vector.broadcast %c16_i32_106 : i32 to vector<256x1xi32>
    %249 = arith.cmpi slt, %247, %248 : vector<256x1xi32>
    %250 = arith.andi %245, %249 : vector<256x1xi1>
    %c1_i32_107 = arith.constant 1 : i32
    %251 = vector.broadcast %c1_i32_107 : i32 to vector<256x1xi32>
    %252 = arith.addi %13, %251 : vector<256x1xi32>
    %c0_i32_108 = arith.constant 0 : i32
    %253 = vector.broadcast %c0_i32_108 : i32 to vector<256x1xi32>
    %254 = arith.cmpi sge, %252, %253 : vector<256x1xi32>
    %255 = arith.andi %250, %254 : vector<256x1xi1>
    %c1_i32_109 = arith.constant 1 : i32
    %256 = vector.broadcast %c1_i32_109 : i32 to vector<256x1xi32>
    %257 = arith.addi %13, %256 : vector<256x1xi32>
    %c16_i32_110 = arith.constant 16 : i32
    %258 = vector.broadcast %c16_i32_110 : i32 to vector<256x1xi32>
    %259 = arith.cmpi slt, %257, %258 : vector<256x1xi32>
    %260 = arith.andi %255, %259 : vector<256x1xi1>
    %cst_111 = arith.constant 0.000000e+00 : f32
    %261 = vector.broadcast %cst_111 : f32 to vector<256x8xf32>
    %262 = vector.shape_cast %260 : vector<256x1xi1> to vector<256x1xi1>
    %263 = vector.broadcast %262 : vector<256x1xi1> to vector<256x8xi1>
    %264 = arith.select %263, %241, %261 : vector<256x8xi1>, vector<256x8xf32>
    %c8 = arith.constant 8 : index
    %c0_112 = arith.constant 0 : index
    %c0_113 = arith.constant 0 : index
    %265 = vector.load %arg4[%c8, %c0_112, %c0_113] : memref<9x8x8xf32, #tpu.memory_space<vmem>>, vector<1x8x8xf32>
    %266 = vector.shape_cast %265 : vector<1x8x8xf32> to vector<8x8xf32>
    %cst_114 = arith.constant dense<0.000000e+00> : vector<256x8xf32>
    %267 = tpu.matmul %264, %266, %cst_114 {dimension_numbers = #tpu.dot_dimension_numbers<[1], [0], [0], [1], [0, 0, 1, 1], [], []>} : vector<256x8xf32>, vector<8x8xf32>, vector<256x8xf32> -> vector<256x8xf32>
    %268 = arith.addf %240, %267 : vector<256x8xf32>
    %c0_115 = arith.constant 0 : index
    %c0_116 = arith.constant 0 : index
    %269 = vector.load %arg5[%c0_115, %c0_116] : memref<1x8xf32, #tpu.memory_space<vmem>>, vector<1x8xf32>
    %270 = vector.broadcast %269 : vector<1x8xf32> to vector<256x8xf32>
    %271 = arith.addf %268, %270 : vector<256x8xf32>
    %cst_117 = arith.constant 0.000000e+00 : f32
    %272 = vector.broadcast %cst_117 : f32 to vector<256x8xf32>
    %273 = arith.maximumf %271, %272 : vector<256x8xf32>
    %c0_118 = arith.constant 0 : index
    %c0_119 = arith.constant 0 : index
    %274 = vector.load %arg6[%c0_118, %c0_119] : memref<8x32xf32, #tpu.memory_space<vmem>>, vector<8x32xf32>
    %cst_120 = arith.constant dense<0.000000e+00> : vector<256x32xf32>
    %275 = tpu.matmul %273, %274, %cst_120 {dimension_numbers = #tpu.dot_dimension_numbers<[1], [0], [0], [1], [0, 0, 1, 1], [], []>} : vector<256x8xf32>, vector<8x32xf32>, vector<256x32xf32> -> vector<256x32xf32>
    %c0_121 = arith.constant 0 : index
    %c0_122 = arith.constant 0 : index
    %276 = vector.load %arg7[%c0_121, %c0_122] : memref<1x32xf32, #tpu.memory_space<vmem>>, vector<1x32xf32>
    %277 = vector.broadcast %276 : vector<1x32xf32> to vector<256x32xf32>
    %278 = arith.addf %275, %277 : vector<256x32xf32>
    %279 = arith.addf %278, %2 : vector<256x32xf32>
    %cst_123 = arith.constant 0.000000e+00 : f32
    %280 = vector.broadcast %cst_123 : f32 to vector<256x32xf32>
    %281 = arith.maximumf %279, %280 : vector<256x32xf32>
    %282 = vector.shape_cast %281 : vector<256x32xf32> to vector<16x16x32xf32>
    %c0_124 = arith.constant 0 : index
    %c0_125 = arith.constant 0 : index
    %c0_126 = arith.constant 0 : index
    %c0_127 = arith.constant 0 : index
    %283 = vector.load %arg8[%c0_124, %c0_125, %c0_126, %c0_127] : memref<1x16x16x32xf32, #tpu.memory_space<vmem>>, vector<1x16x16x32xf32>
    %284 = vector.shape_cast %283 : vector<1x16x16x32xf32> to vector<16x16x32xf32>
    %285 = vector.shape_cast %282 : vector<16x16x32xf32> to vector<1x16x16x32xf32>
    tpu.vector_store %arg8[%c0_124, %c0_125, %c0_126, %c0_127], %285 {strides = array<i32>} : memref<1x16x16x32xf32, #tpu.memory_space<vmem>>, vector<1x16x16x32xf32>,
    return
  }
  func.func @transform_0(%arg0: i32) -> (i32, i32, i32, i32) {
    %c0_i32 = arith.constant 0 : i32
    %c0_i32_0 = arith.constant 0 : i32
    %c0_i32_1 = arith.constant 0 : i32
    %c0_i32_2 = arith.constant 0 : i32
    return %arg0, %c0_i32, %c0_i32_0, %c0_i32_1 : i32, i32, i32, i32
  }
  func.func @transform_1(%arg0: i32) -> (i32, i32) {
    %c0_i32 = arith.constant 0 : i32
    %c0_i32_0 = arith.constant 0 : i32
    %c0_i32_1 = arith.constant 0 : i32
    return %c0_i32, %c0_i32_0 : i32, i32
  }
  func.func @transform_2(%arg0: i32) -> (i32, i32) {
    %c0_i32 = arith.constant 0 : i32
    %c0_i32_0 = arith.constant 0 : i32
    %c0_i32_1 = arith.constant 0 : i32
    return %c0_i32, %c0_i32_0 : i32, i32
  }
  func.func @transform_3(%arg0: i32) -> (i32, i32, i32) {
    %c0_i32 = arith.constant 0 : i32
    %c0_i32_0 = arith.constant 0 : i32
    %c0_i32_1 = arith.constant 0 : i32
    %c0_i32_2 = arith.constant 0 : i32
    return %c0_i32, %c0_i32_0, %c0_i32_1 : i32, i32, i32
  }
  func.func @transform_4(%arg0: i32) -> (i32, i32) {
    %c0_i32 = arith.constant 0 : i32
    %c0_i32_0 = arith.constant 0 : i32
    %c0_i32_1 = arith.constant 0 : i32
    return %c0_i32, %c0_i32_0 : i32, i32
  }
  func.func @transform_5(%arg0: i32) -> (i32, i32) {
    %c0_i32 = arith.constant 0 : i32
    %c0_i32_0 = arith.constant 0 : i32
    %c0_i32_1 = arith.constant 0 : i32
    return %c0_i32, %c0_i32_0 : i32, i32
  }
  func.func @transform_6(%arg0: i32) -> (i32, i32) {
    %c0_i32 = arith.constant 0 : i32
    %c0_i32_0 = arith.constant 0 : i32
    %c0_i32_1 = arith.constant 0 : i32
    return %c0_i32, %c0_i32_0 : i32, i32
  }
  func.func @transform_7(%arg0: i32) -> (i32, i32, i32, i32) {
    %c0_i32 = arith.constant 0 : i32
    %c0_i32_0 = arith.constant 0 : i32
    %c0_i32_1 = arith.constant 0 : i32
    %c0_i32_2 = arith.constant 0 : i32
    return %arg0, %c0_i32, %c0_i32_0, %c0_i32_1 : i32, i32, i32, i32
  }
}

</mosaic_0001>

<bundles_post_ra>
// kernel: bottleneck_forward.1
= control target key start
LH: loop header
LB: loop body
LE: loop exit
PB: predicated region body
PF: predicated region fallthrough
CT: control target
= control target key end

     0   :  { %12 = vsyncpa [#allocation3], 0  ;;  %s8120_s0 = inlined_call_operand.hbm [shape: f32[2,16,16,32], index: 0, kind: input, shape index: {}]   ;;  %s8121_s1 = inlined_call_operand.vmem [shape: f32[32,8], index: 1, kind: input, shape index: {}]   ;;  %s8122_s2 = inlined_call_operand.vmem [shape: f32[1,8], index: 2, kind: input, shape index: {}]   ;;  %s8123_s3 = inlined_call_operand.vmem [shape: f32[9,8,8], index: 3, kind: input, shape index: {}]   ;;  %s8124_s4 = inlined_call_operand.vmem [shape: f32[1,8], index: 4, kind: input, shape index: {}]   ;;  %s8125_s5 = inlined_call_operand.vmem [shape: f32[8,32], index: 5, kind: input, shape index: {}]   ;;  %s8126_s6 = inlined_call_operand.vmem [shape: f32[1,32], index: 6, kind: input, shape index: {}]   ;;  %s8127_s7 = inlined_call_operand.hbm [shape: f32[2,16,16,32], index: 7, kind: output, shape index: {}]  }
   0x1   :  { %14 = vsyncpa [#allocation3 + $0x1], 0 }
   0x2   :  { %15 = vsyncpa [#allocation4], 0 }
   0x3   :  { %17 = vsyncpa [#allocation4 + $0x1], 0  ;;  %s5812_s24 = smov 0   ;;  %s5814_s25 = smov 0  }
   0x4   :  { %s5816_s26 = smov 0   ;;  %s5818_s27 = smov 0  }
   0x5 LB: > { %s5833_s28 = sadd.s32 4294967295, %s5763_s27   ;;  %s4297_s29 = sadd.s32 4294967294, %s5763_s27   ;;  %s5763_s27 = sphi %s5818_s27, %s8485_s27   ;;  %s5759_s26 = sphi %s5816_s26, %s8484_s26   ;;  %s5755_s25 = sphi %s5814_s25, %s8483_s25   ;;  %s5751_s24 = sphi %s5812_s24, %s8482_s24  }
   0x6   : > { %s5837_s30 = sadd.s32 1, %s5763_s27   ;;  %s30_s8 = sadd.s32 1, %s5759_s26 }
   0x7   : > { %s27_s9 = ssub.s32 %s5763_s27, %s5837_s30  ;;  %p37_p0 = scmp.ne.s32.totalorder %s5759_s26, %s5755_s25 }
   0x8   : > { %p28_p1 = scmp.eq.s32.totalorder %s27_s9, 0  ;;  %p38_p2 = scmp.eq.s32.totalorder %s5763_s27, 0 }
   0x9   : > { %p43_p3 = scmp.ne.s32.totalorder %s5755_s25, %s5751_s24  ;;  %p44_p4 = scmp.eq.s32.totalorder %s5833_s28, 0 }
   0xa   : > { %s5849_s10 = scalar_select %p28_p1, %s5759_s26, %s30_s8  }
   0xb   : > { %p5851_p5 = por %p38_p2, %p37_p0  ;;  %p5855_p6 = por %p44_p4, %p43_p3 }
   0xc   : > { %p193_p7 = scmp.eq.s32.totalorder %s5833_s28, 1  ;;  %p199_p8 = scmp.eq.s32.totalorder %s4297_s29, 1 }
   0xd   : > { %s8220_s12 = scalar_select %p5855_p6, 1, 0 }
   0xe   : > { %p5600_p10 = scmp.lt.s32.totalorder %s5763_s27, 2  ;;  %p5862_p11 = por %p193_p7, %p37_p0 }
   0xf   : > { %p5866_p12 = por %p199_p8, %p43_p3  ;;  %s237_s15 = sand.u32 1, %s5759_s26  }
  0x10   : > { %s8221_s13 = scalar_select %p5862_p11, 1, 0 }
  0x11   : > { %s8222_s14 = scalar_select %p5866_p12, 1, 0 }
  0x12   : > { %s4662_s16 = sshll.u32 %s5763_s27, 12  ;;  %s4300_s17 = sshll.u32 %s237_s15, 8 }
  0x13   : > { %s5875_s20 = scalar_lea.hbm %s8120_s0, %s4662_s16  ;;  %s241_s21 = scalar_lea.vmem [#allocation2], %s4300_s17 }
  0x14   : > { %s248_s22 = sshll.u32 %s241_s21, 4  ;;  %p5879_p13 = pnand %p5600_p10, %p5851_p5  ;;  %s5883_s22 = int_to_ptr.vmem [resolvable:$true] %s248_s22 }
  0x15   : > { %s5885_s29 = scalar_lea.sflag [#allocation3], %s237_s15  ;;  %s5671_s8 = scalar_lea.hbm %s5875_s20, 4096 }
  0x16   : > { %p5672_p0 = scmp.ne.s32.totalorder %s5875_s20, %s5671_s8  ;;  %p5673_p1 = pneg %p5879_p13 }
  0x17   : > { %s5676_s17 = scalar_lea.hbm %s8120_s0, 8192  ;;  %p5677_p4 = scmp.lt.s32.totalorder %s5875_s20, %s8120_s0 }
  0x18   : > { %p5674_p2 = pnand %p5673_p1, %p5672_p0  ;;  %p5678_p5 = scmp.lt.s32.totalorder %s5676_s17, %s5671_s8 }
  0x1a   : > { %p5675_p3 = pneg %p5674_p2  ;;  %p5679_p7 = por %p5678_p5, %p5677_p4 }
  0x1c   : > { %p5680_p8 = pnand %p5679_p7, %p5675_p3 }
  0x1e   : > { %5683 = shalt.err (!%p5680_p8)
}
  0x1f   : > { %s5684_s15 = scalar_lea.vmem %s5883_s22, 4096  ;;  %s5765_s19 = smov [#allocation2]  }
  0x20   : > { %p5685_p10 = scmp.ne.s32.totalorder %s5883_s22, %s5684_s15  ;;  %s5689_s21 = sshll.u32 %s5765_s19, 4  ;;  %s5690_s21 = int_to_ptr.vmem [resolvable:$false] %s5689_s21 }
  0x21   : > { %s5691_s9 = scalar_lea.vmem %s5690_s21, 8192  ;;  %p5692_p2 = scmp.lt.s32.totalorder %s5883_s22, %s5690_s21 }
  0x22   : > { %p5687_p9 = pnand %p5685_p10, %p5673_p1  ;;  %p5693_p12 = scmp.lt.s32.totalorder %s5691_s9, %s5684_s15 }
  0x24   : > { %p5688_p0 = pneg %p5687_p9  ;;  %p5694_p11 = por %p5693_p12, %p5692_p2 }
  0x26   : > { %p5695_p6 = pnand %p5694_p11, %p5688_p0 }
  0x28   : > { %5698 = shalt.err (!%p5695_p6)
}
  0x29   : > { %s5766_s8 = smov 128   ;;  %s5767_s16 = smov 8  }
  0x2a   : > { %5595 = dma.hbm_to_vmem [thread:$0]  (!%p5879_p13), %s5875_s20, 4096, %s5883_s22, %s5885_s29, %s5766_s8, %s5766_s8, %s5767_s16  }
  0x2b   : > { %p4303_p9 = scmp.ge.s32.totalorder %s5763_s27, 1  ;;  %p256_p1 = scmp.lt.s32.totalorder %s5763_s27, 3 }
  0x2d   : > { %p257_p3 = pnand %p4303_p9, %p256_p1 }
  0x2f   : > { %260 = sbr.rel (%p257_p3) target bundleno = 1006 (0x3ee), region = 48 }
  0x34   : > { %s5909_s17 = sand.u32 1, %s5755_s25   ;;  %p8224_p6 = scmp.ne.s32.totalorder %s8220_s12, 0 }
  0x35   : > { %s4304_s11 = sshll.u32 %s5909_s17, 8  ;;  %s263_s18 = scalar_lea.sflag [#allocation3], %s5909_s17 }
  0x36   : > { %s5915_s15 = scalar_lea.vmem [#allocation2], %s4304_s11 }
  0x37   : > { %5742 = dma.done.wait (%p8224_p6), %s263_s18, 4096  }
  0x38   : > { %5744 = vsyncadd (%p8224_p6), %s263_s18, 4294963200  ;;  %vm340_vm0 = vcmask 261120   ;;  %v332_v0 = vld [vmem:[%s8121_s1 + $0x18] sm:$0xff]  ;;  %v331_v1 = vld [vmem:[%s8121_s1 + $0x10] sm:$0xff]  ;;  %v8130_v37 = vmov 0.0   ;;  %vm729_vm1 = vcmask 1040384  }
  0x39   : > { %5030 = vmatprep.subr.mxu0 %v332_v0  ;;  %v297_v2 = vld [vmem:[%s5915_s15] sm:$0xff]  ;;  %v330_v3 = vld [vmem:[%s8121_s1 + $0x8] sm:$0xff]  ;;  %v299_v6 = vld [vmem:[%s5915_s15 + $0x10] sm:$0xff]  ;;  %vm882_vm2 = vcmask 1046528   ;;  %vm1006_vm3 = vcmask 64512   ;;  %vm1652_vm4 = vcmask 1045504  }
  0x3a   : > { %5031 = vmatpush3.msra.mxu0 %v332_v0  ;;  %5038 = vmatprep.mubr.msk.f32.mxu0 %vm340_vm0, %v297_v2  ;;  %v329_v4 = vld [vmem:[%s8121_s1] sm:$0xff]  ;;  %v298_v5 = vld [vmem:[%s5915_s15 + $0x8] sm:$0xff]  ;;  %v300_v7 = vld [vmem:[%s5915_s15 + $0x18] sm:$0xff]  ;;  %s7945_s22 = scalar_lea.vmem [#allocation5], %s4304_s11  ;;  %s4663_s11 = sshll.u32 %s5833_s28, 12 }
  0x3b   : > { %5032 = vmatprep.subr.mxu0 %v331_v1  ;;  %v301_v8 = vld [vmem:[%s5915_s15 + $0x20] sm:$0xff]  ;;  %v4339_v9 = vld [vmem:[%s8123_s3 + $0x8] sm:$0xff]  ;;  %v303_v11 = vld [vmem:[%s5915_s15 + $0x30] sm:$0xff]  ;;  %s4224_s23 = sshll.u32 %s7945_s22, 4  ;;  %s8071_s12 = scalar_lea.hbm %s8127_s7, %s4663_s11  ;;  %s8073_s23 = int_to_ptr.vmem [resolvable:$true] %s4224_s23 }
  0x3c   : > { %5033 = vmatpush3.msra.mxu0 %v331_v1  ;;  %v302_v10 = vld [vmem:[%s5915_s15 + $0x28] sm:$0xff]  ;;  %5586 = vmatprep.subr.mxu1 %v4339_v9  ;;  %v304_v12 = vld [vmem:[%s5915_s15 + $0x38] sm:$0xff]  ;;  %v305_v13 = vld [vmem:[%s5915_s15 + $0x40] sm:$0xff]  ;;  %s4211_s28 = scalar_lea.sflag [#allocation4], %s5909_s17  ;;  %s5699_s21 = scalar_lea.vmem %s8073_s23, 4096 }
  0x3d   : > { %5034 = vmatprep.subr.mxu0 %v330_v3  ;;  %5587 = vmatpush3.msra.mxu1 %v4339_v9  ;;  %v306_v14 = vld [vmem:[%s5915_s15 + $0x48] sm:$0xff]  ;;  %v307_v15 = vld [vmem:[%s5915_s15 + $0x50] sm:$0xff]  ;;  %v308_v16 = vld [vmem:[%s5915_s15 + $0x58] sm:$0xff]  ;;  %p5700_p11 = scmp.ne.s32.totalorder %s8073_s23, %s5699_s21  ;;  %p8479_p12 = scmp.ne.s32.totalorder %s8221_s13, 0 }
  0x3e   : > { %5035 = vmatpush3.msra.mxu0 %v330_v3  ;;  %v309_v17 = vld [vmem:[%s5915_s15 + $0x60] sm:$0xff]  ;;  %v310_v18 = vld [vmem:[%s5915_s15 + $0x68] sm:$0xff]  ;;  %v311_v19 = vld [vmem:[%s5915_s15 + $0x70] sm:$0xff] }
  0x3f   : > { %5036 = vmatprep.subr.mxu0 %v329_v4  ;;  %v312_v20 = vld [vmem:[%s5915_s15 + $0x78] sm:$0xff]  ;;  %v313_v21 = vld [vmem:[%s5915_s15 + $0x80] sm:$0xff]  ;;  %v314_v22 = vld [vmem:[%s5915_s15 + $0x88] sm:$0xff]  ;;  %p5701_p13 = pnand %p5700_p11, %p8479_p12 }
  0x40   : > { %5037 = vmatpush3.msra.mxu0 %v329_v4  ;;  %v315_v23 = vld [vmem:[%s5915_s15 + $0x90] sm:$0xff]  ;;  %v316_v24 = vld [vmem:[%s5915_s15 + $0x98] sm:$0xff]  ;;  %v317_v25 = vld [vmem:[%s5915_s15 + $0xa0] sm:$0xff] }
  0x41   : > { %5039 = vmatmul.mubr.msk.f32.vlgmr.msra.gmra.mxu0 %vm340_vm0, %v298_v5  ;;  %5086 = vmatprep.subr.mxu0 %v4339_v9  ;;  %v318_v26 = vld [vmem:[%s5915_s15 + $0xa8] sm:$0xff]  ;;  %v319_v27 = vld [vmem:[%s5915_s15 + $0xb0] sm:$0xff]  ;;  %v320_v28 = vld [vmem:[%s5915_s15 + $0xb8] sm:$0xff]  ;;  %p5702_p4 = pneg %p5701_p13 }
  0x42   : > { %5041 = vmatprep.mubr.msk.f32.mxu0 %vm340_vm0, %v299_v6  ;;  %5087 = vmatpush3.msra.mxu0 %v4339_v9  ;;  %v321_v29 = vld [vmem:[%s5915_s15 + $0xc0] sm:$0xff]  ;;  %v322_v30 = vld [vmem:[%s5915_s15 + $0xc8] sm:$0xff]  ;;  %v323_v31 = vld [vmem:[%s5915_s15 + $0xd0] sm:$0xff] }
  0x43   : > { %v324_v32 = vld [vmem:[%s5915_s15 + $0xd8] sm:$0xff]  ;;  %v325_v33 = vld [vmem:[%s5915_s15 + $0xe0] sm:$0xff]  ;;  %v326_v34 = vld [vmem:[%s5915_s15 + $0xe8] sm:$0xff] }
  0x44   : > { %v327_v35 = vld [vmem:[%s5915_s15 + $0xf0] sm:$0xff]  ;;  %v328_v36 = vld [vmem:[%s5915_s15 + $0xf8] sm:$0xff]  ;;  %v6008_v39 = vld [vmem:[%s8123_s3] sm:$0xff] }
  0x45   : > { %5042 = vmatmul.mubr.msk.f32.gmra.mxu0 %vm340_vm0, %v300_v7  ;;  %v4400_v38 = vld [vmem:[%s8123_s3 + $0x10] sm:$0xff]  ;;  %5136 = vmatprep.subr.mxu1 %v6008_v39  ;;  %v6014_v40 = vld [vmem:[%s8123_s3 + $0x20] sm:$0xff] }
  0x46   : > { %5044 = vmatprep.mubr.msk.f32.mxu0 %vm340_vm0, %v301_v8  ;;  %5186 = vmatprep.subr.mxu0 %v4400_v38  ;;  %v6020_v41 = vld [vmem:[%s8122_s2] ss:$0 sm:$0xff] }
  0x49   : > { %5045 = vmatmul.mubr.msk.f32.gmra.mxu0 %vm340_vm0, %v302_v10 }
  0x4a   : > { %5047 = vmatprep.mubr.msk.f32.mxu0 %vm340_vm0, %v303_v11 }
  0x4d   : > { %5048 = vmatmul.mubr.msk.f32.gmra.mxu0 %vm340_vm0, %v304_v12 }
  0x4e   : > { %5050 = vmatprep.mubr.msk.f32.mxu0 %vm340_vm0, %v305_v13 }
  0x51   : > { %5051 = vmatmul.mubr.msk.f32.gmra.mxu0 %vm340_vm0, %v306_v14 }
  0x52   : > { %5053 = vmatprep.mubr.msk.f32.mxu0 %vm340_vm0, %v307_v15 }
  0x55   : > { %5054 = vmatmul.mubr.msk.f32.gmra.mxu0 %vm340_vm0, %v308_v16 }
  0x56   : > { %5056 = vmatprep.mubr.msk.f32.mxu0 %vm340_vm0, %v309_v17 }
  0x59   : > { %5057 = vmatmul.mubr.msk.f32.gmra.mxu0 %vm340_vm0, %v310_v18 }
  0x5a   : > { %5059 = vmatprep.mubr.msk.f32.mxu0 %vm340_vm0, %v311_v19  ;;  %v694_v19 = vlaneseq }
  0x5d   : > { %5060 = vmatmul.mubr.msk.f32.gmra.mxu0 %vm340_vm0, %v312_v20 }
  0x5e   : > { %5062 = vmatprep.mubr.msk.f32.mxu0 %vm340_vm0, %v313_v21 }
  0x61   : > { %5063 = vmatmul.mubr.msk.f32.gmra.mxu0 %vm340_vm0, %v314_v22 }
  0x62   : > { %5065 = vmatprep.mubr.msk.f32.mxu0 %vm340_vm0, %v315_v23 }
  0x65   : > { %5066 = vmatmul.mubr.msk.f32.gmra.mxu0 %vm340_vm0, %v316_v24 }
  0x66   : > { %5068 = vmatprep.mubr.msk.f32.mxu0 %vm340_vm0, %v317_v25 }
  0x69   : > { %5069 = vmatmul.mubr.msk.f32.gmra.mxu0 %vm340_vm0, %v318_v26 }
  0x6a   : > { %5071 = vmatprep.mubr.msk.f32.mxu0 %vm340_vm0, %v319_v27 }
  0x6d   : > { %5072 = vmatmul.mubr.msk.f32.gmra.mxu0 %vm340_vm0, %v320_v28 }
  0x6e   : > { %5074 = vmatprep.mubr.msk.f32.mxu0 %vm340_vm0, %v321_v29 }
  0x71   : > { %5075 = vmatmul.mubr.msk.f32.gmra.mxu0 %vm340_vm0, %v322_v30 }
  0x72   : > { %5077 = vmatprep.mubr.msk.f32.mxu0 %vm340_vm0, %v323_v31 }
  0x75   : > { %5078 = vmatmul.mubr.msk.f32.gmra.mxu0 %vm340_vm0, %v324_v32 }
  0x76   : > { %5080 = vmatprep.mubr.msk.f32.mxu0 %vm340_vm0, %v325_v33 }
  0x79   : > { %5081 = vmatmul.mubr.msk.f32.gmra.mxu0 %vm340_vm0, %v326_v34  ;;  %v6077_v34 = vshrl.u32 %v694_v19, 7 }
  0x7a   : > { %5083 = vmatprep.mubr.msk.f32.mxu0 %vm340_vm0, %v327_v35 }
  0x7d   : > { %5084 = vmatmul.mubr.msk.f32.gmra.mxu0 %vm340_vm0, %v328_v36 }
  0x7e   : > { %5088 = vmatprep.mubr.f32.mxu0 %v8130_v37 }
  0x81   : > { %5089 = vmatmul.mubr.f32.vlgmr.msra.gmra.mxu0 %v8130_v37 }
  0x82   : > { %5187 = vmatpush3.msra.mxu0 %v4400_v38 }
  0x83   : > { %5286 = vmatprep.subr.mxu0 %v6014_v40 }
 0x101   : > { %v5040_v42 = vpop.f32.mrf.mxu0 }
 0x102   : > { %v509_v43 = vadd.f32 %v5040_v42, %v6020_v41 }
 0x103   : > { %v503_v44 = vpop.f32.mrf.mxu0 }
 0x104   : > { %v663_v45 = vmax.f32 %v509_v43, 0.0  ;;  %v504_v46 = vadd.f32 %v6020_v41, %v503_v44 }
 0x105   : > { %v5043_v47 = vpop.f32.mrf.mxu0 }
 0x106   : > { %v662_v48 = vmax.f32 %v504_v46, 0.0  ;;  %v519_v49 = vadd.f32 %v5043_v47, %v6020_v41  ;;  %v731_v51 = vrot.slane %v663_v45, 7  ;;  %v696_v46 = vadd.s32 8, %v6077_v34 }
 0x107   : > { %v513_v50 = vpop.f32.mrf.mxu0 }
 0x108   : > { %v730_v52 = vrot.slane %v662_v48, 7  ;;  %v665_v53 = vmax.f32 %v519_v49, 0.0  ;;  %v514_v54 = vadd.f32 %v6020_v41, %v513_v50 }
 0x109   : > { %v5046_v55 = vpop.f32.mrf.mxu0 }
 0x10a   : > { %v6027_v56 = vsel %vm729_vm1, %v730_v52, %v731_v51  ;;  %v6030_v57 = vsel %vm729_vm1, 0.0, %v730_v52  ;;  %v664_v58 = vmax.f32 %v514_v54, 0.0  ;;  %v529_v60 = vadd.f32 %v5046_v55, %v6020_v41 }
 0x10b   : > { %v883_v59 = vrot.slane %v6030_v57, 1  ;;  %v523_v61 = vpop.f32.mrf.mxu0  ;;  %v884_v62 = vrot.slane %v6027_v56, 1  ;;  %v735_v63 = vrot.slane %v665_v53, 7 }
 0x10c   : > { %v733_v0 = vrot.slane %v664_v58, 7  ;;  %v524_v1 = vadd.f32 %v6020_v41, %v523_v61  ;;  %v667_v2 = vmax.f32 %v529_v60, 0.0 }
 0x10d   : > { %v5049_v3 = vpop.f32.mrf.mxu0  ;;  %v6037_v4 = vsel %vm882_vm2, %v883_v59, %v884_v62 }
 0x10e   : > { %v6040_v5 = vsel %vm729_vm1, %v731_v51, %v733_v0  ;;  %v6043_v6 = vsel %vm729_vm1, %v733_v0, %v735_v63  ;;  %v666_v7 = vmax.f32 %v524_v1, 0.0  ;;  %v539_v8 = vadd.f32 %v5049_v3, %v6020_v41  ;;  %5091 = vmatprep.mubr.msk.f32.mxu0 %vm1006_vm3, %v6037_v4 }
 0x10f   : > { %v533_v9 = vpop.f32.mrf.mxu0  ;;  %v886_v10 = vrot.slane %v6040_v5, 1  ;;  %v888_v11 = vrot.slane %v6043_v6, 1  ;;  %v739_v12 = vrot.slane %v667_v2, 7  ;;  %v1653_v0 = vrot.slane %v6030_v57, 2 }
 0x110   : > { %v737_v13 = vrot.slane %v666_v7, 7  ;;  %v669_v14 = vmax.f32 %v539_v8, 0.0  ;;  %v534_v15 = vadd.f32 %v6020_v41, %v533_v9 }
 0x111   : > { %v5052_v16 = vpop.f32.mrf.mxu0  ;;  %v6052_v17 = vsel %vm882_vm2, %v884_v62, %v886_v10  ;;  %v6055_v18 = vsel %vm882_vm2, %v886_v10, %v888_v11 }
 0x112   : > { %v6058_v20 = vsel %vm729_vm1, %v735_v63, %v737_v13  ;;  %v6061_v21 = vsel %vm729_vm1, %v737_v13, %v739_v12  ;;  %v668_v22 = vmax.f32 %v534_v15, 0.0  ;;  %5092 = vmatmul.mubr.msk.f32.gmra.mxu0 %vm1006_vm3, %v6052_v17  ;;  %v549_v23 = vadd.f32 %v5052_v16, %v6020_v41 }
 0x113   : > { %v543_v24 = vpop.f32.mrf.mxu0  ;;  %5094 = vmatprep.mubr.msk.f32.mxu0 %vm1006_vm3, %v6055_v18  ;;  %v890_v25 = vrot.slane %v6058_v20, 1  ;;  %v892_v26 = vrot.slane %v6061_v21, 1  ;;  %v743_v27 = vrot.slane %v669_v14, 7  ;;  %v6113_v63 = vadd.s32 1, %v696_v46 }
 0x114   : > { %v741_v28 = vrot.slane %v668_v22, 7  ;;  %v544_v29 = vadd.f32 %v6020_v41, %v543_v24  ;;  %v671_v30 = vmax.f32 %v549_v23, 0.0  ;;  %v1656_v23 = vrot.slane %v6040_v5, 2 }
 0x115   : > { %v5055_v31 = vpop.f32.mrf.mxu0  ;;  %v6072_v32 = vsel %vm882_vm2, %v888_v11, %v890_v25  ;;  %v6075_v33 = vsel %vm882_vm2, %v890_v25, %v892_v26  ;;  %v1654_v11 = vrot.slane %v6027_v56, 2  ;;  %v1660_v24 = vrot.slane %v6058_v20, 2 }
 0x116   : > { %v6080_v35 = vsel %vm729_vm1, %v739_v12, %v741_v28  ;;  %v6083_v36 = vsel %vm729_vm1, %v741_v28, %v743_v27  ;;  %v670_v38 = vmax.f32 %v544_v29, 0.0  ;;  %v559_v42 = vadd.f32 %v5055_v31, %v6020_v41  ;;  %5095 = vmatmul.mubr.msk.f32.gmra.mxu0 %vm1006_vm3, %v6072_v32 }
 0x117   : > { %v553_v43 = vpop.f32.mrf.mxu0  ;;  %5097 = vmatprep.mubr.msk.f32.mxu0 %vm1006_vm3, %v6075_v33  ;;  %v894_v44 = vrot.slane %v6080_v35, 1  ;;  %v896_v45 = vrot.slane %v6083_v36, 1  ;;  %v747_v47 = vrot.slane %v671_v30, 7  ;;  %vm1645_vm5 = vcmp.lt.s32.totalorder %v6113_v63, 16 }
 0x118   : > { %v745_v48 = vrot.slane %v670_v38, 7  ;;  %v673_v49 = vmax.f32 %v559_v42, 0.0  ;;  %v554_v50 = vadd.f32 %v6020_v41, %v553_v43  ;;  %v6147_v38 = vsel %vm1652_vm4, %v1653_v0, %v1654_v11 }
 0x119   : > { %v5058_v51 = vpop.f32.mrf.mxu0  ;;  %v6095_v52 = vsel %vm882_vm2, %v892_v26, %v894_v44  ;;  %v6098_v53 = vsel %vm882_vm2, %v894_v44, %v896_v45  ;;  %8228 = vst [vmem:[#allocation11_spill] sm:$0xff] %v6147_v38 }
 0x11a   : > { %v6101_v54 = vsel %vm729_vm1, %v743_v27, %v745_v48  ;;  %v6104_v55 = vsel %vm729_vm1, %v745_v48, %v747_v47  ;;  %v672_v58 = vmax.f32 %v554_v50, 0.0  ;;  %5098 = vmatmul.mubr.msk.f32.gmra.mxu0 %vm1006_vm3, %v6095_v52  ;;  %v569_v59 = vadd.f32 %v5058_v51, %v6020_v41 }
 0x11b   : > { %v563_v60 = vpop.f32.mrf.mxu0  ;;  %5100 = vmatprep.mubr.msk.f32.mxu0 %vm1006_vm3, %v6098_v53  ;;  %v898_v61 = vrot.slane %v6101_v54, 1  ;;  %v900_v62 = vrot.slane %v6104_v55, 1  ;;  %v751_v1 = vrot.slane %v673_v49, 7  ;;  %v1657_v50 = vsel %vm1652_vm4, %v1654_v11, %v1656_v23 }
 0x11c   : > { %v749_v2 = vrot.slane %v672_v58, 7  ;;  %v564_v3 = vadd.f32 %v6020_v41, %v563_v60  ;;  %v675_v7 = vmax.f32 %v569_v59, 0.0 }
 0x11d   : > { %v5061_v8 = vpop.f32.mrf.mxu0  ;;  %v6118_v9 = vsel %vm882_vm2, %v896_v45, %v898_v61  ;;  %v6121_v10 = vsel %vm882_vm2, %v898_v61, %v900_v62  ;;  %v1658_v45 = vrot.slane %v6043_v6, 2 }
 0x11e   : > { %8225 = vst [vmem:[#allocation8_spill] sm:$0xff] %v6121_v10  ;;  %v6125_v12 = vsel %vm729_vm1, %v747_v47, %v749_v2  ;;  %v6128_v13 = vsel %vm729_vm1, %v749_v2, %v751_v1  ;;  %v674_v14 = vmax.f32 %v564_v3, 0.0  ;;  %v579_v15 = vadd.f32 %v5061_v8, %v6020_v41  ;;  %5101 = vmatmul.mubr.msk.f32.gmra.mxu0 %vm1006_vm3, %v6118_v9 }
 0x11f   : > { %v573_v16 = vpop.f32.mrf.mxu0  ;;  %5103 = vmatprep.mubr.msk.f32.mxu0 %vm1006_vm3, %v6121_v10  ;;  %v902_v19 = vrot.slane %v6125_v12, 1  ;;  %v904_v22 = vrot.slane %v6128_v13, 1  ;;  %v755_v25 = vrot.slane %v675_v7, 7  ;;  %v1661_v60 = vsel %vm1652_vm4, %v1658_v45, %v1660_v24 }
 0x120   : > { %v753_v26 = vrot.slane %v674_v14, 7  ;;  %v677_v27 = vmax.f32 %v579_v15, 0.0  ;;  %v574_v28 = vadd.f32 %v6020_v41, %v573_v16  ;;  %v1662_v2 = vrot.slane %v6061_v21, 2 }
 0x121   : > { %v5064_v29 = vpop.f32.mrf.mxu0  ;;  %v6141_v30 = vsel %vm882_vm2, %v900_v62, %v902_v19  ;;  %v6144_v31 = vsel %vm882_vm2, %v902_v19, %v904_v22  ;;  %v6190_v19 = vsel %vm1645_vm5, %v1657_v50, 0.0  ;;  %v6210_v50 = vld [vmem:[%s8123_s3 + $0x18] sm:$0xff] }
 0x122   : > { %8226 = vst [vmem:[#allocation9_spill] sm:$0xff] %v6141_v30  ;;  %8227 = vst [vmem:[#allocation10_spill] sm:$0xff] %v6144_v31  ;;  %v6151_v42 = vsel %vm729_vm1, %v751_v1, %v753_v26  ;;  %v6154_v43 = vsel %vm729_vm1, %v753_v26, %v755_v25  ;;  %v676_v44 = vmax.f32 %v574_v28, 0.0  ;;  %5104 = vmatmul.mubr.msk.f32.gmra.mxu0 %vm1006_vm3, %v6141_v30  ;;  %v759_v51 = vrot.slane %v677_v27, 7 }
 0x123   : > { %v589_v46 = vadd.f32 %v5064_v29, %v6020_v41  ;;  %v583_v47 = vpop.f32.mrf.mxu0  ;;  %5106 = vmatprep.mubr.msk.f32.mxu0 %vm1006_vm3, %v6144_v31  ;;  %v906_v48 = vrot.slane %v6151_v42, 1  ;;  %v908_v49 = vrot.slane %v6154_v43, 1  ;;  %8231 = vst [vmem:[#allocation14_spill] sm:$0xff] %v6190_v19 }
 0x124   : > { %v757_v58 = vrot.slane %v676_v44, 7  ;;  %v584_v59 = vadd.f32 %v6020_v41, %v583_v47  ;;  %v6201_v47 = vsel %vm1652_vm4, %v1656_v23, %v1658_v45  ;;  %v6222_v23 = vsel %vm1652_vm4, %v1660_v24, %v1662_v2 }
 0x125   : > { %v679_v61 = vmax.f32 %v589_v46, 0.0  ;;  %v5067_v62 = vpop.f32.mrf.mxu0  ;;  %v6168_v0 = vsel %vm882_vm2, %v904_v22, %v906_v48  ;;  %v6171_v1 = vsel %vm882_vm2, %v906_v48, %v908_v49  ;;  %v1664_v22 = vrot.slane %v6080_v35, 2  ;;  %8234 = vst [vmem:[#allocation17_spill] sm:$0xff] %v6201_v47  ;;  %8236 = vst [vmem:[#allocation19_spill] sm:$0xff] %v6222_v23 }
 0x126   : > { %8229 = vst [vmem:[#allocation12_spill] sm:$0xff] %v6168_v0  ;;  %8230 = vst [vmem:[#allocation13_spill] sm:$0xff] %v6171_v1  ;;  %v6175_v3 = vsel %vm729_vm1, %v755_v25, %v757_v58  ;;  %v6178_v7 = vsel %vm729_vm1, %v757_v58, %v759_v51  ;;  %v678_v8 = vmax.f32 %v584_v59, 0.0  ;;  %v599_v11 = vadd.f32 %v5067_v62, %v6020_v41 }
 0x127   : > { %5107 = vmatmul.mubr.msk.f32.gmra.mxu0 %vm1006_vm3, %v6168_v0  ;;  %5109 = vmatprep.mubr.msk.f32.mxu1 %vm1006_vm3, %v6171_v1  ;;  %v593_v14 = vpop.f32.mrf.mxu0  ;;  %v910_v15 = vrot.slane %v6175_v3, 1  ;;  %v912_v16 = vrot.slane %v6178_v7, 1  ;;  %v763_v25 = vrot.slane %v679_v61, 7  ;;  %v6205_v48 = vsel %vm1645_vm5, %v1661_v60, 0.0 }
 0x128   : > { %5188 = vmatprep.mubr.f32.mxu0 %v8130_v37  ;;  %v761_v26 = vrot.slane %v678_v8, 7  ;;  %v681_v27 = vmax.f32 %v599_v11, 0.0  ;;  %v594_v28 = vadd.f32 %v6020_v41, %v593_v14  ;;  %8235 = vst [vmem:[#allocation18_spill] sm:$0xff] %v6205_v48  ;;  %v8140_v62 = vrot.slane %v6101_v54, 2 }
 0x129   : > { %v5070_v29 = vpop.f32.mrf.mxu0  ;;  %v6195_v44 = vsel %vm882_vm2, %v908_v49, %v910_v15  ;;  %v6198_v46 = vsel %vm882_vm2, %v910_v15, %v912_v16  ;;  %v1665_v24 = vsel %vm1652_vm4, %v1662_v2, %v1664_v22 }
 0x12a   : > { %8232 = vst [vmem:[#allocation15_spill] sm:$0xff] %v6195_v44  ;;  %8233 = vst [vmem:[#allocation16_spill] sm:$0xff] %v6198_v46  ;;  %v6213_v58 = vsel %vm729_vm1, %v759_v51, %v761_v26  ;;  %v6216_v49 = vsel %vm729_vm1, %v761_v26, %v763_v25  ;;  %v680_v59 = vmax.f32 %v594_v28, 0.0  ;;  %5110 = vmatmul.mubr.msk.f32.vlgmr.msra.gmra.mxu1 %vm1006_vm3, %v6195_v44  ;;  %v767_v8 = vrot.slane %v681_v27, 7 }
 0x12b   : > { %5189 = vmatmul.mubr.f32.vlgmr.msra.gmra.mxu0 %v8130_v37  ;;  %v609_v45 = vadd.f32 %v5070_v29, %v6020_v41  ;;  %5137 = vmatpush3.msra.mxu1 %v6008_v39  ;;  %v603_v60 = vpop.f32.mrf.mxu0  ;;  %v914_v51 = vrot.slane %v6213_v58, 1  ;;  %v916_v61 = vrot.slane %v6216_v49, 1  ;;  %v1666_v27 = vrot.slane %v6083_v36, 2  ;;  %v6247_v29 = vld [vmem:[%s8123_s3 + $0x30] sm:$0xff] }
 0x12c   : > { %5112 = vmatprep.mubr.msk.f32.mxu1 %vm1006_vm3, %v6198_v46  ;;  %v765_v11 = vrot.slane %v680_v59, 7  ;;  %v604_v14 = vadd.f32 %v6020_v41, %v603_v60  ;;  %5191 = vmatprep.mubr.msk.f32.mxu0 %vm1006_vm3, %v6147_v38  ;;  %v1674_v46 = vrot.slane %v6128_v13, 2 }
 0x12d   : > { %5236 = vmatprep.subr.mxu1 %v6210_v50  ;;  %v683_v39 = vmax.f32 %v609_v45, 0.0  ;;  %v5073_v15 = vpop.f32.mrf.mxu0  ;;  %v6237_v26 = vsel %vm882_vm2, %v912_v16, %v914_v51  ;;  %v6240_v28 = vsel %vm882_vm2, %v914_v51, %v916_v61  ;;  %5287 = vmatpush3.msra.mxu0 %v6014_v40  ;;  %v1669_v51 = vsel %vm1652_vm4, %v1666_v27, %v8140_v62 }
 0x12e   : > { %8237 = vst [vmem:[#allocation20_spill] sm:$0xff] %v6237_v26  ;;  %8238 = vst [vmem:[#allocation21_spill] sm:$0xff] %v6240_v28  ;;  %v6250_v2 = vsel %vm729_vm1, %v763_v25, %v765_v11  ;;  %v6253_v59 = vsel %vm729_vm1, %v765_v11, %v767_v8  ;;  %v682_v16 = vmax.f32 %v604_v14, 0.0  ;;  %v619_v45 = vadd.f32 %v5073_v15, %v6020_v41 }
 0x12f   : > { %5113 = vmatmul.mubr.msk.f32.gmra.mxu1 %vm1006_vm3, %v6237_v26  ;;  %5192 = vmatmul.mubr.msk.f32.gmra.mxu0 %vm1006_vm3, %v6190_v19  ;;  %v613_v40 = vpop.f32.mrf.mxu0  ;;  %v918_v25 = vrot.slane %v6250_v2, 1  ;;  %v920_v60 = vrot.slane %v6253_v59, 1  ;;  %v1672_v11 = vrot.slane %v6125_v12, 2  ;;  %v771_v14 = vrot.slane %v683_v39, 7 }
 0x130   : > { %5115 = vmatprep.mubr.msk.f32.mxu1 %vm1006_vm3, %v6240_v28  ;;  %5194 = vmatprep.mubr.msk.f32.mxu0 %vm1006_vm3, %v6201_v47  ;;  %v769_v15 = vrot.slane %v682_v16, 7  ;;  %v685_v37 = vmax.f32 %v619_v45, 0.0  ;;  %v614_v19 = vadd.f32 %v6020_v41, %v613_v40  ;;  %v6280_v26 = vsel %vm1645_vm5, %v1665_v24, 0.0 }
 0x131   : > { %5386 = vmatprep.subr.mxu0 %v6247_v29  ;;  %v5076_v38 = vpop.f32.mrf.mxu0  ;;  %v6273_v47 = vsel %vm882_vm2, %v916_v61, %v918_v25  ;;  %v6276_v28 = vsel %vm882_vm2, %v918_v25, %v920_v60  ;;  %8241 = vst [vmem:[#allocation24_spill] sm:$0xff] %v6280_v26  ;;  %v6283_v62 = vsel %vm1652_vm4, %v1664_v22, %v1666_v27  ;;  %v1670_v61 = vrot.slane %v6104_v55, 2 }
 0x132   : > { %8239 = vst [vmem:[#allocation22_spill] sm:$0xff] %v6273_v47  ;;  %8240 = vst [vmem:[#allocation23_spill] sm:$0xff] %v6276_v28  ;;  %v6286_v39 = vsel %vm729_vm1, %v767_v8, %v769_v15  ;;  %v6289_v16 = vsel %vm729_vm1, %v769_v15, %v771_v14  ;;  %v684_v45 = vmax.f32 %v614_v19, 0.0  ;;  %v629_v24 = vadd.f32 %v5076_v38, %v6020_v41 }
 0x133   : > { %8242 = vst [vmem:[#allocation25_spill] sm:$0xff] %v6283_v62  ;;  %5116 = vmatmul.mubr.msk.f32.gmra.mxu1 %vm1006_vm3, %v6273_v47  ;;  %5195 = vmatmul.mubr.msk.f32.gmra.mxu0 %vm1006_vm3, %v6205_v48  ;;  %v623_v40 = vpop.f32.mrf.mxu0  ;;  %v922_v22 = vrot.slane %v6286_v39, 1  ;;  %v924_v19 = vrot.slane %v6289_v16, 1  ;;  %v6305_v8 = vsel %vm1645_vm5, %v1669_v51, 0.0  ;;  %v775_v27 = vrot.slane %v685_v37, 7 }
 0x134   : > { %5118 = vmatprep.mubr.msk.f32.mxu1 %vm1006_vm3, %v6276_v28  ;;  %5197 = vmatprep.mubr.msk.f32.mxu0 %vm1006_vm3, %v6222_v23  ;;  %8243 = vst [vmem:[#allocation26_spill] sm:$0xff] %v6305_v8  ;;  %v773_v25 = vrot.slane %v684_v45, 7  ;;  %v624_v15 = vadd.f32 %v6020_v41, %v623_v40  ;;  %v1673_v38 = vsel %vm1652_vm4, %v1670_v61, %v1672_v11  ;;  %v687_v48 = vmax.f32 %v629_v24, 0.0 }
 0x135   : > { %v5079_v47 = vpop.f32.mrf.mxu0  ;;  %v6310_v28 = vsel %vm882_vm2, %v920_v60, %v922_v22  ;;  %v6313_v23 = vsel %vm882_vm2, %v922_v22, %v924_v19  ;;  %v1676_v40 = vrot.slane %v6151_v42, 2  ;;  %v6349_v31 = vsel %vm1645_vm5, %v1673_v38, 0.0 }
 0x136   : > { %8244 = vst [vmem:[#allocation27_spill] sm:$0xff] %v6310_v28  ;;  %8245 = vst [vmem:[#allocation28_spill] sm:$0xff] %v6313_v23  ;;  %v6317_v44 = vsel %vm729_vm1, %v771_v14, %v773_v25  ;;  %v6320_v37 = vsel %vm729_vm1, %v773_v25, %v775_v27  ;;  %v686_v51 = vmax.f32 %v624_v15, 0.0  ;;  %v639_v45 = vadd.f32 %v5079_v47, %v6020_v41 }
 0x137   : > { %5119 = vmatmul.mubr.msk.f32.gmra.mxu1 %vm1006_vm3, %v6310_v28  ;;  %5198 = vmatmul.mubr.msk.f32.gmra.mxu0 %vm1006_vm3, %v6280_v26  ;;  %v633_v60 = vpop.f32.mrf.mxu0  ;;  %v926_v14 = vrot.slane %v6317_v44, 1  ;;  %v928_v24 = vrot.slane %v6320_v37, 1  ;;  %v1678_v47 = vrot.slane %v6154_v43, 2  ;;  %v779_v22 = vrot.slane %v687_v48, 7  ;;  %8250 = vst [vmem:[#allocation32_spill] sm:$0xff] %v6349_v31 }
 0x138   : > { %5121 = vmatprep.mubr.msk.f32.mxu1 %vm1006_vm3, %v6313_v23  ;;  %5200 = vmatprep.mubr.msk.f32.mxu0 %vm1006_vm3, %v6283_v62  ;;  %v777_v25 = vrot.slane %v686_v51, 7  ;;  %v689_v15 = vmax.f32 %v639_v45, 0.0  ;;  %v634_v26 = vadd.f32 %v6020_v41, %v633_v60  ;;  %v8248_v62 = vrot.slane %v6101_v54, 2 }
 0x139   : > { %v5082_v28 = vpop.f32.mrf.mxu0  ;;  %v6337_v1 = vsel %vm882_vm2, %v924_v19, %v926_v14  ;;  %v6340_v23 = vsel %vm882_vm2, %v926_v14, %v928_v24  ;;  %v1677_v45 = vsel %vm1652_vm4, %v1674_v46, %v1676_v40 }
 0x13a   : > { %8246 = vst [vmem:[#allocation29_spill] sm:$0xff] %v6337_v1  ;;  %8247 = vst [vmem:[#allocation30_spill] sm:$0xff] %v6340_v23  ;;  %v6345_v0 = vsel %vm1652_vm4, %v8248_v62, %v1670_v61  ;;  %v6352_v48 = vsel %vm729_vm1, %v775_v27, %v777_v25  ;;  %v6355_v51 = vsel %vm729_vm1, %v777_v25, %v779_v22  ;;  %v688_v19 = vmax.f32 %v634_v26, 0.0 }
 0x13b   : > { %8249 = vst [vmem:[#allocation31_spill] sm:$0xff] %v6345_v0  ;;  %5122 = vmatmul.mubr.msk.f32.gmra.mxu1 %vm1006_vm3, %v6337_v1  ;;  %5201 = vmatmul.mubr.msk.f32.gmra.mxu0 %vm1006_vm3, %v6305_v8  ;;  %v6362_v62 = vsel %vm1652_vm4, %v1672_v11, %v1674_v46  ;;  %v649_v61 = vadd.f32 %v5082_v28, %v6020_v41  ;;  %v643_v38 = vpop.f32.mrf.mxu0  ;;  %v930_v26 = vrot.slane %v6352_v48, 1  ;;  %v932_v27 = vrot.slane %v6355_v51, 1 }
 0x13c   : > { %8251 = vst [vmem:[#allocation33_spill] sm:$0xff] %v6362_v62  ;;  %5124 = vmatprep.mubr.msk.f32.mxu1 %vm1006_vm3, %v6340_v23  ;;  %5203 = vmatprep.mubr.msk.f32.mxu0 %vm1006_vm3, %v6345_v0  ;;  %v783_v60 = vrot.slane %v689_v15, 7  ;;  %v781_v14 = vrot.slane %v688_v19, 7  ;;  %v644_v11 = vadd.f32 %v6020_v41, %v643_v38  ;;  %v6374_v25 = vsel %vm1652_vm4, %v1676_v40, %v1678_v47 }
 0x13d   : > { %v691_v28 = vmax.f32 %v649_v61, 0.0  ;;  %v5085_v8 = vpop.f32.mrf.mxu0  ;;  %v6377_v23 = vsel %vm882_vm2, %v928_v24, %v930_v26  ;;  %v6380_v0 = vsel %vm882_vm2, %v930_v26, %v932_v27  ;;  %v1680_v1 = vrot.slane %v6175_v3, 2 }
 0x13e   : > { %8252 = vst [vmem:[#allocation34_spill] sm:$0xff] %v6377_v23  ;;  %8253 = vst [vmem:[#allocation35_spill] sm:$0xff] %v6380_v0  ;;  %v6384_v30 = vsel %vm729_vm1, %v779_v22, %v781_v14  ;;  %v6387_v46 = vsel %vm729_vm1, %v781_v14, %v783_v60  ;;  %v690_v15 = vmax.f32 %v644_v11, 0.0  ;;  %v659_v40 = vadd.f32 %v5085_v8, %v6020_v41 }
 0x13f   : > { %5125 = vmatmul.mubr.msk.f32.gmra.mxu1 %vm1006_vm3, %v6377_v23  ;;  %5204 = vmatmul.mubr.msk.f32.gmra.mxu0 %vm1006_vm3, %v6349_v31  ;;  %v653_v24 = vpop.f32.mrf.mxu0  ;;  %v934_v22 = vrot.slane %v6384_v30, 1  ;;  %v6401_v19 = vsel %vm1645_vm5, %v1677_v45, 0.0  ;;  %v936_v8 = vrot.slane %v6387_v46, 1  ;;  %v1682_v61 = vrot.slane %v6178_v7, 2 }
 0x140   : > { %5127 = vmatprep.mubr.msk.f32.mxu1 %vm1006_vm3, %v6380_v0  ;;  %5206 = vmatprep.mubr.msk.f32.mxu0 %vm1006_vm3, %v6362_v62  ;;  %v787_v38 = vrot.slane %v691_v28, 7  ;;  %v785_v26 = vrot.slane %v690_v15, 7  ;;  %v693_v14 = vmax.f32 %v659_v40, 0.0  ;;  %v654_v11 = vadd.f32 %v6020_v41, %v653_v24 }
 0x141   : > { %v6407_v31 = vsel %vm882_vm2, %v932_v27, %v934_v22  ;;  %v6410_v62 = vsel %vm882_vm2, %v934_v22, %v936_v8  ;;  %v1681_v0 = vsel %vm1652_vm4, %v1678_v47, %v1680_v1  ;;  %v1684_v45 = vrot.slane %v6213_v58, 2 }
 0x142   : > { %8254 = vst [vmem:[#allocation36_spill] sm:$0xff] %v6407_v31  ;;  %8255 = vst [vmem:[#allocation37_spill] sm:$0xff] %v6410_v62  ;;  %v6415_v23 = vsel %vm729_vm1, %v783_v60, %v785_v26  ;;  %v6418_v10 = vsel %vm729_vm1, %v785_v26, %v787_v38  ;;  %v791_v28 = vrot.slane %v693_v14, 7  ;;  %v692_v15 = vmax.f32 %v654_v11, 0.0 }
 0x143   : > { %5128 = vmatmul.mubr.msk.f32.gmra.mxu1 %vm1006_vm3, %v6407_v31  ;;  %5207 = vmatmul.mubr.msk.f32.gmra.mxu0 %vm1006_vm3, %v6401_v19  ;;  %v938_v41 = vrot.slane %v6415_v23, 1  ;;  %v940_v47 = vrot.slane %v6418_v10, 1  ;;  %v6435_v40 = vsel %vm1645_vm5, %v1681_v0, 0.0  ;;  %v6444_v26 = vsel %vm1652_vm4, %v1680_v1, %v1682_v61 }
 0x144   : > { %5130 = vmatprep.mubr.msk.f32.mxu1 %vm1006_vm3, %v6410_v62  ;;  %5209 = vmatprep.mubr.msk.f32.mxu0 %vm1006_vm3, %v6374_v25  ;;  %v6431_v27 = vsel %vm729_vm1, %v791_v28, 0.0  ;;  %v789_v60 = vrot.slane %v692_v15, 7  ;;  %8256 = vst [vmem:[#allocation38_spill] sm:$0xff] %v6435_v40  ;;  %8259 = vst [vmem:[#allocation41_spill] sm:$0xff] %v6444_v26  ;;  %v1685_v14 = vsel %vm1652_vm4, %v1682_v61, %v1684_v45  ;;  %v1686_v0 = vrot.slane %v6216_v49, 2 }
 0x145   : > { %v6438_v24 = vsel %vm882_vm2, %v936_v8, %v938_v41  ;;  %v6441_v22 = vsel %vm882_vm2, %v938_v41, %v940_v47  ;;  %v1688_v8 = vrot.slane %v6250_v2, 2  ;;  %v6465_v61 = vadd.s32 4294967295, %v6077_v34 }
 0x146   : > { %8257 = vst [vmem:[#allocation39_spill] sm:$0xff] %v6438_v24  ;;  %8258 = vst [vmem:[#allocation40_spill] sm:$0xff] %v6441_v22  ;;  %v6448_v11 = vsel %vm729_vm1, %v787_v38, %v789_v60  ;;  %v6451_v15 = vsel %vm729_vm1, %v789_v60, %v791_v28  ;;  %v6474_v28 = vsel %vm1645_vm5, %v1685_v14, 0.0  ;;  %v6481_v41 = vsel %vm1652_vm4, %v1684_v45, %v1686_v0 }
 0x147   : > { %5131 = vmatmul.mubr.msk.f32.gmra.mxu1 %vm1006_vm3, %v6438_v24  ;;  %5210 = vmatmul.mubr.msk.f32.gmra.mxu0 %vm1006_vm3, %v6435_v40  ;;  %v8187_v1 = vrot.slane %v6448_v11, 1  ;;  %8261 = vst [vmem:[#allocation43_spill] sm:$0xff] %v6474_v28  ;;  %8262 = vst [vmem:[#allocation44_spill] sm:$0xff] %v6481_v41  ;;  %v1689_v34 = vsel %vm1652_vm4, %v1686_v0, %v1688_v8  ;;  %v1692_v60 = vrot.slane %v6286_v39, 2  ;;  %vm830_vm6 = vcmp.ge.s32.totalorder %v6465_v61, 0  ;;  %v6498_v0 = vld [vmem:[%s8123_s3 + $0x28] sm:$0xff] }
 0x148   : > { %5133 = vmatprep.mubr.msk.f32.mxu1 %vm1006_vm3, %v6441_v22  ;;  %5212 = vmatprep.mubr.msk.f32.mxu0 %vm1006_vm3, %v6444_v26  ;;  %v1690_v14 = vrot.slane %v6253_v59, 2  ;;  %v1694_v45 = vrot.slane %v6289_v16, 2  ;;  %v2666_v26 = vrot.slane %v6431_v27, 2  ;;  %v6667_v63 = vsel %vm830_vm6, %v6175_v3, 0.0 }
 0x149   : > { %v6470_v38 = vsel %vm882_vm2, %v940_v47, %v8187_v1  ;;  %v8263_v47 = vmov 0.0   ;;  %v6492_v1 = vsel %vm1645_vm5, %v1689_v34, 0.0  ;;  %v6713_v3 = vsel %vm830_vm6, %v6286_v39, 0.0  ;;  %v8273_v39 = vld [vmem:[#allocation10_spill] sm:$0xff] }
 0x14a   : > { %8260 = vst [vmem:[#allocation42_spill] sm:$0xff] %v6470_v38  ;;  %8264 = vst [vmem:[#allocation45_spill] sm:$0xff] %v6492_v1  ;;  %v1693_v34 = vsel %vm1652_vm4, %v1690_v14, %v1692_v60  ;;  %v6515_v40 = vsel %vm1652_vm4, %v1688_v8, %v1690_v14 }
 0x14b   : > { %5134 = vmatmul.mubr.msk.f32.gmra.mxu1 %vm1006_vm3, %v6470_v38  ;;  %5213 = vmatmul.mubr.msk.f32.gmra.mxu0 %vm1006_vm3, %v6474_v28  ;;  %v1696_v28 = vrot.slane %v6317_v44, 2 }
 0x14c   : > { %5215 = vmatprep.mubr.msk.f32.mxu0 %vm1006_vm3, %v6481_v41  ;;  %5138 = vmatprep.mubr.f32.mxu1 %v8263_v47  ;;  %v6506_v41 = vsel %vm830_vm6, %v6030_v57, 0.0  ;;  %v6523_v57 = vsel %vm1645_vm5, %v1693_v34, 0.0  ;;  %v1698_v34 = vrot.slane %v6320_v37, 2 }
 0x14d   : > { %v1697_v14 = vsel %vm1652_vm4, %v1694_v45, %v1696_v28 }
 0x14f   : > { %5139 = vmatmul.mubr.f32.vlgmr.msra.gmra.mxu1 %v8263_v47  ;;  %5216 = vmatmul.mubr.msk.f32.gmra.mxu0 %vm1006_vm3, %v6492_v1  ;;  %v8199_v1 = vrot.slane %v6451_v15, 2  ;;  %v6531_v47 = vsel %vm1652_vm4, %v1692_v60, %v1694_v45  ;;  %v6558_v45 = vsel %vm830_vm6, %v6058_v20, 0.0 }
 0x150   : > { %5237 = vmatpush3.msra.mxu1 %v6210_v50  ;;  %5141 = vmatprep.mubr.msk.f32.mxu1 %vm1006_vm3, %v6506_v41  ;;  %v6528_v50 = vsel %vm830_vm6, %v6040_v5, 0.0  ;;  %v1700_v5 = vrot.slane %v6352_v48, 2 }
 0x151   : > { %5218 = vmatprep.mubr.msk.f32.mxu0 %vm1006_vm3, %v6515_v40  ;;  %5336 = vmatprep.subr.mxu1 %v6498_v0  ;;  %v2667_v8 = vsel %vm1652_vm4, %v8199_v1, %v2666_v26  ;;  %v6553_v26 = vsel %vm1645_vm5, %v1697_v14, 0.0  ;;  %v1704_v14 = vrot.slane %v6384_v30, 2 }
 0x152   : > { %v6545_v60 = vsel %vm1645_vm5, %v2667_v8, 0.0  ;;  %8266 = vst [vmem:[#allocation47_spill] sm:$0xff] %v6553_v26  ;;  %v6565_v8 = vsel %vm1652_vm4, %v1696_v28, %v1698_v34  ;;  %v1701_v1 = vsel %vm1652_vm4, %v1698_v34, %v1700_v5  ;;  %v6581_v28 = vsel %vm830_vm6, %v6080_v35, 0.0 }
 0x153   : > { %5142 = vmatmul.mubr.msk.f32.gmra.mxu1 %vm1006_vm3, %v6027_v56  ;;  %5219 = vmatmul.mubr.msk.f32.gmra.mxu0 %vm1006_vm3, %v6523_v57  ;;  %8265 = vst [vmem:[#allocation46_spill] sm:$0xff] %v6545_v60  ;;  %8267 = vst [vmem:[#allocation48_spill] sm:$0xff] %v6565_v8  ;;  %v1702_v60 = vrot.slane %v6355_v51, 2  ;;  %v6576_v20 = vsel %vm1645_vm5, %v1701_v1, 0.0  ;;  %v1708_v1 = vrot.slane %v6415_v23, 2 }
 0x154   : > { %5144 = vmatprep.mubr.msk.f32.mxu1 %vm1006_vm3, %v6528_v50  ;;  %5221 = vmatprep.mubr.msk.f32.mxu0 %vm1006_vm3, %v6531_v47  ;;  %8268 = vst [vmem:[#allocation49_spill] sm:$0xff] %v6576_v20 }
 0x155   : > { %v6588_v34 = vsel %vm1652_vm4, %v1700_v5, %v1702_v60  ;;  %v6604_v5 = vsel %vm830_vm6, %v6101_v54, 0.0 }
 0x156   : > { %8269 = vst [vmem:[#allocation50_spill] sm:$0xff] %v6588_v34 }
 0x157   : > { %5145 = vmatmul.mubr.msk.f32.gmra.mxu1 %vm1006_vm3, %v6043_v6  ;;  %5222 = vmatmul.mubr.msk.f32.gmra.mxu0 %vm1006_vm3, %v6553_v26  ;;  %v1706_v26 = vrot.slane %v6387_v46, 2 }
 0x158   : > { %5147 = vmatprep.mubr.msk.f32.mxu1 %vm1006_vm3, %v6558_v45  ;;  %5224 = vmatprep.mubr.msk.f32.mxu0 %vm1006_vm3, %v6565_v8  ;;  %v1705_v8 = vsel %vm1652_vm4, %v1702_v60, %v1704_v14 }
 0x159   : > { %v6599_v35 = vsel %vm1645_vm5, %v1705_v8, 0.0  ;;  %v6611_v60 = vsel %vm1652_vm4, %v1704_v14, %v1706_v26  ;;  %v8211_v8 = vrot.slane %v6448_v11, 2 }
 0x15a   : > { %8270 = vst [vmem:[#allocation51_spill] sm:$0xff] %v6611_v60 }
 0x15b   : > { %5148 = vmatmul.mubr.msk.f32.gmra.mxu1 %vm1006_vm3, %v6061_v21  ;;  %5225 = vmatmul.mubr.msk.f32.gmra.mxu0 %vm1006_vm3, %v6576_v20  ;;  %v1710_v20 = vrot.slane %v6418_v10, 2 }
 0x15c   : > { %5150 = vmatprep.mubr.msk.f32.mxu1 %vm1006_vm3, %v6581_v28  ;;  %5227 = vmatprep.mubr.msk.f32.mxu0 %vm1006_vm3, %v6588_v34  ;;  %v1709_v34 = vsel %vm1652_vm4, %v1706_v26, %v1708_v1  ;;  %v6631_v26 = vsel %vm830_vm6, %v6125_v12, 0.0  ;;  %v6654_v12 = vsel %vm830_vm6, %v6151_v42, 0.0  ;;  %v6672_v42 = vld [vmem:[%s8123_s3 + $0x40] sm:$0xff] }
 0x15d   : > { %v6622_v54 = vsel %vm1645_vm5, %v1709_v34, 0.0  ;;  %v6634_v14 = vsel %vm1652_vm4, %v1708_v1, %v1710_v20  ;;  %v6739_v1 = vsel %vm830_vm6, %v6352_v48, 0.0  ;;  %v8277_v48 = vld [vmem:[#allocation16_spill] sm:$0xff] }
 0x15f   : > { %5151 = vmatmul.mubr.msk.f32.gmra.mxu1 %vm1006_vm3, %v6083_v36  ;;  %5228 = vmatmul.mubr.msk.f32.gmra.mxu0 %vm1006_vm3, %v6599_v35 }
 0x160   : > { %5153 = vmatprep.mubr.msk.f32.mxu1 %vm1006_vm3, %v6604_v5  ;;  %5230 = vmatprep.mubr.msk.f32.mxu0 %vm1006_vm3, %v6611_v60  ;;  %v1713_v60 = vsel %vm1652_vm4, %v1710_v20, %v8211_v8  ;;  %v8274_v20 = vld [vmem:[#allocation12_spill] sm:$0xff]  ;;  %v6752_v8 = vsel %vm830_vm6, %v6384_v30, 0.0  ;;  %v8279_v30 = vld [vmem:[#allocation21_spill] sm:$0xff] }
 0x161   : > { %v6645_v34 = vsel %vm1645_vm5, %v1713_v60, 0.0  ;;  %v8276_v60 = vld [vmem:[#allocation15_spill] sm:$0xff] }
 0x163   : > { %5154 = vmatmul.mubr.msk.f32.gmra.mxu1 %vm1006_vm3, %v6104_v55  ;;  %5231 = vmatmul.mubr.msk.f32.gmra.mxu0 %vm1006_vm3, %v6622_v54 }
 0x164   : > { %5156 = vmatprep.mubr.msk.f32.mxu1 %vm1006_vm3, %v6631_v26  ;;  %5233 = vmatprep.mubr.msk.f32.mxu0 %vm1006_vm3, %v6634_v14 }
 0x167   : > { %5157 = vmatmul.mubr.msk.f32.gmra.mxu1 %vm1006_vm3, %v6128_v13  ;;  %5234 = vmatmul.mubr.msk.f32.gmra.mxu0 %vm1006_vm3, %v6645_v34 }
 0x168   : > { %5159 = vmatprep.mubr.msk.f32.mxu1 %vm1006_vm3, %v6654_v12  ;;  %5288 = vmatprep.mubr.msk.f32.mxu0 %vm1006_vm3, %v6037_v4  ;;  %v6687_v4 = vsel %vm830_vm6, %v6213_v58, 0.0  ;;  %v8271_v58 = vld [vmem:[#allocation8_spill] sm:$0xff] }
 0x16b   : > { %5160 = vmatmul.mubr.msk.f32.gmra.mxu1 %vm1006_vm3, %v6154_v43  ;;  %5289 = vmatmul.mubr.msk.f32.vlgmr.msra.gmra.mxu0 %vm1006_vm3, %v6052_v17  ;;  %v6700_v17 = vsel %vm830_vm6, %v6250_v2, 0.0  ;;  %v6726_v2 = vsel %vm830_vm6, %v6317_v44, 0.0  ;;  %v8275_v44 = vld [vmem:[#allocation13_spill] sm:$0xff] }
 0x16c   : > { %5162 = vmatprep.mubr.msk.f32.mxu1 %vm1006_vm3, %v6667_v63  ;;  %5291 = vmatprep.mubr.msk.f32.mxu0 %vm1006_vm3, %v6055_v18 }
 0x16d   : > { %5387 = vmatpush3.msra.mxu0 %v6247_v29  ;;  %v8272_v29 = vld [vmem:[#allocation9_spill] sm:$0xff] }
 0x16e   : > { %5486 = vmatprep.subr.mxu0 %v6672_v42 }
 0x16f   : > { %5163 = vmatmul.mubr.msk.f32.gmra.mxu1 %vm1006_vm3, %v6178_v7  ;;  %5292 = vmatmul.mubr.msk.f32.gmra.mxu0 %vm1006_vm3, %v6072_v32 }
 0x170   : > { %5165 = vmatprep.mubr.msk.f32.mxu1 %vm1006_vm3, %v6687_v4  ;;  %5294 = vmatprep.mubr.msk.f32.mxu0 %vm1006_vm3, %v6075_v33 }
 0x173   : > { %5166 = vmatmul.mubr.msk.f32.gmra.mxu1 %vm1006_vm3, %v6216_v49  ;;  %5295 = vmatmul.mubr.msk.f32.gmra.mxu0 %vm1006_vm3, %v6095_v52 }
 0x174   : > { %5168 = vmatprep.mubr.msk.f32.mxu1 %vm1006_vm3, %v6700_v17  ;;  %5297 = vmatprep.mubr.msk.f32.mxu0 %vm1006_vm3, %v6098_v53 }
 0x177   : > { %5169 = vmatmul.mubr.msk.f32.gmra.mxu1 %vm1006_vm3, %v6253_v59  ;;  %5298 = vmatmul.mubr.msk.f32.gmra.mxu0 %vm1006_vm3, %v6118_v9 }
 0x178   : > { %5171 = vmatprep.mubr.msk.f32.mxu1 %vm1006_vm3, %v6713_v3  ;;  %5300 = vmatprep.mubr.msk.f32.mxu0 %vm1006_vm3, %v8271_v58 }
 0x17b   : > { %5172 = vmatmul.mubr.msk.f32.gmra.mxu1 %vm1006_vm3, %v6289_v16  ;;  %5301 = vmatmul.mubr.msk.f32.gmra.mxu0 %vm1006_vm3, %v8272_v29 }
 0x17c   : > { %5174 = vmatprep.mubr.msk.f32.mxu1 %vm1006_vm3, %v6726_v2  ;;  %5303 = vmatprep.mubr.msk.f32.mxu0 %vm1006_vm3, %v8273_v39 }
 0x17f   : > { %5175 = vmatmul.mubr.msk.f32.gmra.mxu1 %vm1006_vm3, %v6320_v37  ;;  %5304 = vmatmul.mubr.msk.f32.gmra.mxu0 %vm1006_vm3, %v8274_v20 }
 0x180   : > { %5177 = vmatprep.mubr.msk.f32.mxu1 %vm1006_vm3, %v6739_v1  ;;  %5306 = vmatprep.mubr.msk.f32.mxu0 %vm1006_vm3, %v8275_v44  ;;  %v8278_v44 = vld [vmem:[#allocation20_spill] sm:$0xff] }
 0x183   : > { %5178 = vmatmul.mubr.msk.f32.gmra.mxu1 %vm1006_vm3, %v6355_v51  ;;  %5307 = vmatmul.mubr.msk.f32.gmra.mxu0 %vm1006_vm3, %v8276_v60  ;;  %v6765_v60 = vsel %vm830_vm6, %v6415_v23, 0.0  ;;  %v6782_v23 = vld [vmem:[%s8123_s3 + $0x38] sm:$0xff] }
 0x184   : > { %5180 = vmatprep.mubr.msk.f32.mxu1 %vm1006_vm3, %v6752_v8  ;;  %5309 = vmatprep.mubr.msk.f32.mxu0 %vm1006_vm3, %v8277_v48  ;;  %v8280_v48 = vld [vmem:[#allocation22_spill] sm:$0xff] }
 0x187   : > { %5181 = vmatmul.mubr.msk.f32.gmra.mxu1 %vm1006_vm3, %v6387_v46  ;;  %5310 = vmatmul.mubr.msk.f32.gmra.mxu0 %vm1006_vm3, %v8278_v44  ;;  %v8281_v44 = vld [vmem:[#allocation23_spill] sm:$0xff] }
 0x188   : > { %5183 = vmatprep.mubr.msk.f32.mxu1 %vm1006_vm3, %v6765_v60  ;;  %5312 = vmatprep.mubr.msk.f32.mxu0 %vm1006_vm3, %v8279_v30  ;;  %v8282_v30 = vld [vmem:[#allocation27_spill] sm:$0xff] }
 0x18b   : > { %5184 = vmatmul.mubr.msk.f32.gmra.mxu1 %vm1006_vm3, %v6418_v10  ;;  %5313 = vmatmul.mubr.msk.f32.gmra.mxu0 %vm1006_vm3, %v8280_v48 }
 0x18c   : > { %5238 = vmatprep.mubr.msk.f32.mxu1 %vm1006_vm3, %v6506_v41  ;;  %5315 = vmatprep.mubr.msk.f32.mxu0 %vm1006_vm3, %v8281_v44  ;;  %v8283_v41 = vld [vmem:[#allocation28_spill] sm:$0xff]  ;;  %v8284_v44 = vld [vmem:[#allocation29_spill] sm:$0xff] }
 0x18f   : > { %5239 = vmatmul.mubr.msk.f32.vlgmr.msra.gmra.mxu1 %vm1006_vm3, %v6027_v56  ;;  %5316 = vmatmul.mubr.msk.f32.gmra.mxu0 %vm1006_vm3, %v8282_v30  ;;  %v8285_v56 = vld [vmem:[#allocation30_spill] sm:$0xff] }
 0x190   : > { %5337 = vmatpush3.msra.mxu1 %v6498_v0  ;;  %5241 = vmatprep.mubr.msk.f32.mxu1 %vm1006_vm3, %v6528_v50  ;;  %v8286_v0 = vld [vmem:[#allocation34_spill] sm:$0xff] }
 0x191   : > { %5318 = vmatprep.mubr.msk.f32.mxu0 %vm1006_vm3, %v8283_v41  ;;  %5436 = vmatprep.subr.mxu1 %v6782_v23  ;;  %v8287_v41 = vld [vmem:[#allocation35_spill] sm:$0xff] }
 0x193   : > { %5242 = vmatmul.mubr.msk.f32.gmra.mxu1 %vm1006_vm3, %v6043_v6  ;;  %5319 = vmatmul.mubr.msk.f32.gmra.mxu0 %vm1006_vm3, %v8284_v44 }
 0x194   : > { %5244 = vmatprep.mubr.msk.f32.mxu1 %vm1006_vm3, %v6558_v45  ;;  %5321 = vmatprep.mubr.msk.f32.mxu0 %vm1006_vm3, %v8285_v56 }
 0x197   : > { %5245 = vmatmul.mubr.msk.f32.gmra.mxu1 %vm1006_vm3, %v6061_v21  ;;  %5322 = vmatmul.mubr.msk.f32.gmra.mxu0 %vm1006_vm3, %v8286_v0  ;;  %v8313_v0 = vld [vmem:[#allocation47_spill] sm:$0xff] }
 0x198   : > { %5247 = vmatprep.mubr.msk.f32.mxu1 %vm1006_vm3, %v6581_v28  ;;  %5324 = vmatprep.mubr.msk.f32.mxu0 %vm1006_vm3, %v8287_v41  ;;  %v2391_v41 = vrot.slane %v6451_v15, 1 }
 0x19b   : > { %5248 = vmatmul.mubr.msk.f32.gmra.mxu1 %vm1006_vm3, %v6083_v36  ;;  %5325 = vmatmul.mubr.msk.f32.gmra.mxu0 %vm1006_vm3, %v6407_v31 }
 0x19c   : > { %5250 = vmatprep.mubr.msk.f32.mxu1 %vm1006_vm3, %v6604_v5  ;;  %5327 = vmatprep.mubr.msk.f32.mxu0 %vm1006_vm3, %v6410_v62  ;;  %v8288_v62 = vrot.slane %v6448_v11, 1 }
 0x19e   : > { %v6834_v31 = vsel %vm882_vm2, %v8288_v62, %v2391_v41 }
 0x19f   : > { %5251 = vmatmul.mubr.msk.f32.gmra.mxu1 %vm1006_vm3, %v6104_v55  ;;  %5328 = vmatmul.mubr.msk.f32.gmra.mxu0 %vm1006_vm3, %v6438_v24  ;;  %8289 = vst [vmem:[#allocation8_spill] sm:$0xff] %v6834_v31  ;;  %v2393_v24 = vrot.slane %v6431_v27, 1  ;;  %v8296_v27 = vld [vmem:[#allocation24_spill] sm:$0xff] }
 0x1a0   : > { %5253 = vmatprep.mubr.msk.f32.mxu1 %vm1006_vm3, %v6631_v26  ;;  %5330 = vmatprep.mubr.msk.f32.mxu0 %vm1006_vm3, %v6441_v22 }
 0x1a1   : > { %v6842_v22 = vsel %vm882_vm2, %v2391_v41, %v2393_v24  ;;  %v8297_v24 = vld [vmem:[#allocation25_spill] sm:$0xff] }
 0x1a2   : > { %8290 = vst [vmem:[#allocation9_spill] sm:$0xff] %v6842_v22 }
 0x1a3   : > { %5254 = vmatmul.mubr.msk.f32.gmra.mxu1 %vm1006_vm3, %v6128_v13  ;;  %5331 = vmatmul.mubr.msk.f32.gmra.mxu0 %vm1006_vm3, %v6470_v38 }
 0x1a4   : > { %5256 = vmatprep.mubr.msk.f32.mxu1 %vm1006_vm3, %v6654_v12  ;;  %5333 = vmatprep.mubr.msk.f32.mxu0 %vm1006_vm3, %v6834_v31 }
 0x1a7   : > { %5257 = vmatmul.mubr.msk.f32.gmra.mxu1 %vm1006_vm3, %v6154_v43  ;;  %5334 = vmatmul.mubr.msk.f32.gmra.mxu0 %vm1006_vm3, %v6842_v22 }
 0x1a8   : > { %5259 = vmatprep.mubr.msk.f32.mxu1 %vm1006_vm3, %v6667_v63  ;;  %5388 = vmatprep.mubr.msk.f32.mxu0 %vm1006_vm3, %v6528_v50  ;;  %v8298_v50 = vld [vmem:[#allocation26_spill] sm:$0xff] }
 0x1ab   : > { %5260 = vmatmul.mubr.msk.f32.gmra.mxu1 %vm1006_vm3, %v6178_v7  ;;  %5389 = vmatmul.mubr.msk.f32.vlgmr.msra.gmra.mxu0 %vm1006_vm3, %v6043_v6  ;;  %v2123_v6 = vsel %vm830_vm6, %v6448_v11, 0.0 }
 0x1ac   : > { %5262 = vmatprep.mubr.msk.f32.mxu1 %vm1006_vm3, %v6687_v4  ;;  %5391 = vmatprep.mubr.msk.f32.mxu0 %vm1006_vm3, %v6558_v45  ;;  %v8299_v45 = vld [vmem:[#allocation31_spill] sm:$0xff] }
 0x1ad   : > { %5487 = vmatpush3.msra.mxu0 %v6672_v42  ;;  %v8303_v42 = vld [vmem:[#allocation38_spill] sm:$0xff] }
 0x1af   : > { %5263 = vmatmul.mubr.msk.f32.gmra.mxu1 %vm1006_vm3, %v6216_v49  ;;  %5392 = vmatmul.mubr.msk.f32.gmra.mxu0 %vm1006_vm3, %v6061_v21  ;;  %v6923_v21 = vpop.f32.mrf.mxu0 }
 0x1b0   : > { %5265 = vmatprep.mubr.msk.f32.mxu1 %vm1006_vm3, %v6700_v17  ;;  %5394 = vmatprep.mubr.msk.f32.mxu0 %vm1006_vm3, %v6581_v28 }
 0x1b3   : > { %5266 = vmatmul.mubr.msk.f32.gmra.mxu1 %vm1006_vm3, %v6253_v59  ;;  %5395 = vmatmul.mubr.msk.f32.gmra.mxu0 %vm1006_vm3, %v6083_v36  ;;  %v8291_v36 = vld [vmem:[#allocation11_spill] sm:$0xff] }
 0x1b4   : > { %5268 = vmatprep.mubr.msk.f32.mxu1 %vm1006_vm3, %v6713_v3  ;;  %5397 = vmatprep.mubr.msk.f32.mxu0 %vm1006_vm3, %v6604_v5  ;;  %v8300_v5 = vld [vmem:[#allocation32_spill] sm:$0xff] }
 0x1b7   : > { %5269 = vmatmul.mubr.msk.f32.gmra.mxu1 %vm1006_vm3, %v6289_v16  ;;  %5398 = vmatmul.mubr.msk.f32.gmra.mxu0 %vm1006_vm3, %v6104_v55  ;;  %v8292_v55 = vld [vmem:[#allocation14_spill] sm:$0xff] }
 0x1b8   : > { %5271 = vmatprep.mubr.msk.f32.mxu1 %vm1006_vm3, %v6726_v2  ;;  %5400 = vmatprep.mubr.msk.f32.mxu0 %vm1006_vm3, %v6631_v26 }
 0x1bb   : > { %5272 = vmatmul.mubr.msk.f32.gmra.mxu1 %vm1006_vm3, %v6320_v37  ;;  %5401 = vmatmul.mubr.msk.f32.gmra.mxu0 %vm1006_vm3, %v6128_v13  ;;  %v6933_v13 = vpop.f32.mrf.mxu0 }
 0x1bc   : > { %5274 = vmatprep.mubr.msk.f32.mxu1 %vm1006_vm3, %v6739_v1  ;;  %5403 = vmatprep.mubr.msk.f32.mxu0 %vm1006_vm3, %v6654_v12  ;;  %v8302_v12 = vmov 0.0  }
 0x1bf   : > { %5275 = vmatmul.mubr.msk.f32.gmra.mxu1 %vm1006_vm3, %v6355_v51  ;;  %5404 = vmatmul.mubr.msk.f32.gmra.mxu0 %vm1006_vm3, %v6154_v43  ;;  %v8293_v43 = vld [vmem:[#allocation17_spill] sm:$0xff] }
 0x1c0   : > { %5277 = vmatprep.mubr.msk.f32.mxu1 %vm1006_vm3, %v6752_v8  ;;  %5406 = vmatprep.mubr.msk.f32.mxu0 %vm1006_vm3, %v6667_v63 }
 0x1c3   : > { %5278 = vmatmul.mubr.msk.f32.gmra.mxu1 %vm1006_vm3, %v6387_v46  ;;  %5407 = vmatmul.mubr.msk.f32.gmra.mxu0 %vm1006_vm3, %v6178_v7 }
 0x1c4   : > { %5280 = vmatprep.mubr.msk.f32.mxu1 %vm1006_vm3, %v6765_v60  ;;  %5409 = vmatprep.mubr.msk.f32.mxu0 %vm1006_vm3, %v6687_v4  ;;  %v8304_v4 = vld [vmem:[#allocation41_spill] sm:$0xff] }
 0x1c7   : > { %5281 = vmatmul.mubr.msk.f32.gmra.mxu1 %vm1006_vm3, %v6418_v10  ;;  %5410 = vmatmul.mubr.msk.f32.gmra.mxu0 %vm1006_vm3, %v6216_v49  ;;  %v8294_v49 = vld [vmem:[#allocation18_spill] sm:$0xff] }
 0x1c8   : > { %5283 = vmatprep.mubr.msk.f32.mxu1 %vm1006_vm3, %v2123_v6  ;;  %5412 = vmatprep.mubr.msk.f32.mxu0 %vm1006_vm3, %v6700_v17 }
 0x1cb   : > { %5284 = vmatmul.mubr.msk.f32.gmra.mxu1 %vm1006_vm3, %v6451_v15  ;;  %5413 = vmatmul.mubr.msk.f32.gmra.mxu0 %vm1006_vm3, %v6253_v59  ;;  %v8295_v59 = vld [vmem:[#allocation19_spill] sm:$0xff] }
 0x1cc   : > { %5338 = vmatprep.mubr.msk.f32.mxu1 %vm1006_vm3, %v8291_v36  ;;  %5415 = vmatprep.mubr.msk.f32.mxu0 %vm1006_vm3, %v6713_v3 }
 0x1cf   : > { %5339 = vmatmul.mubr.msk.f32.vlgmr.msra.gmra.mxu1 %vm1006_vm3, %v8292_v55  ;;  %5416 = vmatmul.mubr.msk.f32.gmra.mxu0 %vm1006_vm3, %v6289_v16  ;;  %v8308_v55 = vld [vmem:[#allocation45_spill] sm:$0xff] }
 0x1d0   : > { %5437 = vmatpush3.msra.mxu1 %v6782_v23  ;;  %5341 = vmatprep.mubr.msk.f32.mxu1 %vm1006_vm3, %v8293_v43 }
 0x1d1   : > { %5418 = vmatprep.mubr.msk.f32.mxu0 %vm1006_vm3, %v6726_v2 }
 0x1d2   : > { %v6940_v7 = vpop.f32.mrf.mxu0 }
 0x1d3   : > { %5342 = vmatmul.mubr.msk.f32.gmra.mxu1 %vm1006_vm3, %v8294_v49  ;;  %5419 = vmatmul.mubr.msk.f32.gmra.mxu0 %vm1006_vm3, %v6320_v37 }
 0x1d4   : > { %5344 = vmatprep.mubr.msk.f32.mxu1 %vm1006_vm3, %v8295_v59  ;;  %5421 = vmatprep.mubr.msk.f32.mxu0 %vm1006_vm3, %v6739_v1  ;;  %v6950_v16 = vpop.f32.mrf.mxu0  ;;  %v8305_v1 = vld [vmem:[#allocation43_spill] sm:$0xff] }
 0x1d6   : > { %v6952_v62 = vpop.f32.mrf.mxu0 }
 0x1d7   : > { %5345 = vmatmul.mubr.msk.f32.gmra.mxu1 %vm1006_vm3, %v8296_v27  ;;  %5422 = vmatmul.mubr.msk.f32.gmra.mxu0 %vm1006_vm3, %v6355_v51 }
 0x1d8   : > { %5347 = vmatprep.mubr.msk.f32.mxu1 %vm1006_vm3, %v8297_v24  ;;  %5424 = vmatprep.mubr.msk.f32.mxu0 %vm1006_vm3, %v6752_v8  ;;  %v6962_v37 = vpop.f32.mrf.mxu0  ;;  %v8301_v8 = vld [vmem:[#allocation33_spill] sm:$0xff] }
 0x1da   : > { %v6964_v61 = vpop.f32.mrf.mxu0 }
 0x1db   : > { %5348 = vmatmul.mubr.msk.f32.gmra.mxu1 %vm1006_vm3, %v8298_v50  ;;  %5425 = vmatmul.mubr.msk.f32.gmra.mxu0 %vm1006_vm3, %v6387_v46 }
 0x1dc   : > { %5350 = vmatprep.mubr.msk.f32.mxu1 %vm1006_vm3, %v8299_v45  ;;  %5427 = vmatprep.mubr.msk.f32.mxu0 %vm1006_vm3, %v6765_v60  ;;  %v6974_v51 = vpop.f32.mrf.mxu0  ;;  %v8306_v60 = vld [vmem:[#allocation44_spill] sm:$0xff] }
 0x1de   : > { %v6976_v28 = vpop.f32.mrf.mxu0 }
 0x1df   : > { %5351 = vmatmul.mubr.msk.f32.gmra.mxu1 %vm1006_vm3, %v8300_v5  ;;  %5428 = vmatmul.mubr.msk.f32.gmra.mxu0 %vm1006_vm3, %v6418_v10 }
 0x1e0   : > { %5353 = vmatprep.mubr.msk.f32.mxu1 %vm1006_vm3, %v8301_v8  ;;  %5430 = vmatprep.mubr.msk.f32.mxu0 %vm1006_vm3, %v2123_v6  ;;  %v6985_v46 = vpop.f32.mrf.mxu0 }
 0x1e2   : > { %v6987_v26 = vpop.f32.mrf.mxu0 }
 0x1e3   : > { %5354 = vmatmul.mubr.msk.f32.gmra.mxu1 %vm1006_vm3, %v6401_v19  ;;  %5431 = vmatmul.mubr.msk.f32.gmra.mxu0 %vm1006_vm3, %v6451_v15 }
 0x1e4   : > { %5356 = vmatprep.mubr.msk.f32.mxu1 %vm1006_vm3, %v6374_v25  ;;  %5433 = vmatprep.mubr.f32.mxu0 %v8302_v12  ;;  %v6996_v10 = vpop.f32.mrf.mxu0 }
 0x1e7   : > { %v6998_v63 = vpop.f32.mrf.mxu0  ;;  %5357 = vmatmul.mubr.msk.f32.gmra.mxu1 %vm1006_vm3, %v8303_v42  ;;  %5434 = vmatmul.mubr.f32.gmra.mxu0 %v8302_v12 }
 0x1e8   : > { %5359 = vmatprep.mubr.msk.f32.mxu1 %vm1006_vm3, %v8304_v4  ;;  %5488 = vmatprep.mubr.msk.f32.mxu0 %vm1006_vm3, %v8293_v43 }
 0x1e9   : > { %v7007_v17 = vpop.f32.mrf.mxu0 }
 0x1ea   : > { %v7009_v3 = vpop.f32.mrf.mxu1 }
 0x1eb   : > { %v7011_v2 = vpop.f32.mrf.mxu0  ;;  %5360 = vmatmul.mubr.msk.f32.gmra.mxu1 %vm1006_vm3, %v8305_v1  ;;  %5489 = vmatmul.mubr.msk.f32.vlgmr.msra.gmra.mxu0 %vm1006_vm3, %v8294_v49 }
 0x1ec   : > { %5362 = vmatprep.mubr.msk.f32.mxu1 %vm1006_vm3, %v8306_v60  ;;  %5491 = vmatprep.mubr.msk.f32.mxu0 %vm1006_vm3, %v8295_v59  ;;  %v7021_v23 = vpop.f32.mrf.mxu1 }
 0x1ed   : > { %v7023_v41 = vpop.f32.mrf.mxu0 }
 0x1ef   : > { %v7025_v6 = vpop.f32.mrf.mxu1  ;;  %v7027_v36 = vpop.f32.mrf.mxu0  ;;  %5363 = vmatmul.mubr.msk.f32.gmra.mxu1 %vm1006_vm3, %v8308_v55  ;;  %5492 = vmatmul.mubr.msk.f32.gmra.mxu0 %vm1006_vm3, %v8296_v27 }
 0x1f0   : > { %8307 = vst [vmem:[#allocation10_spill] sm:$0xff] %v7025_v6  ;;  %5365 = vmatprep.mubr.msk.f32.mxu1 %vm1006_vm3, %v6515_v40  ;;  %5494 = vmatprep.mubr.msk.f32.mxu0 %vm1006_vm3, %v8297_v24  ;;  %v8327_v6 = vrot.slane %v6448_v11, 2 }
 0x1f1   : > { %v7037_v43 = vpop.f32.mrf.mxu1  ;;  %v7039_v49 = vpop.f32.mrf.mxu0 }
 0x1f2   : > { %8309 = vst [vmem:[#allocation12_spill] sm:$0xff] %v7037_v43 }
 0x1f3   : > { %v7041_v59 = vpop.f32.mrf.mxu1  ;;  %v7043_v22 = vpop.f32.mrf.mxu0  ;;  %5366 = vmatmul.mubr.msk.f32.gmra.mxu1 %vm1006_vm3, %v6523_v57  ;;  %5495 = vmatmul.mubr.msk.f32.gmra.mxu0 %vm1006_vm3, %v8298_v50  ;;  %v8314_v50 = vld [vmem:[#allocation48_spill] sm:$0xff] }
 0x1f4   : > { %8310 = vst [vmem:[#allocation22_spill] sm:$0xff] %v7041_v59  ;;  %5368 = vmatprep.mubr.msk.f32.mxu1 %vm1006_vm3, %v6531_v47  ;;  %5497 = vmatprep.mubr.msk.f32.mxu0 %vm1006_vm3, %v8299_v45  ;;  %v8317_v59 = vld [vmem:[#allocation49_spill] sm:$0xff] }
 0x1f5   : > { %v7053_v27 = vpop.f32.mrf.mxu1  ;;  %v7055_v24 = vpop.f32.mrf.mxu0 }
 0x1f6   : > { %8311 = vst [vmem:[#allocation11_spill] sm:$0xff] %v7053_v27 }
 0x1f7   : > { %v7057_v31 = vpop.f32.mrf.mxu1  ;;  %v7059_v38 = vpop.f32.mrf.mxu0  ;;  %5369 = vmatmul.mubr.msk.f32.gmra.mxu1 %vm1006_vm3, %v8313_v0  ;;  %5498 = vmatmul.mubr.msk.f32.gmra.mxu0 %vm1006_vm3, %v8300_v5  ;;  %v8318_v5 = vld [vmem:[#allocation50_spill] sm:$0xff] }
 0x1f8   : > { %8312 = vst [vmem:[#allocation14_spill] sm:$0xff] %v7057_v31  ;;  %5371 = vmatprep.mubr.msk.f32.mxu1 %vm1006_vm3, %v8314_v50  ;;  %5500 = vmatprep.mubr.msk.f32.mxu0 %vm1006_vm3, %v8301_v8 }
 0x1f9   : > { %v7069_v45 = vpop.f32.mrf.mxu1  ;;  %v7071_v27 = vpop.f32.mrf.mxu0 }
 0x1fa   : > { %8315 = vst [vmem:[#allocation17_spill] sm:$0xff] %v7069_v45 }
 0x1fb   : > { %v7073_v56 = vpop.f32.mrf.mxu1  ;;  %v7075_v31 = vpop.f32.mrf.mxu0  ;;  %5372 = vmatmul.mubr.msk.f32.gmra.mxu1 %vm1006_vm3, %v8317_v59  ;;  %5501 = vmatmul.mubr.msk.f32.gmra.mxu0 %vm1006_vm3, %v6401_v19  ;;  %v8321_v19 = vld [vmem:[#allocation51_spill] sm:$0xff] }
 0x1fc   : > { %8316 = vst [vmem:[#allocation18_spill] sm:$0xff] %v7073_v56  ;;  %5374 = vmatprep.mubr.msk.f32.mxu1 %vm1006_vm3, %v8318_v5  ;;  %5503 = vmatprep.mubr.msk.f32.mxu0 %vm1006_vm3, %v6374_v25 }
 0x1fd   : > { %v7085_v8 = vpop.f32.mrf.mxu1  ;;  %v7087_v45 = vpop.f32.mrf.mxu0 }
 0x1fe   : > { %8319 = vst [vmem:[#allocation19_spill] sm:$0xff] %v7085_v8 }
 0x1ff   : > { %v7089_v44 = vpop.f32.mrf.mxu1  ;;  %v7091_v56 = vpop.f32.mrf.mxu0  ;;  %5375 = vmatmul.mubr.msk.f32.gmra.mxu1 %vm1006_vm3, %v6599_v35  ;;  %5504 = vmatmul.mubr.msk.f32.gmra.mxu0 %vm1006_vm3, %v8303_v42 }
 0x200   : > { %8320 = vst [vmem:[#allocation24_spill] sm:$0xff] %v7089_v44  ;;  %5377 = vmatprep.mubr.msk.f32.mxu1 %vm1006_vm3, %v8321_v19  ;;  %5506 = vmatprep.mubr.msk.f32.mxu0 %vm1006_vm3, %v8304_v4 }
 0x201   : > { %v7101_v25 = vpop.f32.mrf.mxu1  ;;  %v7103_v8 = vpop.f32.mrf.mxu0 }
 0x202   : > { %8322 = vst [vmem:[#allocation25_spill] sm:$0xff] %v7101_v25 }
 0x203   : > { %v7105_v43 = vpop.f32.mrf.mxu1  ;;  %v7107_v44 = vpop.f32.mrf.mxu0  ;;  %5378 = vmatmul.mubr.msk.f32.gmra.mxu1 %vm1006_vm3, %v6622_v54  ;;  %5507 = vmatmul.mubr.msk.f32.gmra.mxu0 %vm1006_vm3, %v8305_v1  ;;  %v8326_v1 = vrot.slane %v6451_v15, 2  ;;  %v8330_v15 = vld [vmem:[#allocation46_spill] sm:$0xff] }
 0x204   : > { %8323 = vst [vmem:[#allocation26_spill] sm:$0xff] %v7105_v43  ;;  %5380 = vmatprep.mubr.msk.f32.mxu1 %vm1006_vm3, %v6634_v14  ;;  %5509 = vmatprep.mubr.msk.f32.mxu0 %vm1006_vm3, %v8306_v60 }
 0x205   : > { %v7117_v42 = vpop.f32.mrf.mxu1  ;;  %v7119_v4 = vpop.f32.mrf.mxu0  ;;  %v7134_v60 = vsel %vm1652_vm4, %v8327_v6, %v8326_v1 }
 0x206   : > { %8324 = vst [vmem:[#allocation31_spill] sm:$0xff] %v7117_v42 }
 0x207   : > { %v7121_v25 = vpop.f32.mrf.mxu1  ;;  %v7123_v43 = vpop.f32.mrf.mxu0  ;;  %5381 = vmatmul.mubr.msk.f32.gmra.mxu1 %vm1006_vm3, %v6645_v34  ;;  %5510 = vmatmul.mubr.msk.f32.gmra.mxu0 %vm1006_vm3, %v8308_v55 }
 0x208   : > { %8325 = vst [vmem:[#allocation32_spill] sm:$0xff] %v7121_v25  ;;  %5383 = vmatprep.mubr.msk.f32.mxu1 %vm1006_vm3, %v7134_v60  ;;  %5512 = vmatprep.mubr.msk.f32.mxu0 %vm1006_vm3, %v6515_v40 }
 0x209   : > { %v7140_v25 = vpop.f32.mrf.mxu1  ;;  %v7142_v42 = vpop.f32.mrf.mxu0 }
 0x20a   : > { %8328 = vst [vmem:[#allocation33_spill] sm:$0xff] %v7140_v25 }
 0x20b   : > { %v7144_v30 = vpop.f32.mrf.mxu1  ;;  %v7146_v55 = vpop.f32.mrf.mxu0  ;;  %5384 = vmatmul.mubr.msk.f32.gmra.mxu1 %vm1006_vm3, %v8330_v15  ;;  %5513 = vmatmul.mubr.msk.f32.gmra.mxu0 %vm1006_vm3, %v6523_v57 }
 0x20c   : > { %8329 = vst [vmem:[#allocation38_spill] sm:$0xff] %v7144_v30  ;;  %5438 = vmatprep.mubr.msk.f32.mxu1 %vm1006_vm3, %v6055_v18  ;;  %5515 = vmatprep.mubr.msk.f32.mxu0 %vm1006_vm3, %v6531_v47 }
 0x20d   : > { %v7156_v40 = vpop.f32.mrf.mxu1  ;;  %v7158_v11 = vpop.f32.mrf.mxu0 }
 0x20e   : > { %8331 = vst [vmem:[#allocation41_spill] sm:$0xff] %v7156_v40 }
 0x20f   : > { %v5140_v6 = vpop.f32.mrf.mxu1  ;;  %v7160_v1 = vpop.f32.mrf.mxu0  ;;  %5439 = vmatmul.mubr.msk.f32.vlgmr.msra.gmra.mxu1 %vm1006_vm3, %v6072_v32  ;;  %5516 = vmatmul.mubr.msk.f32.gmra.mxu0 %vm1006_vm3, %v8313_v0 }
 0x210   : > { %v1487_v57 = vadd.f32 %v5140_v6, %v6923_v21  ;;  %5441 = vmatprep.mubr.msk.f32.mxu1 %vm1006_vm3, %v6075_v33  ;;  %5518 = vmatprep.mubr.msk.f32.mxu0 %vm1006_vm3, %v8314_v50 }
 0x211   : > { %v1481_v18 = vpop.f32.mrf.mxu1  ;;  %v7171_v47 = vpop.f32.mrf.mxu0 }
 0x212   : > { %v1482_v40 = vadd.f32 %v1481_v18, %v6933_v13  ;;  %v7175_v30 = vadd.f32 %v7011_v2, %v1487_v57 }
 0x213   : > { %v5143_v32 = vpop.f32.mrf.mxu1  ;;  %v7177_v25 = vpop.f32.mrf.mxu0  ;;  %5442 = vmatmul.mubr.msk.f32.gmra.mxu1 %vm1006_vm3, %v6095_v52  ;;  %5519 = vmatmul.mubr.msk.f32.gmra.mxu0 %vm1006_vm3, %v8317_v59 }
 0x214   : > { %v1497_v33 = vadd.f32 %v5143_v32, %v6940_v7  ;;  %5444 = vmatprep.mubr.msk.f32.mxu1 %vm1006_vm3, %v6098_v53  ;;  %5521 = vmatprep.mubr.msk.f32.mxu0 %vm1006_vm3, %v8318_v5  ;;  %v7189_v0 = vadd.f32 %v7023_v41, %v1482_v40 }
 0x215   : > { %v1491_v21 = vpop.f32.mrf.mxu1  ;;  %v7191_v13 = vpop.f32.mrf.mxu0 }
 0x216   : > { %v1492_v2 = vadd.f32 %v1491_v21, %v6950_v16  ;;  %v7195_v52 = vadd.f32 %v7027_v36, %v1497_v33 }
 0x217   : > { %v5146_v59 = vpop.f32.mrf.mxu1  ;;  %v7197_v50 = vpop.f32.mrf.mxu0  ;;  %5445 = vmatmul.mubr.msk.f32.gmra.mxu1 %vm1006_vm3, %v6118_v9  ;;  %5522 = vmatmul.mubr.msk.f32.gmra.mxu0 %vm1006_vm3, %v6599_v35  ;;  %v3785_v35 = vld [vmem:[%s8125_s5] sm:$0xff] }
 0x218   : > { %v1507_v53 = vadd.f32 %v5146_v59, %v6952_v62  ;;  %5447 = vmatprep.mubr.msk.f32.mxu1 %vm1006_vm3, %v8271_v58  ;;  %5524 = vmatprep.mubr.msk.f32.mxu0 %vm1006_vm3, %v8321_v19  ;;  %v7209_v7 = vadd.f32 %v7039_v49, %v1492_v2 }
 0x219   : > { %v1501_v16 = vpop.f32.mrf.mxu1  ;;  %v7211_v41 = vpop.f32.mrf.mxu0  ;;  %5536 = vmatprep.subr.mxu1 %v3785_v35 }
 0x21a   : > { %v1502_v36 = vadd.f32 %v1501_v16, %v6962_v37  ;;  %v7215_v9 = vadd.f32 %v7043_v22, %v1507_v53  ;;  %5537 = vmatpush3.msra.mxu1 %v3785_v35  ;;  %v8337_v35 = vld [vmem:[#allocation23_spill] sm:$0xff] }
 0x21b   : > { %v5149_v62 = vpop.f32.mrf.mxu1  ;;  %v7220_v58 = vpop.f32.mrf.mxu0  ;;  %5448 = vmatmul.mubr.msk.f32.gmra.mxu1 %vm1006_vm3, %v8272_v29  ;;  %5525 = vmatmul.mubr.msk.f32.gmra.mxu0 %vm1006_vm3, %v6622_v54 }
 0x21c   : > { %v1517_v49 = vadd.f32 %v5149_v62, %v6964_v61  ;;  %5450 = vmatprep.mubr.msk.f32.mxu1 %vm1006_vm3, %v8273_v39  ;;  %5527 = vmatprep.mubr.msk.f32.mxu0 %vm1006_vm3, %v6634_v14  ;;  %v7232_v22 = vadd.f32 %v7055_v24, %v1502_v36  ;;  %v8332_v39 = vld [vmem:[#allocation13_spill] sm:$0xff] }
 0x21d   : > { %v1511_v37 = vpop.f32.mrf.mxu1  ;;  %v7234_v5 = vpop.f32.mrf.mxu0 }
 0x21e   : > { %v1512_v29 = vadd.f32 %v1511_v37, %v6974_v51  ;;  %v7238_v19 = vadd.f32 %v7059_v38, %v1517_v49 }
 0x21f   : > { %v5152_v54 = vpop.f32.mrf.mxu1  ;;  %v7240_v61 = vpop.f32.mrf.mxu0  ;;  %5451 = vmatmul.mubr.msk.f32.gmra.mxu1 %vm1006_vm3, %v8274_v20  ;;  %5528 = vmatmul.mubr.msk.f32.gmra.mxu0 %vm1006_vm3, %v6645_v34 }
 0x220   : > { %v1527_v14 = vadd.f32 %v5152_v54, %v6976_v28  ;;  %5453 = vmatprep.mubr.msk.f32.mxu1 %vm1006_vm3, %v8332_v39  ;;  %5530 = vmatprep.mubr.msk.f32.mxu0 %vm1006_vm3, %v7134_v60  ;;  %v7252_v38 = vadd.f32 %v7071_v27, %v1512_v29  ;;  %v8333_v28 = vld [vmem:[#allocation15_spill] sm:$0xff]  ;;  %v8334_v60 = vld [vmem:[#allocation16_spill] sm:$0xff] }
 0x221   : > { %v1521_v51 = vpop.f32.mrf.mxu1  ;;  %v7254_v24 = vpop.f32.mrf.mxu0 }
 0x222   : > { %v1522_v40 = vadd.f32 %v1521_v51, %v6985_v46  ;;  %v7258_v20 = vadd.f32 %v7075_v31, %v1527_v14  ;;  %v8340_v14 = vld [vmem:[#allocation28_spill] sm:$0xff] }
 0x223   : > { %v5155_v34 = vpop.f32.mrf.mxu1  ;;  %v7260_v6 = vpop.f32.mrf.mxu0  ;;  %5454 = vmatmul.mubr.msk.f32.gmra.mxu1 %vm1006_vm3, %v8333_v28  ;;  %5531 = vmatmul.mubr.msk.f32.gmra.mxu0 %vm1006_vm3, %v8330_v15 }
 0x224   : > { %v1537_v27 = vadd.f32 %v5155_v34, %v6987_v26  ;;  %5456 = vmatprep.mubr.msk.f32.mxu1 %vm1006_vm3, %v8334_v60  ;;  %5533 = vmatprep.mubr.f32.mxu0 %v8302_v12  ;;  %v7271_v46 = vadd.f32 %v7087_v45, %v1522_v40  ;;  %v8335_v26 = vld [vmem:[#allocation20_spill] sm:$0xff]  ;;  %v8336_v45 = vld [vmem:[#allocation21_spill] sm:$0xff]  ;;  %v8343_v60 = vld [vmem:[#allocation22_spill] sm:$0xff] }
 0x225   : > { %v1531_v31 = vpop.f32.mrf.mxu1  ;;  %v7273_v57 = vpop.f32.mrf.mxu0 }
 0x226   : > { %v1532_v18 = vadd.f32 %v1531_v31, %v6996_v10  ;;  %v7277_v32 = vadd.f32 %v7091_v56, %v1537_v27  ;;  %v8342_v27 = vld [vmem:[#allocation29_spill] sm:$0xff] }
 0x227   : > { %v5158_v33 = vpop.f32.mrf.mxu1  ;;  %v7279_v15 = vpop.f32.mrf.mxu0  ;;  %5457 = vmatmul.mubr.msk.f32.gmra.mxu1 %vm1006_vm3, %v8335_v26  ;;  %5534 = vmatmul.mubr.f32.gmra.mxu0 %v8302_v12 }
 0x228   : > { %v1547_v21 = vadd.f32 %v5158_v33, %v6998_v63  ;;  %5459 = vmatprep.mubr.msk.f32.mxu1 %vm1006_vm3, %v8336_v45  ;;  %v7288_v2 = vadd.f32 %v7103_v8, %v1532_v18  ;;  %v8344_v18 = vld [vmem:[#allocation30_spill] sm:$0xff] }
 0x229   : > { %v1541_v10 = vpop.f32.mrf.mxu1  ;;  %v7290_v59 = vpop.f32.mrf.mxu0 }
 0x22a   : > { %v1542_v56 = vadd.f32 %v1541_v10, %v7007_v17  ;;  %v7294_v53 = vadd.f32 %v7107_v44, %v1547_v21  ;;  %v8345_v21 = vld [vmem:[#allocation11_spill] sm:$0xff] }
 0x22b   : > { %v5161_v16 = vpop.f32.mrf.mxu1  ;;  %v7296_v36 = vpop.f32.mrf.mxu0  ;;  %5460 = vmatmul.mubr.msk.f32.gmra.mxu1 %vm1006_vm3, %v8280_v48  ;;  %v8338_v48 = vld [vmem:[#allocation27_spill] sm:$0xff] }
 0x22c   : > { %v1557_v63 = vadd.f32 %v5161_v16, %v7009_v3  ;;  %5462 = vmatprep.mubr.msk.f32.mxu1 %vm1006_vm3, %v8337_v35  ;;  %v7304_v8 = vadd.f32 %v7119_v4, %v1542_v56  ;;  %v8339_v3 = vld [vmem:[#allocation10_spill] sm:$0xff] }
 0x22d   : > { %v1551_v62 = vpop.f32.mrf.mxu1  ;;  %v7306_v49 = vpop.f32.mrf.mxu0  ;;  %v8346_v16 = vld [vmem:[#allocation34_spill] sm:$0xff] }
 0x22e   : > { %v1552_v44 = vadd.f32 %v1551_v62, %v7021_v23  ;;  %v7310_v17 = vadd.f32 %v7123_v43, %v1557_v63  ;;  %v8341_v23 = vld [vmem:[#allocation12_spill] sm:$0xff]  ;;  %v8347_v63 = vld [vmem:[#allocation14_spill] sm:$0xff]  ;;  %v8348_v62 = vld [vmem:[#allocation35_spill] sm:$0xff] }
 0x22f   : > { %v5164_v37 = vpop.f32.mrf.mxu1  ;;  %v7312_v29 = vpop.f32.mrf.mxu0  ;;  %5463 = vmatmul.mubr.msk.f32.gmra.mxu1 %vm1006_vm3, %v8338_v48  ;;  %v8349_v48 = vld [vmem:[#allocation17_spill] sm:$0xff] }
 0x230   : > { %v1567_v54 = vadd.f32 %v5164_v37, %v8339_v3  ;;  %5465 = vmatprep.mubr.msk.f32.mxu1 %vm1006_vm3, %v8340_v14  ;;  %v7320_v4 = vadd.f32 %v7142_v42, %v1552_v44 }
 0x231   : > { %v1561_v39 = vpop.f32.mrf.mxu1  ;;  %v7322_v51 = vpop.f32.mrf.mxu0 }
 0x232   : > { %v1562_v43 = vadd.f32 %v1561_v39, %v8341_v23  ;;  %v7326_v40 = vadd.f32 %v7146_v55, %v1567_v54  ;;  %v8350_v39 = vld [vmem:[#allocation36_spill] sm:$0xff]  ;;  %v8351_v23 = vld [vmem:[#allocation18_spill] sm:$0xff] }
 0x233   : > { %v5167_v34 = vpop.f32.mrf.mxu1  ;;  %v7328_v28 = vpop.f32.mrf.mxu0  ;;  %5466 = vmatmul.mubr.msk.f32.gmra.mxu1 %vm1006_vm3, %v8342_v27 }
 0x234   : > { %v1577_v31 = vadd.f32 %v5167_v34, %v8343_v60  ;;  %5468 = vmatprep.mubr.msk.f32.mxu1 %vm1006_vm3, %v8344_v18  ;;  %v7336_v42 = vadd.f32 %v7158_v11, %v1562_v43  ;;  %v8352_v34 = vld [vmem:[#allocation37_spill] sm:$0xff] }
 0x235   : > { %v1571_v33 = vpop.f32.mrf.mxu1  ;;  %v7338_v26 = vpop.f32.mrf.mxu0 }
 0x236   : > { %v1572_v55 = vadd.f32 %v1571_v33, %v8345_v21  ;;  %v7342_v45 = vadd.f32 %v7160_v1, %v1577_v31  ;;  %v8353_v31 = vld [vmem:[#allocation19_spill] sm:$0xff] }
 0x237   : > { %v5170_v10 = vpop.f32.mrf.mxu1  ;;  %v7344_v56 = vpop.f32.mrf.mxu0  ;;  %5469 = vmatmul.mubr.msk.f32.gmra.mxu1 %vm1006_vm3, %v8346_v16 }
 0x238   : > { %v1587_v35 = vadd.f32 %v5170_v10, %v8347_v63  ;;  %5471 = vmatprep.mubr.msk.f32.mxu1 %vm1006_vm3, %v8348_v62  ;;  %v7352_v11 = vadd.f32 %v7171_v47, %v1572_v55  ;;  %v8354_v55 = vld [vmem:[#allocation39_spill] sm:$0xff]  ;;  %v8355_v10 = vld [vmem:[#allocation24_spill] sm:$0xff] }
 0x239   : > { %v1581_v44 = vpop.f32.mrf.mxu1  ;;  %v7354_v37 = vpop.f32.mrf.mxu0  ;;  %v8356_v63 = vld [vmem:[#allocation40_spill] sm:$0xff] }
 0x23a   : > { %v1582_v1 = vadd.f32 %v1581_v44, %v8349_v48  ;;  %v7358_v3 = vadd.f32 %v7177_v25, %v1587_v35  ;;  %v8357_v44 = vld [vmem:[#allocation25_spill] sm:$0xff] }
 0x23b   : > { %v5173_v54 = vpop.f32.mrf.mxu1  ;;  %v7360_v14 = vpop.f32.mrf.mxu0  ;;  %5472 = vmatmul.mubr.msk.f32.gmra.mxu1 %vm1006_vm3, %v8350_v39  ;;  %v8358_v39 = vld [vmem:[#allocation42_spill] sm:$0xff] }
 0x23c   : > { %v1597_v43 = vadd.f32 %v5173_v54, %v8351_v23  ;;  %5474 = vmatprep.mubr.msk.f32.mxu1 %vm1006_vm3, %v8352_v34  ;;  %v7368_v47 = vadd.f32 %v7191_v13, %v1582_v1  ;;  %v8359_v23 = vld [vmem:[#allocation26_spill] sm:$0xff]  ;;  %v8360_v34 = vld [vmem:[#allocation8_spill] sm:$0xff] }
 0x23d   : > { %v1591_v27 = vpop.f32.mrf.mxu1  ;;  %v7370_v60 = vpop.f32.mrf.mxu0 }
 0x23e   : > { %v1592_v25 = vadd.f32 %v1591_v27, %v8353_v31  ;;  %v7374_v18 = vadd.f32 %v7197_v50, %v1597_v43 }
 0x23f   : > { %v5176_v33 = vpop.f32.mrf.mxu1  ;;  %v7376_v21 = vpop.f32.mrf.mxu0  ;;  %5475 = vmatmul.mubr.msk.f32.gmra.mxu1 %vm1006_vm3, %v8354_v55 }
 0x240   : > { %v1607_v16 = vadd.f32 %v5176_v33, %v8355_v10  ;;  %5477 = vmatprep.mubr.msk.f32.mxu1 %vm1006_vm3, %v8356_v63  ;;  %v7384_v13 = vadd.f32 %v7211_v41, %v1592_v25  ;;  %v8361_v25 = vld [vmem:[#allocation31_spill] sm:$0xff]  ;;  %v8363_v63 = vld [vmem:[#allocation32_spill] sm:$0xff] }
 0x241   : > { %v1601_v35 = vpop.f32.mrf.mxu1  ;;  %v7386_v62 = vpop.f32.mrf.mxu0 }
 0x242   : > { %v1602_v50 = vadd.f32 %v1601_v35, %v8357_v44  ;;  %v7390_v48 = vadd.f32 %v7220_v58, %v1607_v16  ;;  %v8362_v16 = vld [vmem:[#allocation9_spill] sm:$0xff] }
 0x243   : > { %v5179_v1 = vpop.f32.mrf.mxu1  ;;  %v7392_v54 = vpop.f32.mrf.mxu0  ;;  %5478 = vmatmul.mubr.msk.f32.gmra.mxu1 %vm1006_vm3, %v8358_v39 }
 0x244   : > { %v1617_v43 = vadd.f32 %v5179_v1, %v8359_v23  ;;  %5480 = vmatprep.mubr.msk.f32.mxu1 %vm1006_vm3, %v8360_v34  ;;  %v7400_v41 = vadd.f32 %v7234_v5, %v1602_v50  ;;  %v8364_v1 = vld [vmem:[#allocation33_spill] sm:$0xff]  ;;  %v8365_v34 = vld [vmem:[#allocation38_spill] sm:$0xff] }
 0x245   : > { %v1611_v27 = vpop.f32.mrf.mxu1  ;;  %v7402_v31 = vpop.f32.mrf.mxu0 }
 0x246   : > { %v1612_v58 = vadd.f32 %v1611_v27, %v8361_v25  ;;  %v7406_v33 = vadd.f32 %v7240_v61, %v1617_v43 }
 0x247   : > { %v5182_v55 = vpop.f32.mrf.mxu1  ;;  %v7408_v10 = vpop.f32.mrf.mxu0  ;;  %5481 = vmatmul.mubr.msk.f32.gmra.mxu1 %vm1006_vm3, %v8362_v16 }
 0x248   : > { %v1627_v35 = vadd.f32 %v5182_v55, %v8363_v63  ;;  %5483 = vmatprep.mubr.f32.mxu1 %v8302_v12  ;;  %v7415_v5 = vadd.f32 %v7254_v24, %v1612_v58  ;;  %v8366_v55 = vld [vmem:[#allocation41_spill] sm:$0xff] }
 0x249   : > { %v1621_v44 = vpop.f32.mrf.mxu1  ;;  %v7417_v50 = vpop.f32.mrf.mxu0 }
 0x24a   : > { %v1622_v39 = vadd.f32 %v1621_v44, %v8364_v1  ;;  %v7421_v61 = vadd.f32 %v7260_v6, %v1627_v35 }
 0x24b   : > { %v5185_v23 = vpop.f32.mrf.mxu1  ;;  %v7423_v43 = vpop.f32.mrf.mxu0  ;;  %5484 = vmatmul.mubr.f32.gmra.mxu1 %v8302_v12 }
 0x24c   : > { %v1637_v27 = vadd.f32 %v5185_v23, %v8365_v34  ;;  %v7428_v25 = vadd.f32 %v7273_v57, %v1622_v39 }
 0x24d   : > { %v1631_v24 = vpop.f32.mrf.mxu1  ;;  %v7430_v58 = vpop.f32.mrf.mxu0 }
 0x24e   : > { %v1632_v16 = vadd.f32 %v1631_v24, %v8366_v55  ;;  %v7434_v63 = vadd.f32 %v7279_v15, %v1637_v27 }
 0x24f   : > { %v5240_v6 = vpop.f32.mrf.mxu1  ;;  %v7436_v35 = vpop.f32.mrf.mxu0 }
 0x250   : > { %v2359_v44 = vadd.f32 %v5240_v6, %v7175_v30  ;;  %v7440_v12 = vadd.f32 %v7290_v59, %v1632_v16 }
 0x251   : > { %v2199_v1 = vpop.f32.mrf.mxu1  ;;  %v7442_v23 = vpop.f32.mrf.mxu0 }
 0x252   : > { %v2358_v57 = vadd.f32 %v2199_v1, %v7189_v0  ;;  %v7446_v39 = vadd.f32 %v7296_v36, %v2359_v44 }
 0x253   : > { %v5243_v34 = vpop.f32.mrf.mxu1  ;;  %v7448_v24 = vpop.f32.mrf.mxu0 }
 0x254   : > { %v2361_v15 = vadd.f32 %v5243_v34, %v7195_v52  ;;  %v7452_v27 = vadd.f32 %v7306_v49, %v2358_v57 }
 0x255   : > { %v2209_v30 = vpop.f32.mrf.mxu1  ;;  %v7454_v55 = vpop.f32.mrf.mxu0 }
 0x256   : > { %v2360_v59 = vadd.f32 %v2209_v30, %v7209_v7  ;;  %v7458_v16 = vadd.f32 %v7312_v29, %v2361_v15 }
 0x257   : > { %v5246_v0 = vpop.f32.mrf.mxu1  ;;  %v7460_v6 = vpop.f32.mrf.mxu0 }
 0x258   : > { %v2363_v36 = vadd.f32 %v5246_v0, %v7215_v9  ;;  %v7464_v44 = vadd.f32 %v7322_v51, %v2360_v59 }
 0x259   : > { %v2219_v52 = vpop.f32.mrf.mxu1  ;;  %v7466_v1 = vpop.f32.mrf.mxu0 }
 0x25a   : > { %v2362_v49 = vadd.f32 %v2219_v52, %v7232_v22  ;;  %v7470_v57 = vadd.f32 %v7328_v28, %v2363_v36 }
 0x25b   : > { %v5249_v7 = vpop.f32.mrf.mxu1  ;;  %v7472_v34 = vpop.f32.mrf.mxu0 }
 0x25c   : > { %v2365_v29 = vadd.f32 %v5249_v7, %v7238_v19  ;;  %v7476_v15 = vadd.f32 %v7338_v26, %v2362_v49 }
 0x25d   : > { %v2229_v9 = vpop.f32.mrf.mxu1  ;;  %v7478_v30 = vpop.f32.mrf.mxu0 }
 0x25e   : > { %v2364_v51 = vadd.f32 %v2229_v9, %v7252_v38  ;;  %v7482_v59 = vadd.f32 %v7344_v56, %v2365_v29 }
 0x25f   : > { %v5252_v22 = vpop.f32.mrf.mxu1  ;;  %v7484_v0 = vpop.f32.mrf.mxu0 }
 0x260   : > { %v2367_v28 = vadd.f32 %v5252_v22, %v7258_v20  ;;  %v7488_v36 = vadd.f32 %v7354_v37, %v2364_v51 }
 0x261   : > { %v2239_v19 = vpop.f32.mrf.mxu1  ;;  %v7490_v52 = vpop.f32.mrf.mxu0 }
 0x262   : > { %v2366_v26 = vadd.f32 %v2239_v19, %v7271_v46  ;;  %v7494_v49 = vadd.f32 %v7360_v14, %v2367_v28 }
 0x263   : > { %v5255_v38 = vpop.f32.mrf.mxu1  ;;  %v7496_v7 = vpop.f32.mrf.mxu0 }
 0x264   : > { %v2369_v56 = vadd.f32 %v5255_v38, %v7277_v32  ;;  %v7500_v29 = vadd.f32 %v7370_v60, %v2366_v26 }
 0x265   : > { %v2249_v20 = vpop.f32.mrf.mxu1  ;;  %v7502_v9 = vpop.f32.mrf.mxu0 }
 0x266   : > { %v2368_v37 = vadd.f32 %v2249_v20, %v7288_v2  ;;  %v7506_v51 = vadd.f32 %v7376_v21, %v2369_v56 }
 0x267   : > { %v5258_v46 = vpop.f32.mrf.mxu1  ;;  %v7508_v22 = vpop.f32.mrf.mxu0 }
 0x268   : > { %v2371_v14 = vadd.f32 %v5258_v46, %v7294_v53  ;;  %v7512_v28 = vadd.f32 %v7386_v62, %v2368_v37 }
 0x269   : > { %v2259_v32 = vpop.f32.mrf.mxu1  ;;  %v7514_v19 = vpop.f32.mrf.mxu0 }
 0x26a   : > { %v2370_v60 = vadd.f32 %v2259_v32, %v7304_v8  ;;  %v7518_v26 = vadd.f32 %v7392_v54, %v2371_v14 }
 0x26b   : > { %v5261_v2 = vpop.f32.mrf.mxu1  ;;  %v7520_v38 = vpop.f32.mrf.mxu0 }
 0x26c   : > { %v2373_v21 = vadd.f32 %v5261_v2, %v7310_v17  ;;  %v7524_v56 = vadd.f32 %v7402_v31, %v2370_v60 }
 0x26d   : > { %v2269_v53 = vpop.f32.mrf.mxu1  ;;  %v7526_v20 = vpop.f32.mrf.mxu0 }
 0x26e   : > { %v2372_v62 = vadd.f32 %v2269_v53, %v7320_v4  ;;  %v7530_v37 = vadd.f32 %v7408_v10, %v2373_v21 }
 0x26f   : > { %v5264_v8 = vpop.f32.mrf.mxu1  ;;  %v7532_v46 = vpop.f32.mrf.mxu0 }
 0x270   : > { %v2375_v54 = vadd.f32 %v5264_v8, %v7326_v40  ;;  %v7536_v14 = vadd.f32 %v7417_v50, %v2372_v62 }
 0x271   : > { %v2279_v17 = vpop.f32.mrf.mxu1  ;;  %v7538_v32 = vpop.f32.mrf.mxu0 }
 0x272   : > { %8367 = vst [vmem:[#allocation43_spill] sm:$0xff] %v7536_v14  ;;  %v2374_v31 = vadd.f32 %v2279_v17, %v7336_v42  ;;  %v7542_v60 = vadd.f32 %v7423_v43, %v2375_v54 }
 0x273   : > { %v5267_v4 = vpop.f32.mrf.mxu1  ;;  %v7544_v2 = vpop.f32.mrf.mxu0 }
 0x274   : > { %8368 = vst [vmem:[#allocation44_spill] sm:$0xff] %v7542_v60  ;;  %v2377_v10 = vadd.f32 %v5267_v4, %v7342_v45  ;;  %v7548_v21 = vadd.f32 %v7430_v58, %v2374_v31 }
 0x275   : > { %v2289_v40 = vpop.f32.mrf.mxu1  ;;  %v7550_v53 = vpop.f32.mrf.mxu0 }
 0x276   : > { %8369 = vst [vmem:[#allocation45_spill] sm:$0xff] %v7548_v21  ;;  %v2376_v50 = vadd.f32 %v2289_v40, %v7352_v11  ;;  %v7554_v62 = vadd.f32 %v7436_v35, %v2377_v10 }
 0x277   : > { %v5270_v42 = vpop.f32.mrf.mxu1  ;;  %v7556_v8 = vpop.f32.mrf.mxu0 }
 0x278   : > { %8370 = vst [vmem:[#allocation47_spill] sm:$0xff] %v7554_v62  ;;  %v2379_v43 = vadd.f32 %v5270_v42, %v7358_v3  ;;  %v7560_v54 = vadd.f32 %v7442_v23, %v2376_v50 }
 0x279   : > { %v2299_v45 = vpop.f32.mrf.mxu1  ;;  %v7562_v17 = vpop.f32.mrf.mxu0 }
 0x27a   : > { %8371 = vst [vmem:[#allocation48_spill] sm:$0xff] %v7560_v54  ;;  %v2378_v58 = vadd.f32 %v2299_v45, %v7368_v47  ;;  %v7566_v31 = vadd.f32 %v7448_v24, %v2379_v43 }
 0x27b   : > { %v5273_v11 = vpop.f32.mrf.mxu1  ;;  %v7568_v4 = vpop.f32.mrf.mxu0 }
 0x27c   : > { %8372 = vst [vmem:[#allocation49_spill] sm:$0xff] %v7566_v31  ;;  %v2381_v35 = vadd.f32 %v5273_v11, %v7374_v18  ;;  %v7572_v10 = vadd.f32 %v7454_v55, %v2378_v58 }
 0x27d   : > { %v2309_v3 = vpop.f32.mrf.mxu1  ;;  %v7574_v40 = vpop.f32.mrf.mxu0 }
 0x27e   : > { %8373 = vst [vmem:[#allocation50_spill] sm:$0xff] %v7572_v10  ;;  %v2380_v23 = vadd.f32 %v2309_v3, %v7384_v13  ;;  %v7578_v50 = vadd.f32 %v7460_v6, %v2381_v35 }
 0x27f   : > { %v5276_v47 = vpop.f32.mrf.mxu1  ;;  %v7580_v42 = vpop.f32.mrf.mxu0 }
 0x280   : > { %8374 = vst [vmem:[#allocation51_spill] sm:$0xff] %v7578_v50  ;;  %v2383_v24 = vadd.f32 %v5276_v47, %v7390_v48  ;;  %v7584_v43 = vadd.f32 %v7466_v1, %v2380_v23 }
 0x281   : > { %v2319_v18 = vpop.f32.mrf.mxu1  ;;  %v7586_v45 = vpop.f32.mrf.mxu0 }
 0x282   : > { %8375 = vst [vmem:[#allocation46_spill] sm:$0xff] %v7584_v43  ;;  %v2382_v55 = vadd.f32 %v2319_v18, %v7400_v41  ;;  %v7590_v58 = vadd.f32 %v7472_v34, %v2383_v24 }
 0x283   : > { %v5279_v13 = vpop.f32.mrf.mxu1  ;;  %v7592_v11 = vpop.f32.mrf.mxu0 }
 0x284   : > { %8376 = vst [vmem:[#allocation13_spill] sm:$0xff] %v7590_v58  ;;  %v2385_v6 = vadd.f32 %v5279_v13, %v7406_v33  ;;  %v7596_v35 = vadd.f32 %v7478_v30, %v2382_v55 }
 0x285   : > { %v2329_v48 = vpop.f32.mrf.mxu1  ;;  %v7598_v3 = vpop.f32.mrf.mxu0 }
 0x286   : > { %8377 = vst [vmem:[#allocation15_spill] sm:$0xff] %v7596_v35  ;;  %8378 = vst [vmem:[#allocation16_spill] sm:$0xff] %v7598_v3  ;;  %v2384_v1 = vadd.f32 %v2329_v48, %v7415_v5  ;;  %v7602_v23 = vadd.f32 %v7484_v0, %v2385_v6 }
 0x287   : > { %v5282_v41 = vpop.f32.mrf.mxu1  ;;  %v7604_v47 = vpop.f32.mrf.mxu0 }
 0x288   : > { %8379 = vst [vmem:[#allocation20_spill] sm:$0xff] %v7602_v23  ;;  %8380 = vst [vmem:[#allocation21_spill] sm:$0xff] %v7604_v47  ;;  %v2387_v34 = vadd.f32 %v5282_v41, %v7421_v61  ;;  %v7608_v24 = vadd.f32 %v7490_v52, %v2384_v1 }
 0x289   : > { %v2339_v33 = vpop.f32.mrf.mxu1  ;;  %v7610_v18 = vpop.f32.mrf.mxu0 }
 0x28a   : > { %8381 = vst [vmem:[#allocation23_spill] sm:$0xff] %v7608_v24  ;;  %8382 = vst [vmem:[#allocation27_spill] sm:$0xff] %v7610_v18  ;;  %v2386_v30 = vadd.f32 %v2339_v33, %v7428_v25  ;;  %v7614_v55 = vadd.f32 %v7496_v7, %v2387_v34 }
 0x28b   : > { %v5285_v5 = vpop.f32.mrf.mxu1  ;;  %v7616_v13 = vpop.f32.mrf.mxu0 }
 0x28c   : > { %8383 = vst [vmem:[#allocation10_spill] sm:$0xff] %v7614_v55  ;;  %8384 = vst [vmem:[#allocation28_spill] sm:$0xff] %v7616_v13  ;;  %v2389_v0 = vadd.f32 %v5285_v5, %v7434_v63  ;;  %v7620_v6 = vadd.f32 %v7502_v9, %v2386_v30 }
 0x28d   : > { %v2349_v61 = vpop.f32.mrf.mxu1  ;;  %v7622_v48 = vpop.f32.mrf.mxu0 }
 0x28e   : > { %8385 = vst [vmem:[#allocation12_spill] sm:$0xff] %v7620_v6  ;;  %8386 = vst [vmem:[#allocation29_spill] sm:$0xff] %v7622_v48  ;;  %v2388_v52 = vadd.f32 %v2349_v61, %v7440_v12  ;;  %v7626_v1 = vadd.f32 %v7508_v22, %v2389_v0 }
 0x28f   : > { %v5340_v25 = vpop.f32.mrf.mxu1  ;;  %v7628_v41 = vpop.f32.mrf.mxu0 }
 0x290   : > { %8387 = vst [vmem:[#allocation22_spill] sm:$0xff] %v7626_v1  ;;  %8388 = vst [vmem:[#allocation30_spill] sm:$0xff] %v7628_v41  ;;  %v7631_v7 = vadd.f32 %v7514_v19, %v2388_v52 }
 0x291   : > { %v2746_v34 = vpop.f32.mrf.mxu1  ;;  %v7633_v33 = vpop.f32.mrf.mxu0 }
 0x292   : > { %8389 = vst [vmem:[#allocation11_spill] sm:$0xff] %v7631_v7  ;;  %8390 = vst [vmem:[#allocation34_spill] sm:$0xff] %v7633_v33 }
 0x293   : > { %v5343_v63 = vpop.f32.mrf.mxu1  ;;  %v7635_v9 = vpop.f32.mrf.mxu0 }
 0x294   : > { %8391 = vst [vmem:[#allocation14_spill] sm:$0xff] %v7635_v9 }
 0x295   : > { %v2756_v30 = vpop.f32.mrf.mxu1  ;;  %v7637_v5 = vpop.f32.mrf.mxu0 }
 0x296   : > { %8392 = vst [vmem:[#allocation35_spill] sm:$0xff] %v7637_v5 }
 0x297   : > { %v5346_v6 = vpop.f32.mrf.mxu1  ;;  %v7639_v12 = vpop.f32.mrf.mxu0 }
 0x298   : > { %8393 = vst [vmem:[#allocation17_spill] sm:$0xff] %v7639_v12 }
 0x299   : > { %v7641_v22 = vpop.f32.mrf.mxu1  ;;  %v7643_v0 = vpop.f32.mrf.mxu0 }
 0x29a   : > { %8394 = vst [vmem:[#allocation36_spill] sm:$0xff] %v7643_v0 }
 0x29b   : > { %v7645_v61 = vpop.f32.mrf.mxu1  ;;  %v7647_v19 = vpop.f32.mrf.mxu0 }
 0x29c   : > { %8395 = vst [vmem:[#allocation18_spill] sm:$0xff] %v7647_v19 }
 0x29d   : > { %v7649_v52 = vpop.f32.mrf.mxu1  ;;  %v7651_v7 = vpop.f32.mrf.mxu0 }
 0x29e   : > { %8396 = vst [vmem:[#allocation37_spill] sm:$0xff] %v7651_v7 }
 0x29f   : > { %v7653_v1 = vpop.f32.mrf.mxu1  ;;  %v7655_v55 = vpop.f32.mrf.mxu0 }
 0x2a0   : > { %8397 = vst [vmem:[#allocation19_spill] sm:$0xff] %v7655_v55 }
 0x2a1   : > { %v7657_v24 = vpop.f32.mrf.mxu1  ;;  %v7659_v23 = vpop.f32.mrf.mxu0 }
 0x2a2   : > { %8398 = vst [vmem:[#allocation39_spill] sm:$0xff] %v7659_v23 }
 0x2a3   : > { %v7661_v35 = vpop.f32.mrf.mxu1  ;;  %v7663_v12 = vpop.f32.mrf.mxu0 }
 0x2a4   : > { %8399 = vst [vmem:[#allocation24_spill] sm:$0xff] %v7663_v12 }
 0x2a5   : > { %v7665_v0 = vpop.f32.mrf.mxu1  ;;  %v7667_v58 = vpop.f32.mrf.mxu0 }
 0x2a6   : > { %8400 = vst [vmem:[#allocation40_spill] sm:$0xff] %v7667_v58 }
 0x2a7   : > { %v7669_v19 = vpop.f32.mrf.mxu1  ;;  %v7671_v43 = vpop.f32.mrf.mxu0 }
 0x2a8   : > { %8401 = vst [vmem:[#allocation25_spill] sm:$0xff] %v7671_v43 }
 0x2a9   : > { %v7673_v7 = vpop.f32.mrf.mxu1  ;;  %v7675_v5 = vpop.f32.mrf.mxu0 }
 0x2aa   : > { %8402 = vst [vmem:[#allocation42_spill] sm:$0xff] %v7675_v5 }
 0x2ab   : > { %v7677_v55 = vpop.f32.mrf.mxu1  ;;  %v5490_v50 = vpop.f32.mrf.mxu0 }
 0x2ad   : > { %v7679_v23 = vpop.f32.mrf.mxu1  ;;  %v3523_v9 = vpop.f32.mrf.mxu0 }
 0x2ae   : > { %8403 = vst [vmem:[#allocation26_spill] sm:$0xff] %v7679_v23 }
 0x2af   : > { %v7681_v33 = vpop.f32.mrf.mxu1  ;;  %v5493_v12 = vpop.f32.mrf.mxu0 }
 0x2b0   : > { %8404 = vst [vmem:[#allocation8_spill] sm:$0xff] %v7681_v33 }
 0x2b1   : > { %v7683_v10 = vpop.f32.mrf.mxu1  ;;  %v3533_v58 = vpop.f32.mrf.mxu0 }
 0x2b2   : > { %8405 = vst [vmem:[#allocation31_spill] sm:$0xff] %v7683_v10 }
 0x2b3   : > { %v7685_v41 = vpop.f32.mrf.mxu1  ;;  %v7687_v31 = vpop.f32.mrf.mxu0 }
 0x2b4   : > { %8406 = vst [vmem:[#allocation9_spill] sm:$0xff] %v7685_v41 }
 0x2b5   : > { %v7689_v43 = vpop.f32.mrf.mxu1  ;;  %v7691_v54 = vpop.f32.mrf.mxu0 }
 0x2b6   : > { %8407 = vst [vmem:[#allocation32_spill] sm:$0xff] %v7689_v43 }
 0x2b7   : > { %v7693_v5 = vpop.f32.mrf.mxu1  ;;  %v7695_v48 = vpop.f32.mrf.mxu0 }
 0x2b8   : > { %8408 = vst [vmem:[#allocation33_spill] sm:$0xff] %v7693_v5 }
 0x2b9   : > { %v7697_v62 = vpop.f32.mrf.mxu1  ;;  %v7699_v13 = vpop.f32.mrf.mxu0 }
 0x2ba   : > { %8409 = vst [vmem:[#allocation38_spill] sm:$0xff] %v7697_v62 }
 0x2bb   : > { %v7701_v18 = vpop.f32.mrf.mxu1  ;;  %v7703_v10 = vpop.f32.mrf.mxu0 }
 0x2bc   : > { %8410 = vst [vmem:[#allocation41_spill] sm:$0xff] %v7701_v18 }
 0x2bd   : > { %v7705_v21 = vpop.f32.mrf.mxu1  ;;  %v7707_v41 = vpop.f32.mrf.mxu0 }
 0x2be   : > { %8411 = vst [vmem:[#allocation52_spill] sm:$0xff] %v7705_v21 }
 0x2bf   : > { %v7709_v47 = vpop.f32.mrf.mxu1  ;;  %v7711_v43 = vpop.f32.mrf.mxu0 }
 0x2c0   : > { %8412 = vst [vmem:[#allocation53_spill] sm:$0xff] %v7709_v47  ;;  %8413 = vst [vmem:[#allocation54_spill] sm:$0xff] %v7711_v43  ;;  %v2906_v47 = vadd.f32 %v5340_v25, %v7446_v39  ;;  %v2910_v39 = vadd.f32 %v5346_v6, %v7470_v57 }
 0x2c1   : > { %v7713_v33 = vpop.f32.mrf.mxu1  ;;  %v7715_v5 = vpop.f32.mrf.mxu0 }
 0x2c2   : > { %8414 = vst [vmem:[#allocation55_spill] sm:$0xff] %v7713_v33  ;;  %8415 = vst [vmem:[#allocation56_spill] sm:$0xff] %v7715_v5  ;;  %v2905_v33 = vadd.f32 %v2746_v34, %v7452_v27  ;;  %v7747_v34 = vld [vmem:[%s8124_s4] ss:$0 sm:$0xff]  ;;  %v3169_v6 = vadd.f32 %v7544_v2, %v2910_v39 }
 0x2c3   : > { %v7717_v60 = vpop.f32.mrf.mxu1  ;;  %v7719_v62 = vpop.f32.mrf.mxu0 }
 0x2c4   : > { %8416 = vst [vmem:[#allocation57_spill] sm:$0xff] %v7717_v60  ;;  %8417 = vst [vmem:[#allocation58_spill] sm:$0xff] %v7719_v62  ;;  %v2908_v60 = vadd.f32 %v5343_v63, %v7458_v16 }
 0x2c5   : > { %v7721_v23 = vpop.f32.mrf.mxu1  ;;  %v7725_v14 = vpop.f32.mrf.mxu0 }
 0x2c6   : > { %8418 = vst [vmem:[#allocation59_spill] sm:$0xff] %v7721_v23  ;;  %8420 = vst [vmem:[#allocation61_spill] sm:$0xff] %v7725_v14  ;;  %v3165_v23 = vadd.f32 %v7520_v38, %v2906_v47  ;;  %v3167_v38 = vadd.f32 %v7532_v46, %v2908_v60 }
 0x2c7   : > { %v7723_v18 = vpop.f32.mrf.mxu1  ;;  %v7733_v43 = vpop.f32.mrf.mxu0 }
 0x2c8   : > { %8419 = vst [vmem:[#allocation60_spill] sm:$0xff] %v7723_v18  ;;  %v2907_v18 = vadd.f32 %v2756_v30, %v7464_v44  ;;  %v2909_v44 = vadd.f32 %v7641_v22, %v7476_v15  ;;  %v2914_v30 = vadd.f32 %v7653_v1, %v7494_v49 }
 0x2c9   : > { %v7727_v21 = vpop.f32.mrf.mxu1  ;;  %v7742_v25 = vpop.f32.mrf.mxu0 }
 0x2ca   : > { %8421 = vst [vmem:[#allocation62_spill] sm:$0xff] %v7727_v21  ;;  %v3164_v21 = vadd.f32 %v7526_v20, %v2905_v33  ;;  %v3166_v57 = vadd.f32 %v7538_v32, %v2907_v18  ;;  %v3168_v33 = vadd.f32 %v7550_v53, %v2909_v44  ;;  %v2911_v32 = vadd.f32 %v7649_v52, %v7488_v36 }
 0x2cb   : > { %v7730_v3 = vpop.f32.mrf.mxu1  ;;  %v7753_v47 = vpop.f32.mrf.mxu0 }
 0x2cc   : > { %8422 = vst [vmem:[#allocation63_spill] sm:$0xff] %v7730_v3 }
 0x2cd   : > { %v7735_v5 = vpop.f32.mrf.mxu1  ;;  %v7765_v2 = vpop.f32.mrf.mxu0 }
 0x2cf   : > { %v5440_v62 = vpop.f32.mrf.mxu1 }
 0x2d0   : > { %v3424_v14 = vadd.f32 %v5440_v62, %v3165_v23 }
 0x2d1   : > { %v3264_v3 = vpop.f32.mrf.mxu1 }
 0x2d2   : > { %v3683_v27 = vadd.f32 %v5490_v50, %v3424_v14  ;;  %v3423_v16 = vadd.f32 %v3264_v3, %v3164_v21  ;;  %v2912_v21 = vadd.f32 %v7645_v61, %v7482_v59 }
 0x2d3   : > { %v5443_v62 = vpop.f32.mrf.mxu1 }
 0x2d4   : > { %v3682_v23 = vadd.f32 %v3523_v9, %v3423_v16  ;;  %v3426_v20 = vadd.f32 %v5443_v62, %v3167_v38  ;;  %v3722_v14 = vadd.f32 %v7747_v34, %v3683_v27  ;;  %v3171_v36 = vadd.f32 %v7556_v8, %v2912_v21  ;;  %v7777_v38 = vpop.f32.mrf.mxu0 }
 0x2d5   : > { %v3274_v50 = vpop.f32.mrf.mxu1  ;;  %v3170_v16 = vadd.f32 %v7562_v17, %v2911_v32  ;;  %v3173_v8 = vadd.f32 %v7568_v4, %v2914_v30 }
 0x2d6   : > { %v3721_v46 = vadd.f32 %v7747_v34, %v3682_v23  ;;  %v3685_v60 = vadd.f32 %v5493_v12, %v3426_v20  ;;  %v3425_v3 = vadd.f32 %v3274_v50, %v3166_v57  ;;  %v3754_v22 = vmax.f32 %v3722_v14, 0.0 }
 0x2d7   : > { %v5446_v15 = vpop.f32.mrf.mxu1  ;;  %v2915_v57 = vadd.f32 %v7665_v0, %v7512_v28 }
 0x2d8   : > { %v3753_v18 = vmax.f32 %v3721_v46, 0.0  ;;  %v3684_v63 = vadd.f32 %v3533_v58, %v3425_v3  ;;  %v3428_v9 = vadd.f32 %v5446_v15, %v3169_v6  ;;  %v3724_v59 = vadd.f32 %v7747_v34, %v3685_v60 }
 0x2d9   : > { %v3284_v61 = vpop.f32.mrf.mxu1  ;;  %v2913_v58 = vadd.f32 %v7657_v24, %v7500_v29  ;;  %v2916_v29 = vadd.f32 %v7661_v35, %v7506_v51  ;;  %v2918_v51 = vadd.f32 %v7669_v19, %v7518_v26  ;;  %v7793_v35 = vpop.f32.mrf.mxu0  ;;  %v3174_v15 = vadd.f32 %v7586_v45, %v2915_v57  ;;  %v8424_v45 = vld [vmem:[#allocation16_spill] sm:$0xff]  ;;  %v8434_v57 = vld [vmem:[#allocation61_spill] sm:$0xff] }
 0x2da   : > { %v3723_v12 = vadd.f32 %v7747_v34, %v3684_v63  ;;  %v3687_v39 = vadd.f32 %v7687_v31, %v3428_v9  ;;  %v3427_v53 = vadd.f32 %v3284_v61, %v3168_v33  ;;  %5538 = vmatprep.mubr.msk.f32.mxu1 %vm1006_vm3, %v3753_v18  ;;  %v3756_v31 = vmax.f32 %v3724_v59, 0.0  ;;  %v8423_v63 = vld [vmem:[#allocation54_spill] sm:$0xff]  ;;  %v8425_v59 = vld [vmem:[#allocation43_spill] sm:$0xff] }
 0x2db   : > { %v5449_v52 = vpop.f32.mrf.mxu1  ;;  %5539 = vmatmul.mubr.msk.f32.vlgmr.msra.gmra.mxu1 %vm1006_vm3, %v3754_v22  ;;  %v3172_v17 = vadd.f32 %v7574_v40, %v2913_v58  ;;  %v3175_v28 = vadd.f32 %v7580_v42, %v2916_v29  ;;  %v7805_v33 = vpop.f32.mrf.mxu0  ;;  %v3177_v42 = vadd.f32 %v7592_v11, %v2918_v51  ;;  %v8426_v61 = vld [vmem:[#allocation26_spill] sm:$0xff]  ;;  %v8427_v11 = vld [vmem:[#allocation56_spill] sm:$0xff] }
 0x2dc   : > { %v3755_v49 = vmax.f32 %v3723_v12, 0.0  ;;  %v3686_v1 = vadd.f32 %v7691_v54, %v3427_v53  ;;  %v3430_v27 = vadd.f32 %v5449_v52, %v3171_v36  ;;  %v3726_v44 = vadd.f32 %v7747_v34, %v3687_v39 }
 0x2dd   : > { %v3294_v62 = vpop.f32.mrf.mxu1  ;;  %v2919_v12 = vadd.f32 %v8426_v61, %v8425_v59  ;;  %v7821_v52 = vpop.f32.mrf.mxu0 }
 0x2de   : > { %v3725_v24 = vadd.f32 %v7747_v34, %v3686_v1  ;;  %v3689_v23 = vadd.f32 %v7695_v48, %v3430_v27  ;;  %v3429_v20 = vadd.f32 %v3294_v62, %v3170_v16  ;;  %5541 = vmatprep.mubr.msk.f32.mxu1 %vm1006_vm3, %v3755_v49  ;;  %v3758_v48 = vmax.f32 %v3726_v44, 0.0 }
 0x2df   : > { %v5452_v54 = vpop.f32.mrf.mxu1  ;;  %5542 = vmatmul.mubr.msk.f32.gmra.mxu1 %vm1006_vm3, %v3756_v31  ;;  %v8430_v31 = vld [vmem:[#allocation58_spill] sm:$0xff] }
 0x2e0   : > { %v3757_v14 = vmax.f32 %v3725_v24, 0.0  ;;  %v3688_v4 = vadd.f32 %v7699_v13, %v3429_v20  ;;  %v3432_v50 = vadd.f32 %v5452_v54, %v3173_v8  ;;  %v3728_v6 = vadd.f32 %v7747_v34, %v3689_v23  ;;  %v8431_v8 = vld [vmem:[#allocation21_spill] sm:$0xff]  ;;  %v8433_v23 = vld [vmem:[#allocation31_spill] sm:$0xff] }
 0x2e1   : > { %v3304_v21 = vpop.f32.mrf.mxu1  ;;  %v2917_v13 = vadd.f32 %v7673_v7, %v7524_v56  ;;  %v2920_v56 = vadd.f32 %v7677_v55, %v7530_v37  ;;  %v8428_v37 = vld [vmem:[#allocation44_spill] sm:$0xff]  ;;  %v8432_v24 = vld [vmem:[#allocation45_spill] sm:$0xff] }
 0x2e2   : > { %v3727_v46 = vadd.f32 %v7747_v34, %v3688_v4  ;;  %v3691_v40 = vadd.f32 %v7703_v10, %v3432_v50  ;;  %v3431_v60 = vadd.f32 %v3304_v21, %v3172_v17  ;;  %5544 = vmatprep.mubr.msk.f32.mxu1 %vm1006_vm3, %v3757_v14  ;;  %v3760_v10 = vmax.f32 %v3728_v6, 0.0  ;;  %v8429_v55 = vld [vmem:[#allocation8_spill] sm:$0xff]  ;;  %v8435_v50 = vld [vmem:[#allocation27_spill] sm:$0xff] }
 0x2e3   : > { %v5455_v0 = vpop.f32.mrf.mxu1  ;;  %5545 = vmatmul.mubr.msk.f32.gmra.mxu1 %vm1006_vm3, %v3758_v48  ;;  %v3176_v22 = vadd.f32 %v8424_v45, %v2917_v13  ;;  %v2922_v58 = vadd.f32 %v8429_v55, %v8428_v37  ;;  %v3179_v29 = vadd.f32 %v8431_v8, %v2920_v56  ;;  %v2921_v20 = vadd.f32 %v8433_v23, %v8432_v24  ;;  %v7833_v48 = vpop.f32.mrf.mxu0  ;;  %v8438_v13 = vld [vmem:[#allocation9_spill] sm:$0xff]  ;;  %v8446_v37 = vld [vmem:[#allocation38_spill] sm:$0xff]  ;;  %v8449_v23 = vld [vmem:[#allocation51_spill] sm:$0xff] }
 0x2e4   : > { %v3759_v26 = vmax.f32 %v3727_v46, 0.0  ;;  %v3690_v19 = vadd.f32 %v7707_v41, %v3431_v60  ;;  %v3434_v3 = vadd.f32 %v5455_v0, %v3175_v28  ;;  %v3730_v32 = vadd.f32 %v7747_v34, %v3691_v40  ;;  %v8436_v40 = vld [vmem:[#allocation28_spill] sm:$0xff]  ;;  %v8437_v28 = vld [vmem:[#allocation47_spill] sm:$0xff] }
 0x2e5   : > { %v3314_v18 = vpop.f32.mrf.mxu1  ;;  %v3178_v51 = vadd.f32 %v8435_v50, %v2919_v12  ;;  %v3181_v60 = vadd.f32 %v8436_v40, %v2922_v58  ;;  %v2924_v0 = vadd.f32 %v8438_v13, %v8437_v28  ;;  %v8454_v28 = vld [vmem:[#allocation13_spill] sm:$0xff] }
 0x2e6   : > { %v3729_v7 = vadd.f32 %v7747_v34, %v3690_v19  ;;  %v3693_v9 = vadd.f32 %v8423_v63, %v3434_v3  ;;  %v3433_v30 = vadd.f32 %v3314_v18, %v3174_v15  ;;  %5547 = vmatprep.mubr.msk.f32.mxu1 %vm1006_vm3, %v3759_v26  ;;  %v3762_v49 = vmax.f32 %v3730_v32, 0.0  ;;  %v8440_v18 = vld [vmem:[#allocation48_spill] sm:$0xff]  ;;  %v8455_v13 = vld [vmem:[#allocation53_spill] sm:$0xff] }
 0x2e7   : > { %v5458_v41 = vpop.f32.mrf.mxu1  ;;  %5548 = vmatmul.mubr.msk.f32.gmra.mxu1 %vm1006_vm3, %v3760_v10  ;;  %v8439_v10 = vld [vmem:[#allocation29_spill] sm:$0xff] }
 0x2e8   : > { %v3761_v39 = vmax.f32 %v3729_v7, 0.0  ;;  %v3692_v53 = vadd.f32 %v8427_v11, %v3433_v30  ;;  %v3436_v36 = vadd.f32 %v5458_v41, %v3177_v42  ;;  %v3732_v1 = vadd.f32 %v7747_v34, %v3693_v9  ;;  %v8441_v42 = vld [vmem:[#allocation32_spill] sm:$0xff]  ;;  %v8442_v30 = vld [vmem:[#allocation49_spill] sm:$0xff] }
 0x2e9   : > { %v3324_v27 = vpop.f32.mrf.mxu1  ;;  %v3180_v32 = vadd.f32 %v8439_v10, %v2921_v20  ;;  %v2923_v56 = vadd.f32 %v8441_v42, %v8440_v18  ;;  %v8443_v41 = vld [vmem:[#allocation33_spill] sm:$0xff] }
 0x2ea   : > { %v3731_v16 = vadd.f32 %v7747_v34, %v3692_v53  ;;  %v3695_v44 = vadd.f32 %v8430_v31, %v3436_v36  ;;  %v3435_v62 = vadd.f32 %v3324_v27, %v3176_v22  ;;  %5550 = vmatprep.mubr.msk.f32.mxu1 %vm1006_vm3, %v3761_v39  ;;  %v3764_v6 = vmax.f32 %v3732_v1, 0.0  ;;  %v7849_v22 = vpop.f32.mrf.mxu0  ;;  %v8444_v53 = vld [vmem:[#allocation30_spill] sm:$0xff]  ;;  %v8450_v20 = vld [vmem:[#allocation41_spill] sm:$0xff] }
 0x2eb   : > { %v5461_v54 = vpop.f32.mrf.mxu1  ;;  %5551 = vmatmul.mubr.msk.f32.gmra.mxu1 %vm1006_vm3, %v3762_v49  ;;  %v2926_v45 = vadd.f32 %v8443_v41, %v8442_v30  ;;  %v3183_v36 = vadd.f32 %v8444_v53, %v2924_v0  ;;  %v2930_v0 = vadd.f32 %v8455_v13, %v8454_v28  ;;  %v8456_v18 = vld [vmem:[#allocation17_spill] sm:$0xff]  ;;  %v8461_v53 = vld [vmem:[#allocation20_spill] sm:$0xff]  ;;  %v8471_v28 = vld [vmem:[#allocation39_spill] sm:$0xff] }
 0x2ec   : > { %v3763_v17 = vmax.f32 %v3731_v16, 0.0  ;;  %v3694_v14 = vadd.f32 %v8434_v57, %v3435_v62  ;;  %v3438_v4 = vadd.f32 %v5461_v54, %v3179_v29  ;;  %v3734_v21 = vadd.f32 %v7747_v34, %v3695_v44  ;;  %v8447_v16 = vld [vmem:[#allocation34_spill] sm:$0xff]  ;;  %v5526_v44 = vpop.f32.mrf.mxu0 }
 0x2ed   : > { %v3334_v46 = vpop.f32.mrf.mxu1  ;;  %v3182_v31 = vadd.f32 %v8447_v16, %v2923_v56  ;;  %v8448_v29 = vld [vmem:[#allocation14_spill] sm:$0xff]  ;;  %v2928_v54 = vadd.f32 %v8450_v20, %v8449_v23  ;;  %v8457_v56 = vld [vmem:[#allocation15_spill] sm:$0xff] }
 0x2ee   : > { %v3733_v26 = vadd.f32 %v7747_v34, %v3694_v14  ;;  %v3697_v19 = vadd.f32 %v7733_v43, %v3438_v4  ;;  %v3437_v3 = vadd.f32 %v3334_v46, %v3178_v51  ;;  %5553 = vmatprep.mubr.msk.f32.mxu1 %vm1006_vm3, %v3763_v17  ;;  %v3766_v43 = vmax.f32 %v3734_v21, 0.0  ;;  %v8451_v4 = vld [vmem:[#allocation35_spill] sm:$0xff]  ;;  %v8452_v51 = vld [vmem:[#allocation46_spill] sm:$0xff] }
 0x2ef   : > { %v5464_v15 = vpop.f32.mrf.mxu1  ;;  %5554 = vmatmul.mubr.msk.f32.gmra.mxu1 %vm1006_vm3, %v3764_v6  ;;  %v3185_v24 = vadd.f32 %v8448_v29, %v2926_v45  ;;  %v8453_v6 = vld [vmem:[#allocation52_spill] sm:$0xff]  ;;  %v3187_v42 = vadd.f32 %v8456_v18, %v2928_v54  ;;  %v8465_v16 = vld [vmem:[#allocation59_spill] sm:$0xff]  ;;  %v8466_v29 = vld [vmem:[#allocation10_spill] sm:$0xff] }
 0x2f0   : > { %v3765_v7 = vmax.f32 %v3733_v26, 0.0  ;;  %v3696_v63 = vadd.f32 %v7742_v25, %v3437_v3  ;;  %v3440_v9 = vadd.f32 %v5464_v15, %v3181_v60  ;;  %v3736_v59 = vadd.f32 %v7747_v34, %v3697_v19  ;;  %v8445_v25 = vld [vmem:[#allocation50_spill] sm:$0xff]  ;;  %v3643_v26 = vpop.f32.mrf.mxu0  ;;  %v8459_v45 = vld [vmem:[#allocation36_spill] sm:$0xff] }
 0x2f1   : > { %v3344_v61 = vpop.f32.mrf.mxu1  ;;  %v2925_v55 = vadd.f32 %v8446_v37, %v8445_v25  ;;  %v2927_v21 = vadd.f32 %v8453_v6, %v8452_v51  ;;  %v8469_v51 = vld [vmem:[#allocation12_spill] sm:$0xff]  ;;  %v8470_v6 = vld [vmem:[#allocation62_spill] sm:$0xff] }
 0x2f2   : > { %v3735_v12 = vadd.f32 %v7747_v34, %v3696_v63  ;;  %v3699_v39 = vadd.f32 %v7753_v47, %v3440_v9  ;;  %v3439_v11 = vadd.f32 %v3344_v61, %v3180_v32  ;;  %5556 = vmatprep.mubr.msk.f32.mxu1 %vm1006_vm3, %v3765_v7  ;;  %v3768_v62 = vmax.f32 %v3736_v59, 0.0  ;;  %v5529_v59 = vpop.f32.mrf.mxu0 }
 0x2f3   : > { %v5467_v58 = vpop.f32.mrf.mxu1  ;;  %5557 = vmatmul.mubr.msk.f32.gmra.mxu1 %vm1006_vm3, %v3766_v43  ;;  %v3184_v50 = vadd.f32 %v8451_v4, %v2925_v55  ;;  %v3186_v43 = vadd.f32 %v8459_v45, %v2927_v21  ;;  %v8468_v4 = vld [vmem:[#allocation19_spill] sm:$0xff] }
 0x2f4   : > { %v3767_v49 = vmax.f32 %v3735_v12, 0.0  ;;  %v3698_v1 = vadd.f32 %v7765_v2, %v3439_v11  ;;  %v3442_v27 = vadd.f32 %v5467_v58, %v3183_v36  ;;  %v3738_v47 = vadd.f32 %v7747_v34, %v3699_v39  ;;  %v8460_v39 = vld [vmem:[#allocation18_spill] sm:$0xff]  ;;  %v8462_v36 = vld [vmem:[#allocation57_spill] sm:$0xff]  ;;  %v3653_v20 = vpop.f32.mrf.mxu0 }
 0x2f5   : > { %v3354_v8 = vpop.f32.mrf.mxu1  ;;  %v3189_v11 = vadd.f32 %v8460_v39, %v2930_v0  ;;  %v2932_v25 = vadd.f32 %v8462_v36, %v8461_v53  ;;  %v8477_v36 = vld [vmem:[#allocation25_spill] sm:$0xff] }
 0x2f6   : > { %v3737_v17 = vadd.f32 %v7747_v34, %v3698_v1  ;;  %v3701_v57 = vadd.f32 %v7777_v38, %v3442_v27  ;;  %v3441_v14 = vadd.f32 %v3354_v8, %v3182_v31  ;;  %5559 = vmatprep.mubr.msk.f32.mxu1 %vm1006_vm3, %v3767_v49  ;;  %v3770_v38 = vmax.f32 %v3738_v47, 0.0  ;;  %v8463_v49 = vld [vmem:[#allocation37_spill] sm:$0xff]  ;;  %v8464_v27 = vld [vmem:[#allocation23_spill] sm:$0xff]  ;;  %v5532_v0 = vpop.f32.mrf.mxu0 }
 0x2f7   : > { %v5470_v2 = vpop.f32.mrf.mxu1  ;;  %5560 = vmatmul.mubr.msk.f32.gmra.mxu1 %vm1006_vm3, %v3768_v62  ;;  %v2931_v31 = vadd.f32 %v8465_v16, %v8464_v27 }
 0x2f8   : > { %v3769_v46 = vmax.f32 %v3737_v17, 0.0  ;;  %v3700_v40 = vadd.f32 %v7793_v35, %v3441_v14  ;;  %v3444_v60 = vadd.f32 %v5470_v2, %v3185_v24  ;;  %v3740_v19 = vadd.f32 %v7747_v34, %v3701_v57  ;;  %v8458_v35 = vld [vmem:[#allocation55_spill] sm:$0xff]  ;;  %v8467_v24 = vld [vmem:[#allocation60_spill] sm:$0xff] }
 0x2f9   : > { %v3364_v3 = vpop.f32.mrf.mxu1  ;;  %v2929_v7 = vadd.f32 %v8458_v35, %v8457_v56  ;;  %v2934_v23 = vadd.f32 %v8467_v24, %v8466_v29  ;;  %v3190_v13 = vadd.f32 %v8471_v28, %v2931_v31 }
 0x2fa   : > { %v3739_v15 = vadd.f32 %v7747_v34, %v3700_v40  ;;  %v3703_v10 = vadd.f32 %v7805_v33, %v3444_v60  ;;  %v3443_v32 = vadd.f32 %v3364_v3, %v3184_v50  ;;  %5562 = vmatprep.mubr.msk.f32.mxu1 %vm1006_vm3, %v3769_v46  ;;  %v3772_v61 = vmax.f32 %v3740_v19, 0.0  ;;  %v8472_v3 = vld [vmem:[#allocation24_spill] sm:$0xff] }
 0x2fb   : > { %v5473_v63 = vpop.f32.mrf.mxu1  ;;  %5563 = vmatmul.mubr.msk.f32.gmra.mxu1 %vm1006_vm3, %v3770_v38  ;;  %v3188_v1 = vadd.f32 %v8463_v49, %v2929_v7  ;;  %v3191_v50 = vadd.f32 %v8468_v4, %v2932_v25  ;;  %v8475_v7 = vld [vmem:[#allocation40_spill] sm:$0xff]  ;;  %v8478_v49 = vld [vmem:[#allocation42_spill] sm:$0xff] }
 0x2fc   : > { %v3771_v9 = vmax.f32 %v3739_v15, 0.0  ;;  %v3702_v30 = vadd.f32 %v7821_v52, %v3443_v32  ;;  %v3446_v41 = vadd.f32 %v5473_v63, %v3187_v42  ;;  %v3742_v33 = vadd.f32 %v7747_v34, %v3703_v10  ;;  %v8473_v10 = vld [vmem:[#allocation22_spill] sm:$0xff]  ;;  %v8474_v32 = vld [vmem:[#allocation63_spill] sm:$0xff] }
 0x2fd   : > { %v3374_v12 = vpop.f32.mrf.mxu1  ;;  %v3193_v15 = vadd.f32 %v8472_v3, %v2934_v23  ;;  %v2936_v18 = vadd.f32 %v8474_v32, %v8473_v10 }
 0x2fe   : > { %v3741_v37 = vadd.f32 %v7747_v34, %v3702_v30  ;;  %v3705_v55 = vadd.f32 %v7833_v48, %v3446_v41  ;;  %v3445_v58 = vadd.f32 %v3374_v12, %v3186_v43  ;;  %5565 = vmatprep.mubr.msk.f32.mxu1 %vm1006_vm3, %v3771_v9  ;;  %v3774_v48 = vmax.f32 %v3742_v33, 0.0  ;;  %v8476_v9 = vld [vmem:[#allocation11_spill] sm:$0xff] }
 0x2ff   : > { %v5476_v52 = vpop.f32.mrf.mxu1  ;;  %5566 = vmatmul.mubr.msk.f32.gmra.mxu1 %vm1006_vm3, %v3772_v61  ;;  %v2935_v30 = vadd.f32 %v7735_v5, %v8476_v9  ;;  %v3663_v61 = vpop.f32.mrf.mxu0  ;;  %v3195_v25 = vadd.f32 %v8477_v36, %v2936_v18  ;;  %v5644_v9 = vld [vmem:[%s5915_s15 + $0x20] sm:$0xff] }
 0x300   : > { %v3773_v62 = vmax.f32 %v3741_v37, 0.0  ;;  %v3704_v47 = vadd.f32 %v7849_v22, %v3445_v58  ;;  %v3448_v8 = vadd.f32 %v5476_v52, %v3189_v11  ;;  %v3744_v54 = vadd.f32 %v7747_v34, %v3705_v55 }
 0x301   : > { %v3384_v17 = vpop.f32.mrf.mxu1  ;;  %v2933_v22 = vadd.f32 %v8470_v6, %v8469_v51  ;;  %v5535_v55 = vpop.f32.mrf.mxu0 }
 0x302   : > { %v3743_v57 = vadd.f32 %v7747_v34, %v3704_v47  ;;  %v3707_v14 = vadd.f32 %v5526_v44, %v3448_v8  ;;  %v3447_v2 = vadd.f32 %v3384_v17, %v3188_v1  ;;  %5568 = vmatprep.mubr.msk.f32.mxu1 %vm1006_vm3, %v3773_v62  ;;  %v3776_v38 = vmax.f32 %v3744_v54, 0.0 }
 0x303   : > { %v5479_v21 = vpop.f32.mrf.mxu1  ;;  %5569 = vmatmul.mubr.msk.f32.gmra.mxu1 %vm1006_vm3, %v3774_v48  ;;  %v3192_v63 = vadd.f32 %v8475_v7, %v2933_v22  ;;  %v3194_v1 = vadd.f32 %v8478_v49, %v2935_v30  ;;  %v3673_v29 = vpop.f32.mrf.mxu0 }
 0x304   : > { %v3775_v46 = vmax.f32 %v3743_v57, 0.0  ;;  %v3706_v40 = vadd.f32 %v3643_v26, %v3447_v2  ;;  %v3450_v60 = vadd.f32 %v5479_v21, %v3191_v50  ;;  %v3746_v44 = vadd.f32 %v7747_v34, %v3707_v14  ;;  %v7936_v14 = vld [vmem:[%s8126_s6] ss:$0 sm:$0xff]  ;;  %v5639_v50 = vld [vmem:[%s5915_s15 + $0x8] sm:$0xff] }
 0x305   : > { %v3394_v19 = vpop.f32.mrf.mxu1 }
 0x306   : > { %v3745_v42 = vadd.f32 %v7747_v34, %v3706_v40  ;;  %v3709_v56 = vadd.f32 %v5529_v59, %v3450_v60  ;;  %v3449_v35 = vadd.f32 %v3394_v19, %v3190_v13  ;;  %5571 = vmatprep.mubr.msk.f32.mxu1 %vm1006_vm3, %v3775_v46  ;;  %v3778_v33 = vmax.f32 %v3746_v44, 0.0  ;;  %v5640_v46 = vld [vmem:[%s5915_s15] sm:$0xff] }
 0x307   : > { %v5482_v26 = vpop.f32.mrf.mxu1  ;;  %5572 = vmatmul.mubr.msk.f32.gmra.mxu1 %vm1006_vm3, %v3776_v38 }
 0x308   : > { %v3777_v41 = vmax.f32 %v3745_v42, 0.0  ;;  %v3708_v45 = vadd.f32 %v3653_v20, %v3449_v35  ;;  %v3452_v43 = vadd.f32 %v5482_v26, %v3193_v15  ;;  %v3748_v12 = vadd.f32 %v7747_v34, %v3709_v56  ;;  %v5642_v15 = vld [vmem:[%s5915_s15 + $0x10] sm:$0xff]  ;;  %v5643_v56 = vld [vmem:[%s5915_s15 + $0x28] sm:$0xff] }
 0x309   : > { %v3404_v39 = vpop.f32.mrf.mxu1 }
 0x30a   : > { %v3747_v59 = vadd.f32 %v7747_v34, %v3708_v45  ;;  %v3711_v11 = vadd.f32 %v5532_v0, %v3452_v43  ;;  %v3451_v53 = vadd.f32 %v3404_v39, %v3192_v63  ;;  %5574 = vmatprep.mubr.msk.f32.mxu1 %vm1006_vm3, %v3777_v41  ;;  %v3780_v27 = vmax.f32 %v3748_v12, 0.0  ;;  %v5641_v0 = vld [vmem:[%s5915_s15 + $0x18] sm:$0xff] }
 0x30b   : > { %v5485_v37 = vpop.f32.mrf.mxu1  ;;  %5575 = vmatmul.mubr.msk.f32.gmra.mxu1 %vm1006_vm3, %v3778_v33 }
 0x30c   : > { %v3779_v5 = vmax.f32 %v3747_v59, 0.0  ;;  %v3710_v58 = vadd.f32 %v3663_v61, %v3451_v53  ;;  %v3454_v52 = vadd.f32 %v5485_v37, %v3195_v25  ;;  %v3750_v16 = vadd.f32 %v7747_v34, %v3711_v11  ;;  %v5645_v61 = vld [vmem:[%s5915_s15 + $0x38] sm:$0xff]  ;;  %v5646_v11 = vld [vmem:[%s5915_s15 + $0x30] sm:$0xff] }
 0x30d   : > { %v3414_v31 = vpop.f32.mrf.mxu1 }
 0x30e   : > { %v3749_v62 = vadd.f32 %v7747_v34, %v3710_v58  ;;  %v3713_v47 = vadd.f32 %v5535_v55, %v3454_v52  ;;  %v3453_v8 = vadd.f32 %v3414_v31, %v3194_v1  ;;  %5577 = vmatprep.mubr.msk.f32.mxu1 %vm1006_vm3, %v3779_v5  ;;  %v3782_v20 = vmax.f32 %v3750_v16, 0.0  ;;  %v5647_v55 = vld [vmem:[%s5915_s15 + $0x48] sm:$0xff]  ;;  %v5648_v1 = vld [vmem:[%s5915_s15 + $0x40] sm:$0xff] }
 0x30f   : > { %5578 = vmatmul.mubr.msk.f32.gmra.mxu1 %vm1006_vm3, %v3780_v27 }
 0x310   : > { %v3781_v24 = vmax.f32 %v3749_v62, 0.0  ;;  %v3712_v23 = vadd.f32 %v3673_v29, %v3453_v8  ;;  %v3752_v48 = vadd.f32 %v7747_v34, %v3713_v47  ;;  %v5649_v47 = vld [vmem:[%s5915_s15 + $0x58] sm:$0xff] }
 0x312   : > { %v3751_v54 = vadd.f32 %v7747_v34, %v3712_v23  ;;  %5580 = vmatprep.mubr.msk.f32.mxu1 %vm1006_vm3, %v3781_v24  ;;  %v3784_v57 = vmax.f32 %v3752_v48, 0.0 }
 0x313   : > { %5581 = vmatmul.mubr.msk.f32.gmra.mxu1 %vm1006_vm3, %v3782_v20  ;;  %v5650_v20 = vld [vmem:[%s5915_s15 + $0x50] sm:$0xff] }
 0x314   : > { %v3783_v17 = vmax.f32 %v3751_v54, 0.0 }
 0x316   : > { %5583 = vmatprep.mubr.msk.f32.mxu1 %vm1006_vm3, %v3783_v17 }
 0x317   : > { %5584 = vmatmul.mubr.msk.f32.gmra.mxu1 %vm1006_vm3, %v3784_v57 }
 0x39b   : > { %v5540_v2 = vpop.f32.mrf.mxu1 }
 0x39c   : > { %v3961_v34 = vadd.f32 %v5540_v2, %v7936_v14  ;;  %v5651_v2 = vld [vmem:[%s5915_s15 + $0x68] sm:$0xff] }
 0x39d   : > { %v3955_v4 = vpop.f32.mrf.mxu1 }
 0x39e   : > { %v4115_v51 = vadd.f32 %v5639_v50, %v3961_v34  ;;  %v3956_v6 = vadd.f32 %v7936_v14, %v3955_v4 }
 0x39f   : > { %v5543_v22 = vpop.f32.mrf.mxu1 }
 0x3a0   : > { %v4147_v21 = vmax.f32 %v4115_v51, 0.0  ;;  %v4114_v40 = vadd.f32 %v5640_v46, %v3956_v6  ;;  %v3971_v60 = vadd.f32 %v5543_v22, %v7936_v14  ;;  %v5652_v6 = vld [vmem:[%s5915_s15 + $0x60] sm:$0xff] }
 0x3a1   : > { %v3965_v28 = vpop.f32.mrf.mxu1 }
 0x3a2   : > { %4179 = vst.msk [vmem:[%s7945_s22 + $0x8] sm:$0xff] %vm340_vm0, %v4147_v21  ;;  %v4146_v13 = vmax.f32 %v4114_v40, 0.0  ;;  %v4117_v38 = vadd.f32 %v5641_v0, %v3971_v60  ;;  %v3966_v44 = vadd.f32 %v7936_v14, %v3965_v28  ;;  %v5653_v60 = vld [vmem:[%s5915_s15 + $0x78] sm:$0xff] }
 0x3a3   : > { %v5546_v19 = vpop.f32.mrf.mxu1 }
 0x3a4   : > { %4178 = vst.msk [vmem:[%s7945_s22] sm:$0xff] %vm340_vm0, %v4146_v13  ;;  %v4149_v3 = vmax.f32 %v4117_v38, 0.0  ;;  %v4116_v10 = vadd.f32 %v5642_v15, %v3966_v44  ;;  %v3981_v32 = vadd.f32 %v5546_v19, %v7936_v14  ;;  %v5654_v44 = vld [vmem:[%s5915_s15 + $0x70] sm:$0xff] }
 0x3a5   : > { %v3975_v18 = vpop.f32.mrf.mxu1 }
 0x3a6   : > { %4181 = vst.msk [vmem:[%s7945_s22 + $0x18] sm:$0xff] %vm340_vm0, %v4149_v3  ;;  %v4148_v42 = vmax.f32 %v4116_v10, 0.0  ;;  %v4119_v35 = vadd.f32 %v5643_v56, %v3981_v32  ;;  %v3976_v26 = vadd.f32 %v7936_v14, %v3975_v18  ;;  %v5655_v32 = vld [vmem:[%s5915_s15 + $0x88] sm:$0xff] }
 0x3a7   : > { %v5549_v7 = vpop.f32.mrf.mxu1 }
 0x3a8   : > { %4180 = vst.msk [vmem:[%s7945_s22 + $0x10] sm:$0xff] %vm340_vm0, %v4148_v42  ;;  %v4151_v63 = vmax.f32 %v4119_v35, 0.0  ;;  %v4118_v30 = vadd.f32 %v5644_v9, %v3976_v26  ;;  %v3991_v41 = vadd.f32 %v5549_v7, %v7936_v14  ;;  %v5656_v26 = vld [vmem:[%s5915_s15 + $0x80] sm:$0xff] }
 0x3a9   : > { %v3985_v45 = vpop.f32.mrf.mxu1 }
 0x3aa   : > { %4183 = vst.msk [vmem:[%s7945_s22 + $0x28] sm:$0xff] %vm340_vm0, %v4151_v63  ;;  %v4150_v43 = vmax.f32 %v4118_v30, 0.0  ;;  %v4121_v33 = vadd.f32 %v5645_v61, %v3991_v41  ;;  %v3986_v12 = vadd.f32 %v7936_v14, %v3985_v45  ;;  %v5657_v41 = vld [vmem:[%s5915_s15 + $0x98] sm:$0xff] }
 0x3ab   : > { %v5552_v39 = vpop.f32.mrf.mxu1 }
 0x3ac   : > { %4182 = vst.msk [vmem:[%s7945_s22 + $0x20] sm:$0xff] %vm340_vm0, %v4150_v43  ;;  %v4153_v59 = vmax.f32 %v4121_v33, 0.0  ;;  %v4120_v53 = vadd.f32 %v5646_v11, %v3986_v12  ;;  %v4001_v36 = vadd.f32 %v5552_v39, %v7936_v14  ;;  %v5658_v12 = vld [vmem:[%s5915_s15 + $0x90] sm:$0xff] }
 0x3ad   : > { %v3995_v25 = vpop.f32.mrf.mxu1 }
 0x3ae   : > { %4185 = vst.msk [vmem:[%s7945_s22 + $0x38] sm:$0xff] %vm340_vm0, %v4153_v59  ;;  %v4152_v37 = vmax.f32 %v4120_v53, 0.0  ;;  %v4123_v5 = vadd.f32 %v5647_v55, %v4001_v36  ;;  %v3996_v58 = vadd.f32 %v7936_v14, %v3995_v25  ;;  %v5659_v36 = vld [vmem:[%s5915_s15 + $0xa8] sm:$0xff] }
 0x3af   : > { %v5555_v52 = vpop.f32.mrf.mxu1 }
 0x3b0   : > { %4184 = vst.msk [vmem:[%s7945_s22 + $0x30] sm:$0xff] %vm340_vm0, %v4152_v37  ;;  %v4155_v49 = vmax.f32 %v4123_v5, 0.0  ;;  %v4122_v27 = vadd.f32 %v5648_v1, %v3996_v58  ;;  %v4011_v16 = vadd.f32 %v5555_v52, %v7936_v14  ;;  %v5660_v58 = vld [vmem:[%s5915_s15 + $0xa0] sm:$0xff] }
 0x3b1   : > { %v4005_v31 = vpop.f32.mrf.mxu1 }
 0x3b2   : > { %4187 = vst.msk [vmem:[%s7945_s22 + $0x48] sm:$0xff] %vm340_vm0, %v4155_v49  ;;  %v4154_v62 = vmax.f32 %v4122_v27, 0.0  ;;  %v4125_v8 = vadd.f32 %v5649_v47, %v4011_v16  ;;  %v4006_v29 = vadd.f32 %v7936_v14, %v4005_v31  ;;  %v5661_v16 = vld [vmem:[%s5915_s15 + $0xb8] sm:$0xff] }
 0x3b3   : > { %v5558_v24 = vpop.f32.mrf.mxu1 }
 0x3b4   : > { %4186 = vst.msk [vmem:[%s7945_s22 + $0x40] sm:$0xff] %vm340_vm0, %v4154_v62  ;;  %v4157_v23 = vmax.f32 %v4125_v8, 0.0  ;;  %v4124_v48 = vadd.f32 %v5650_v20, %v4006_v29  ;;  %v4021_v54 = vadd.f32 %v5558_v24, %v7936_v14  ;;  %v5662_v29 = vld [vmem:[%s5915_s15 + $0xb0] sm:$0xff] }
 0x3b5   : > { %v4015_v17 = vpop.f32.mrf.mxu1 }
 0x3b6   : > { %4189 = vst.msk [vmem:[%s7945_s22 + $0x58] sm:$0xff] %vm340_vm0, %v4157_v23  ;;  %v4156_v57 = vmax.f32 %v4124_v48, 0.0  ;;  %v4127_v34 = vadd.f32 %v5651_v2, %v4021_v54  ;;  %v4016_v4 = vadd.f32 %v7936_v14, %v4015_v17  ;;  %v5663_v54 = vld [vmem:[%s5915_s15 + $0xc8] sm:$0xff] }
 0x3b7   : > { %v5561_v50 = vpop.f32.mrf.mxu1 }
 0x3b8   : > { %4188 = vst.msk [vmem:[%s7945_s22 + $0x50] sm:$0xff] %vm340_vm0, %v4156_v57  ;;  %v4159_v51 = vmax.f32 %v4127_v34, 0.0  ;;  %v4126_v22 = vadd.f32 %v5652_v6, %v4016_v4  ;;  %v4031_v21 = vadd.f32 %v5561_v50, %v7936_v14  ;;  %v5664_v4 = vld [vmem:[%s5915_s15 + $0xc0] sm:$0xff] }
 0x3b9   : > { %v4025_v46 = vpop.f32.mrf.mxu1 }
 0x3ba   : > { %4191 = vst.msk [vmem:[%s7945_s22 + $0x68] sm:$0xff] %vm340_vm0, %v4159_v51  ;;  %v4158_v40 = vmax.f32 %v4126_v22, 0.0  ;;  %v4129_v28 = vadd.f32 %v5653_v60, %v4031_v21  ;;  %v4026_v13 = vadd.f32 %v7936_v14, %v4025_v46  ;;  %v5665_v21 = vld [vmem:[%s5915_s15 + $0xd8] sm:$0xff] }
 0x3bb   : > { %v5564_v0 = vpop.f32.mrf.mxu1 }
 0x3bc   : > { %4190 = vst.msk [vmem:[%s7945_s22 + $0x60] sm:$0xff] %vm340_vm0, %v4158_v40  ;;  %v4161_v38 = vmax.f32 %v4129_v28, 0.0  ;;  %v4128_v19 = vadd.f32 %v5654_v44, %v4026_v13  ;;  %v4041_v3 = vadd.f32 %v5564_v0, %v7936_v14  ;;  %v5666_v13 = vld [vmem:[%s5915_s15 + $0xd0] sm:$0xff] }
 0x3bd   : > { %v4035_v15 = vpop.f32.mrf.mxu1 }
 0x3be   : > { %4193 = vst.msk [vmem:[%s7945_s22 + $0x78] sm:$0xff] %vm340_vm0, %v4161_v38  ;;  %v4160_v10 = vmax.f32 %v4128_v19, 0.0  ;;  %v4131_v18 = vadd.f32 %v5655_v32, %v4041_v3  ;;  %v4036_v42 = vadd.f32 %v7936_v14, %v4035_v15  ;;  %v5667_v3 = vld [vmem:[%s5915_s15 + $0xe8] sm:$0xff] }
 0x3bf   : > { %v5567_v56 = vpop.f32.mrf.mxu1 }
 0x3c0   : > { %4192 = vst.msk [vmem:[%s7945_s22 + $0x70] sm:$0xff] %vm340_vm0, %v4160_v10  ;;  %v4163_v35 = vmax.f32 %v4131_v18, 0.0  ;;  %v4130_v7 = vadd.f32 %v5656_v26, %v4036_v42  ;;  %v4051_v63 = vadd.f32 %v5567_v56, %v7936_v14  ;;  %v5668_v42 = vld [vmem:[%s5915_s15 + $0xe0] sm:$0xff] }
 0x3c1   : > { %v4045_v9 = vpop.f32.mrf.mxu1 }
 0x3c2   : > { %4195 = vst.msk [vmem:[%s7945_s22 + $0x88] sm:$0xff] %vm340_vm0, %v4163_v35  ;;  %v4162_v30 = vmax.f32 %v4130_v7, 0.0  ;;  %v4133_v45 = vadd.f32 %v5657_v41, %v4051_v63  ;;  %v4046_v43 = vadd.f32 %v7936_v14, %v4045_v9  ;;  %v5669_v63 = vld [vmem:[%s5915_s15 + $0xf8] sm:$0xff] }
 0x3c3   : > { %v5570_v61 = vpop.f32.mrf.mxu1 }
 0x3c4   : > { %4194 = vst.msk [vmem:[%s7945_s22 + $0x80] sm:$0xff] %vm340_vm0, %v4162_v30  ;;  %v4165_v33 = vmax.f32 %v4133_v45, 0.0  ;;  %v4132_v39 = vadd.f32 %v5658_v12, %v4046_v43  ;;  %v4061_v59 = vadd.f32 %v5570_v61, %v7936_v14  ;;  %v5670_v45 = vld [vmem:[%s5915_s15 + $0xf0] sm:$0xff]  ;;  %s5769_s15 = smov [#allocation5]  }
 0x3c5   : > { %v4055_v11 = vpop.f32.mrf.mxu1  ;;  %s5703_s9 = sshll.u32 %s5769_s15, 4  ;;  %s5704_s9 = int_to_ptr.vmem [resolvable:$false] %s5703_s9 }
 0x3c6   : > { %4197 = vst.msk [vmem:[%s7945_s22 + $0x98] sm:$0xff] %vm340_vm0, %v4165_v33  ;;  %v4164_v53 = vmax.f32 %v4132_v39, 0.0  ;;  %v4135_v25 = vadd.f32 %v5659_v36, %v4061_v59  ;;  %v4056_v37 = vadd.f32 %v7936_v14, %v4055_v11  ;;  %s5705_s8 = scalar_lea.vmem %s5704_s9, 8192  ;;  %p5706_p5 = scmp.lt.s32.totalorder %s8073_s23, %s5704_s9 }
 0x3c7   : > { %v5573_v55 = vpop.f32.mrf.mxu1  ;;  %p5707_p7 = scmp.lt.s32.totalorder %s5705_s8, %s5699_s21 }
 0x3c8   : > { %4196 = vst.msk [vmem:[%s7945_s22 + $0x90] sm:$0xff] %vm340_vm0, %v4164_v53  ;;  %v4167_v5 = vmax.f32 %v4135_v25, 0.0  ;;  %v4134_v52 = vadd.f32 %v5660_v58, %v4056_v37  ;;  %v4071_v49 = vadd.f32 %v5573_v55, %v7936_v14 }
 0x3c9   : > { %v4065_v1 = vpop.f32.mrf.mxu1  ;;  %p5708_p8 = por %p5707_p7, %p5706_p5 }
 0x3ca   : > { %4199 = vst.msk [vmem:[%s7945_s22 + $0xa8] sm:$0xff] %vm340_vm0, %v4167_v5  ;;  %v4166_v27 = vmax.f32 %v4134_v52, 0.0  ;;  %v4137_v31 = vadd.f32 %v5661_v16, %v4071_v49  ;;  %v4066_v62 = vadd.f32 %v7936_v14, %v4065_v1 }
 0x3cb   : > { %v5576_v47 = vpop.f32.mrf.mxu1  ;;  %p5709_p10 = pnand %p5708_p8, %p5702_p4 }
 0x3cc   : > { %4198 = vst.msk [vmem:[%s7945_s22 + $0xa0] sm:$0xff] %vm340_vm0, %v4166_v27  ;;  %v4169_v8 = vmax.f32 %v4137_v31, 0.0  ;;  %v4136_v24 = vadd.f32 %v5662_v29, %v4066_v62  ;;  %v4081_v23 = vadd.f32 %v5576_v47, %v7936_v14 }
 0x3cd   : > { %v4075_v20 = vpop.f32.mrf.mxu1 }
 0x3ce   : > { %4201 = vst.msk [vmem:[%s7945_s22 + $0xb8] sm:$0xff] %vm340_vm0, %v4169_v8  ;;  %v4168_v48 = vmax.f32 %v4136_v24, 0.0  ;;  %v4139_v17 = vadd.f32 %v5663_v54, %v4081_v23  ;;  %v4076_v57 = vadd.f32 %v7936_v14, %v4075_v20 }
 0x3cf   : > { %v5579_v2 = vpop.f32.mrf.mxu1 }
 0x3d0   : > { %4200 = vst.msk [vmem:[%s7945_s22 + $0xb0] sm:$0xff] %vm340_vm0, %v4168_v48  ;;  %v4171_v34 = vmax.f32 %v4139_v17, 0.0  ;;  %v4138_v50 = vadd.f32 %v5664_v4, %v4076_v57  ;;  %v4091_v51 = vadd.f32 %v5579_v2, %v7936_v14 }
 0x3d1   : > { %v4085_v6 = vpop.f32.mrf.mxu1 }
 0x3d2   : > { %4203 = vst.msk [vmem:[%s7945_s22 + $0xc8] sm:$0xff] %vm340_vm0, %v4171_v34  ;;  %v4170_v22 = vmax.f32 %v4138_v50, 0.0  ;;  %v4141_v46 = vadd.f32 %v5665_v21, %v4091_v51  ;;  %v4086_v40 = vadd.f32 %v7936_v14, %v4085_v6 }
 0x3d3   : > { %v5582_v60 = vpop.f32.mrf.mxu1 }
 0x3d4   : > { %4202 = vst.msk [vmem:[%s7945_s22 + $0xc0] sm:$0xff] %vm340_vm0, %v4170_v22  ;;  %v4173_v28 = vmax.f32 %v4141_v46, 0.0  ;;  %v4140_v0 = vadd.f32 %v5666_v13, %v4086_v40  ;;  %v4101_v38 = vadd.f32 %v5582_v60, %v7936_v14 }
 0x3d5   : > { %v4095_v44 = vpop.f32.mrf.mxu1 }
 0x3d6   : > { %4205 = vst.msk [vmem:[%s7945_s22 + $0xd8] sm:$0xff] %vm340_vm0, %v4173_v28  ;;  %v4172_v19 = vmax.f32 %v4140_v0, 0.0  ;;  %v4143_v15 = vadd.f32 %v5667_v3, %v4101_v38  ;;  %v4096_v10 = vadd.f32 %v7936_v14, %v4095_v44 }
 0x3d7   : > { %v5585_v32 = vpop.f32.mrf.mxu1 }
 0x3d8   : > { %4204 = vst.msk [vmem:[%s7945_s22 + $0xd0] sm:$0xff] %vm340_vm0, %v4172_v19  ;;  %v4175_v18 = vmax.f32 %v4143_v15, 0.0  ;;  %v4142_v56 = vadd.f32 %v5668_v42, %v4096_v10  ;;  %v4111_v35 = vadd.f32 %v5585_v32, %v7936_v14 }
 0x3d9   : > { %v4105_v26 = vpop.f32.mrf.mxu1 }
 0x3da   : > { %4207 = vst.msk [vmem:[%s7945_s22 + $0xe8] sm:$0xff] %vm340_vm0, %v4175_v18  ;;  %v4174_v7 = vmax.f32 %v4142_v56, 0.0  ;;  %v4145_v9 = vadd.f32 %v5669_v63, %v4111_v35  ;;  %v4106_v30 = vadd.f32 %v7936_v14, %v4105_v26 }
 0x3dc   : > { %4206 = vst.msk [vmem:[%s7945_s22 + $0xe0] sm:$0xff] %vm340_vm0, %v4174_v7  ;;  %v4177_v41 = vmax.f32 %v4145_v9, 0.0  ;;  %v4144_v43 = vadd.f32 %v5670_v45, %v4106_v30 }
 0x3de   : > { %4209 = vst.msk [vmem:[%s7945_s22 + $0xf8] sm:$0xff] %vm340_vm0, %v4177_v41  ;;  %v4176_v14 = vmax.f32 %v4144_v43, 0.0 }
 0x3e0   : > { %4208 = vst.msk [vmem:[%s7945_s22 + $0xf0] sm:$0xff] %vm340_vm0, %v4176_v14 }
 0x3e1   : > { %5712 = shalt.err (!%p5709_p10)
}
 0x3e2   : > { %s5713_s16 = scalar_lea.hbm %s8071_s12, 4096  ;;  %s5717_s22 = scalar_lea.hbm %s8127_s7, 8192 }
 0x3e3   : > { %p5714_p0 = scmp.ne.s32.totalorder %s8071_s12, %s5713_s16  ;;  %p5718_p1 = scmp.lt.s32.totalorder %s8071_s12, %s8127_s7 }
 0x3e4   : > { %p5719_p3 = scmp.lt.s32.totalorder %s5717_s22, %s5713_s16 }
 0x3e5   : > { %p5715_p2 = pnand %p5714_p0, %p8479_p12 }
 0x3e6   : > { %p5720_p6 = por %p5719_p3, %p5718_p1 }
 0x3e7   : > { %p5716_p9 = pneg %p5715_p2 }
 0x3e9   : > { %p5721_p11 = pnand %p5720_p6, %p5716_p9 }
 0x3eb   : > { %5724 = shalt.err (!%p5721_p11)
}
 0x3ec   : > { %s5770_s19 = smov 128   ;;  %s5771_s21 = smov 8  }
 0x3ed   : > { %5590 = dma.vmem_to_hbm [thread:$0]  (%p8479_p12), %s8073_s23, 4096, %s8071_s12, %s4211_s28, %s5770_s19, %s5770_s19, %s5771_s21  }
 0x3ee PF: > { %s4239_s15 = sand.u32 1, %s5751_s24   ;;  %p8480_p13 = scmp.ne.s32.totalorder %s8222_s14, 0 }
 0x3ef   : > { %p8481_p4 = scmp.ge.s32.totalorder %s5763_s27, 2  ;;  %s4240_s9 = scalar_lea.sflag [#allocation4], %s4239_s15 }
 0x3f1   : > { %p5597_p5 = pnand %p8481_p4, %p8480_p13 }
 0x3f3   : > { %p5598_p7 = pneg %p5597_p5 }
 0x3f5   : > { %5746 = dma.done.wait (%p5598_p7), %s4240_s9, 4096  }
 0x3f6   : > { %5748 = vsyncadd (%p5598_p7), %s4240_s9, 4294963200  ;;  %p20_p8 = scmp.ge.s32.totalorder %s5837_s30, 4   ;;  %s8482_s24 = smov %s5755_s25 }
 0x3f7   : > { %s8483_s25 = smov %s5759_s26  ;;  %s8484_s26 = smov %s5849_s10 }
 0x3f8   : > { %s8485_s27 = smov %s5837_s30  ;;  %22 = sbr.rel (!%p20_p8) target bundleno = 5 (0x5), region = 101 }
 0x3fd   :  { %4245 = vsyncpa [#allocation3], 1 }
 0x3fe   :  { %4247 = vsyncpa [#allocation3 + $0x1], 1 }
 0x3ff   :  { %4248 = vsyncpa [#allocation4], 1 }
 0x400   :  { %4250 = vsyncpa [#allocation4 + $0x1], 1 }

</bundles_post_ra>
